<compile_context>
chip_gen: v6e
topology: v6e:2x2x1
jax: 0.10.0
libtpu: 0.0.40
codegen_flags: <defaults>
</compile_context>

<pallas_src>
import numpy as np
import jax
import jax.numpy as jnp
from jax import lax
from jax.experimental import pallas as pl
from jax.experimental.pallas import tpu as pltpu

_LANES = 128


def _round_up(x, m):
    return -(-x // m) * m


# ---------------------------------------------------------------------------
# Kernel factory: one MotionDiscriminator at a single scale.
# Grid = (batch_tiles, num_layers); the layer axis is the inner "arbitrary" axis.
# ---------------------------------------------------------------------------
def _make_motion_disc_kernel(T, T_s, pool_factor, cin, H, num_layers,
                             maxd_pad, packed_conv):
    f32, bf16 = jnp.float32, jnp.bfloat16
    dilations = [2 ** i for i in range(num_layers)]

    def kernel(x_ref, pool_ref, win_ref, bin_ref, lngin_ref, lnbin_ref,
               convw_ref, convb_ref, lng_ref, lnb_ref,
               attw_ref, attb_ref, ow1_ref, ob1_ref, ow2_ref, ob2_ref,
               out_ref, h_ref, hpad_ref, left_ref, right_ref):
        Bt = h_ref.shape[0]
        l = pl.program_id(1)

        def leaky(v):                                   # F.leaky_relu(v, 0.2)
            return jnp.where(v > 0, v, 0.2 * v)

        def layernorm(v, g, b):                         # nn.LayerNorm(H), eps=1e-5
            mu = jnp.mean(v, axis=-1, keepdims=True)
            var = jnp.mean(jnp.square(v - mu), axis=-1, keepdims=True)
            return (v - mu) * lax.rsqrt(var + 1e-5) * g + b

        def mm(v2d, w_bf16):                            # bf16 MXU, f32 accumulation
            return jnp.dot(v2d.astype(bf16), w_bf16, preferred_element_type=f32)

        # -------- layer 0: zero pad bands, downsample + input_proj --------
        @pl.when(l == 0)
        def _init():
            # Zero only the two pad bands; the middle band is rewritten every conv.
            hpad_ref[:, :maxd_pad, :] = jnp.zeros((Bt, maxd_pad, H), f32)
            hpad_ref[:, maxd_pad + T_s:, :] = jnp.zeros((Bt, maxd_pad, H), f32)

            # Linear projection at full T, then (for downsampled scales) apply the
            # AvgPool1d(2,2)**s averaging matrix as a lane-dense (T_s,T)@(T,H) matmul
            # (Pool(x) @ W == Pool(x @ W)).  PyTorch floor-length semantics are baked
            # into the matrix built by the wrapper.
            z = mm(x_ref[...].reshape(Bt * T, cin), win_ref[...]).reshape(Bt, T, H)
            if pool_factor == 1:
                h0 = z
            else:
                P = pool_ref[...]                        # (T_s, T) bf16 (exact 1/2, 1/4)
                zb = z.astype(bf16)
                for b in range(Bt):                      # Bt is small (<= batch_tile)
                    h_ref[b] = jnp.dot(P, zb[b], preferred_element_type=f32)
                h0 = h_ref[...]
            h0 = h0 + bin_ref[...]
            h_ref[...] = leaky(layernorm(h0, lngin_ref[...], lnbin_ref[...]))

        # -------- ResBlock `l`, dilation 2**l --------
        def dconv(v, c):
            """k=3 dilated Conv1d, padding='same': taps x[t-d], x[t], x[t+d]."""
            hpad_ref[:, maxd_pad:maxd_pad + T_s, :] = v
            # Select this layer's dilation with static slices (exactly one branch runs).
            for i, di in enumerate(dilations):
                @pl.when(l == i)
                def _(di=di):
                    left_ref[...] = hpad_ref[:, maxd_pad - di:maxd_pad - di + T_s, :]
                    right_ref[...] = hpad_ref[:, maxd_pad + di:maxd_pad + di + T_s, :]
            w = convw_ref[c]                             # (3H, H) bf16, streamed per layer
            if packed_conv:                              # H lane-aligned: one fused matmul
                pk = jnp.concatenate([left_ref[...], v, right_ref[...]], axis=-1)
                y = mm(pk.reshape(Bt * T_s, 3 * H), w)
            else:                                        # three accumulating (H,H) matmuls
                y = mm(left_ref[...].reshape(Bt * T_s, H), w[:H, :])
                y = y + mm(v.reshape(Bt * T_s, H), w[H:2 * H, :])
                y = y + mm(right_ref[...].reshape(Bt * T_s, H), w[2 * H:, :])
            return y.reshape(Bt, T_s, H) + convb_ref[c]  # bias as matmul epilogue

        res = h_ref[...]
        y = dconv(res, 0)
        y = leaky(layernorm(y, lng_ref[0], lnb_ref[0]))
        y = dconv(y, 1)
        y = layernorm(y, lng_ref[1], lnb_ref[1])
        h = leaky(y + res)
        h_ref[...] = h

        # -------- last layer: attention pooling + output head --------
        @pl.when(l == num_layers - 1)
        def _finalize():
            s = jnp.sum(h * attw_ref[...], axis=-1, keepdims=True) + attb_ref[...]
            m = jnp.max(s, axis=1, keepdims=True)        # softmax over time (dim=1)
            e = jnp.exp(s - m)
            attn = e * pl.reciprocal(jnp.sum(e, axis=1, keepdims=True), approx=True)
            pooled = jnp.sum(h * attn, axis=1)           # (Bt, H)
            o = leaky(mm(pooled, ow1_ref[...]) + ob1_ref[...])
            logit = jnp.sum(o * ow2_ref[...], axis=-1, keepdims=True) + ob2_ref[...]
            out_ref[...] = jnp.broadcast_to(logit, out_ref.shape).astype(out_ref.dtype)

    return kernel


# ---------------------------------------------------------------------------
# Wrapper
# ---------------------------------------------------------------------------
def _avg_pool_matrix(T, factor):
    """Matrix form of AvgPool1d(2,2) applied log2(factor) times (PyTorch floor
    lengths): row t averages frames [t*factor, (t+1)*factor)."""
    T_s = T // factor
    m = np.zeros((T_s, T), np.float32)
    for t in range(T_s):
        m[t, t * factor:(t + 1) * factor] = 1.0 / factor
    return jnp.asarray(m, jnp.bfloat16)                  # 1/2, 1/4 are exact in bf16


def _vmem_limit_bytes(tb, T, T_s, cin, H, maxd_pad):
    def n(*shape):
        r = 1
        for s in shape:
            r *= s
        return r
    est = (2 * n(tb, T, cin) * 4               # x block (double-buffered)
           + n(T_s, T) * 2                     # pooling matrix (bf16)
           + 2 * n(2, 3 * H, H) * 2            # streamed per-layer conv weights (bf16)
           + 2 * 3 * n(2, 1, H) * 4            # per-layer conv bias + LN params
           + (n(cin, H) + n(H, H)) * 2         # resident input-proj / head fc1 (bf16)
           + 8 * n(1, H) * 4                   # small resident vectors
           + (3 * n(tb, T_s, H) + n(tb, T_s + 2 * maxd_pad, H)) * 4   # VMEM scratch
           + 2 * n(tb, _LANES) * 4)            # output block
    # 4x headroom for compiler-internal copies; floor at the default scoped limit.
    # TODO(synk): on v7x (64 MiB physical VMEM) shrink batch_tile if 4*est > ~56 MiB.
    return int(max(32 * 2 ** 20, min(96 * 2 ** 20, 4 * est)))


def multi_scale_motion_discriminator(x, params, *, batch_tile=None):
    """Matches MultiScaleMotionDiscriminator.forward: (B, T, Cin) -> (B, 3) logits.
    (The per-scale `features` lists of the PyTorch module are internal only.)"""
    B, T, cin = x.shape
    num_scales = params["win"].shape[0]
    H = params["win"].shape[-1]
    num_layers = params["convw"].shape[1]
    maxd_pad = _round_up(2 ** (num_layers - 1), 8)       # sublane-aligned pad width
    packed_conv = (H % 128 == 0)

    assert T // 2 ** (num_scales - 1) >= 1, "sequence too short for the deepest scale"
    if batch_tile is None:
        batch_tile = 8 if B % 8 == 0 else B
    tb = batch_tile
    assert B % tb == 0 and (tb % 8 == 0 or tb == B), \
        "batch_tile must tile B and satisfy the (8,128) output-block rule"

    logits = []
    for s in range(num_scales):
        f = 2 ** s
        T_s = T // f
        pool = _avg_pool_matrix(T, f) if f > 1 else jnp.zeros((1, 1), jnp.bfloat16)
        p = {k: v[s] for k, v in params.items()}
        kernel = _make_motion_disc_kernel(T, T_s, f, cin, H, num_layers,
                                          maxd_pad, packed_conv)

        def const(shape):
            nd = len(shape)
            return pl.BlockSpec(shape, lambda bi, l, _nd=nd: (0,) * _nd)

        def per_layer(tail):                             # streamed along the layer axis
            nd = len(tail)
            return pl.BlockSpec((None,) + tail, lambda bi, l, _nd=nd: (l,) + (0,) * _nd)

        in_specs = [
            pl.BlockSpec((tb, T, cin), lambda bi, l: (bi, 0, 0)),   # x (fetched once / tile)
            const(pool.shape),                                      # pooling matrix
            const((cin, H)), const((1, H)),                         # input_proj W (bf16), b
            const((1, H)), const((1, H)),                           # input LN gamma, beta
            per_layer((2, 3 * H, H)),                               # conv W (bf16), per layer
            per_layer((2, 1, H)),                                   # conv bias
            per_layer((2, 1, H)), per_layer((2, 1, H)),             # conv LN gamma, beta
            const((1, H)), const((1, 1)),                           # attention W, b
            const((H, H)), const((1, H)),                           # head fc1 W (bf16), b
            const((1, H)), const((1, 1)),                           # head fc2 W, b
        ]

        out = pl.pallas_call(
            kernel,
            out_shape=jax.ShapeDtypeStruct((B, _LANES), jnp.float32),
            grid=(B // tb, num_layers),
            in_specs=in_specs,
            out_specs=pl.BlockSpec((tb, _LANES), lambda bi, l: (bi, 0)),
            scratch_shapes=[
                pltpu.VMEM((tb, T_s, H), jnp.float32),                  # h (residual state)
                pltpu.VMEM((tb, T_s + 2 * maxd_pad, H), jnp.float32),   # zero-padded conv buf
                pltpu.VMEM((tb, T_s, H), jnp.float32),                  # left tap x[t-d]
                pltpu.VMEM((tb, T_s, H), jnp.float32),                  # right tap x[t+d]
            ],
            compiler_params=pltpu.CompilerParams(
                dimension_semantics=("parallel", "arbitrary"),
                vmem_limit_bytes=_vmem_limit_bytes(tb, T, T_s, cin, H, maxd_pad),
            ),
        )(x, pool,
          p["win"], p["bin"], p["lngin"], p["lnbin"],
          p["convw"], p["convb"], p["lng"], p["lnb"],
          p["attw"], p["attb"], p["ow1"], p["ob1"], p["ow2"], p["ob2"])

        logits.append(out[:, 0])              # lane 0 of the lane-dense block

    return jnp.stack(logits, axis=1)          # == torch.cat(results, dim=1) -> (B, 3)


# ---------------------------------------------------------------------------
# Deterministic synthetic parameters (shapes follow the PyTorch __init__),
# stacked over the 3 per-scale discriminators.
#
# To load real PyTorch weights:
#  * nn.Linear weight (out,in) -> transpose to (in,out); bias -> (1,out).
#  * nn.Conv1d weight w (H, H, 3), padding='same': tap k multiplies x[t+(k-1)*d];
#    pack concat([w[:,:,0].T, w[:,:,1].T, w[:,:,2].T], 0) -> (3H, H) at
#    convw[scale, layer, conv_idx].
#  * Matmul weights (win, convw, ow1) are stored in bf16; everything applied on
#    the VPU (biases, LayerNorm, attention / logit vectors) stays f32.
# ---------------------------------------------------------------------------
def init_params(key, num_scales, cin, hidden, num_layers):
    ks = jax.random.split(key, 6)
    sc = 0.1
    S, H, L = num_scales, hidden, num_layers
    f32, bf16 = jnp.float32, jnp.bfloat16
    return {
        "win":   (jax.random.normal(ks[0], (S, cin, H), f32) * sc).astype(bf16),
        "bin":   jnp.zeros((S, 1, H), f32),
        "lngin": jnp.ones((S, 1, H), f32),
        "lnbin": jnp.zeros((S, 1, H), f32),
        "convw": (jax.random.normal(ks[1], (S, L, 2, 3 * H, H), f32) * sc).astype(bf16),
        "convb": jax.random.normal(ks[2], (S, L, 2, 1, H), f32) * 0.01,
        "lng":   jnp.ones((S, L, 2, 1, H), f32),
        "lnb":   jnp.zeros((S, L, 2, 1, H), f32),
        "attw":  jax.random.normal(ks[3], (S, 1, H), f32) * sc,
        "attb":  jnp.zeros((S, 1, 1), f32),
        "ow1":   (jax.random.normal(ks[4], (S, H, H), f32) * sc).astype(bf16),
        "ob1":   jnp.zeros((S, 1, H), f32),
        "ow2":   jax.random.normal(ks[5], (S, 1, H), f32) * sc,
        "ob2":   jnp.zeros((S, 1, 1), f32),
    }


if __name__ == "__main__":
    # cfg: input_channels=4, hidden_dim=32, num_layers=4 (small test shapes)
    B, T, CIN, HIDDEN, NUM_LAYERS, NUM_SCALES = 2, 8, 4, 32, 4, 3

    key = jax.random.PRNGKey(0)
    kx, kp = jax.random.split(key)
    x = jax.random.normal(kx, (B, T, CIN), jnp.float32)
    params = init_params(kp, NUM_SCALES, CIN, HIDDEN, NUM_LAYERS)

    fwd = jax.jit(lambda xv: multi_scale_motion_discriminator(xv, params))
    out = jax.block_until_ready(fwd(x))

    assert out.shape == (B, NUM_SCALES), out.shape
    assert bool(jnp.all(jnp.isfinite(out)))
    print("KERNEL_OK")
</pallas_src>

<mosaic_0001>
module attributes {stable_mosaic.version = 11 : i64} {
  func.func @kernel(%arg0: i32, %arg1: i32, %arg2: memref<2x8x4xf32, #tpu.memory_space<vmem>>, %arg3: memref<2x8xbf16, #tpu.memory_space<vmem>>, %arg4: memref<4x32xbf16, #tpu.memory_space<vmem>>, %arg5: memref<1x32xf32, #tpu.memory_space<vmem>>, %arg6: memref<1x32xf32, #tpu.memory_space<vmem>>, %arg7: memref<1x32xf32, #tpu.memory_space<vmem>>, %arg8: memref<1x2x96x32xbf16, #tpu.memory_space<vmem>>, %arg9: memref<1x2x1x32xf32, #tpu.memory_space<vmem>>, %arg10: memref<1x2x1x32xf32, #tpu.memory_space<vmem>>, %arg11: memref<1x2x1x32xf32, #tpu.memory_space<vmem>>, %arg12: memref<1x32xf32, #tpu.memory_space<vmem>>, %arg13: memref<1x1xf32, #tpu.memory_space<vmem>>, %arg14: memref<32x32xbf16, #tpu.memory_space<vmem>>, %arg15: memref<1x32xf32, #tpu.memory_space<vmem>>, %arg16: memref<1x32xf32, #tpu.memory_space<vmem>>, %arg17: memref<1x1xf32, #tpu.memory_space<vmem>>, %arg18: memref<2x128xf32, #tpu.memory_space<vmem>>, %arg19: memref<2x2x32xf32, #tpu.memory_space<vmem>>, %arg20: memref<2x18x32xf32, #tpu.memory_space<vmem>>, %arg21: memref<2x2x32xf32, #tpu.memory_space<vmem>>, %arg22: memref<2x2x32xf32, #tpu.memory_space<vmem>>) attributes {dimension_semantics = [#tpu.dimension_semantics<parallel>, #tpu.dimension_semantics<arbitrary>], iteration_bounds = array<i64: 1, 4>, scalar_prefetch = 0 : i64, scratch_operands = 4 : i64, tpu.core_type = #tpu.core_type<tc>, window_params = [{transform_indices = @transform_0, window_bounds = array<i64: 2, 8, 4>}, {pipeline_mode = #tpu.pipeline_mode<synchronous>, transform_indices = @transform_1, window_bounds = array<i64: 2, 8>}, {pipeline_mode = #tpu.pipeline_mode<synchronous>, transform_indices = @transform_2, window_bounds = array<i64: 4, 32>}, {pipeline_mode = #tpu.pipeline_mode<synchronous>, transform_indices = @transform_3, window_bounds = array<i64: 1, 32>}, {pipeline_mode = #tpu.pipeline_mode<synchronous>, transform_indices = @transform_4, window_bounds = array<i64: 1, 32>}, {pipeline_mode = #tpu.pipeline_mode<synchronous>, transform_indices = @transform_5, window_bounds = array<i64: 1, 32>}, {transform_indices = @transform_6, window_bounds = array<i64: 1, 2, 96, 32>}, {transform_indices = @transform_7, window_bounds = array<i64: 1, 2, 1, 32>}, {transform_indices = @transform_8, window_bounds = array<i64: 1, 2, 1, 32>}, {transform_indices = @transform_9, window_bounds = array<i64: 1, 2, 1, 32>}, {pipeline_mode = #tpu.pipeline_mode<synchronous>, transform_indices = @transform_10, window_bounds = array<i64: 1, 32>}, {pipeline_mode = #tpu.pipeline_mode<synchronous>, transform_indices = @transform_11, window_bounds = array<i64: 1, 1>}, {pipeline_mode = #tpu.pipeline_mode<synchronous>, transform_indices = @transform_12, window_bounds = array<i64: 32, 32>}, {pipeline_mode = #tpu.pipeline_mode<synchronous>, transform_indices = @transform_13, window_bounds = array<i64: 1, 32>}, {pipeline_mode = #tpu.pipeline_mode<synchronous>, transform_indices = @transform_14, window_bounds = array<i64: 1, 32>}, {pipeline_mode = #tpu.pipeline_mode<synchronous>, transform_indices = @transform_15, window_bounds = array<i64: 1, 1>}, {transform_indices = @transform_16, window_bounds = array<i64: 2, 128>}]} {
    %c0_i32 = arith.constant 0 : i32
    %0 = arith.cmpi eq, %arg1, %c0_i32 : i32
    %1 = arith.extui %0 : i1 to i32
    %c0_i32_0 = arith.constant 0 : i32
    %2 = arith.cmpi ne, %1, %c0_i32_0 : i32
    scf.if %2 {
      %cst_88 = arith.constant 0.000000e+00 : f32
      %149 = vector.broadcast %cst_88 : f32 to vector<2x8x32xf32>
      %c0_89 = arith.constant 0 : index
      %c0_90 = arith.constant 0 : index
      %c0_91 = arith.constant 0 : index
      %150 = vector.load %arg20[%c0_89, %c0_90, %c0_91] : memref<2x18x32xf32, #tpu.memory_space<vmem>>, vector<2x8x32xf32>
      tpu.vector_store %arg20[%c0_89, %c0_90, %c0_91], %149 {strides = array<i32>} : memref<2x18x32xf32, #tpu.memory_space<vmem>>, vector<2x8x32xf32>,
      %cst_92 = arith.constant 0.000000e+00 : f32
      %151 = vector.broadcast %cst_92 : f32 to vector<2x8x32xf32>
      %c0_93 = arith.constant 0 : index
      %c10 = arith.constant 10 : index
      %c0_94 = arith.constant 0 : index
      %152 = vector.load %arg20[%c0_93, %c10, %c0_94] : memref<2x18x32xf32, #tpu.memory_space<vmem>>, vector<2x8x32xf32>
      tpu.vector_store %arg20[%c0_93, %c10, %c0_94], %151 {strides = array<i32>} : memref<2x18x32xf32, #tpu.memory_space<vmem>>, vector<2x8x32xf32>,
      %c0_95 = arith.constant 0 : index
      %c0_96 = arith.constant 0 : index
      %c0_97 = arith.constant 0 : index
      %153 = vector.load %arg2[%c0_95, %c0_96, %c0_97] : memref<2x8x4xf32, #tpu.memory_space<vmem>>, vector<2x8x4xf32>
      %154 = vector.shape_cast %153 : vector<2x8x4xf32> to vector<16x4xf32>
      %c0_98 = arith.constant 0 : index
      %c0_99 = arith.constant 0 : index
      %155 = vector.load %arg4[%c0_98, %c0_99] : memref<4x32xbf16, #tpu.memory_space<vmem>>, vector<4x32xbf16>
      %156 = arith.truncf %154 : vector<16x4xf32> to vector<16x4xbf16>
      %cst_100 = arith.constant dense<0.000000e+00> : vector<16x32xf32>
      %157 = tpu.matmul %156, %155, %cst_100 {dimension_numbers = #tpu.dot_dimension_numbers<[1], [0], [0], [1], [0, 0, 1, 1], [], []>} : vector<16x4xbf16>, vector<4x32xbf16>, vector<16x32xf32> -> vector<16x32xf32>
      %158 = vector.shape_cast %157 : vector<16x32xf32> to vector<2x8x32xf32>
      %c0_101 = arith.constant 0 : index
      %c0_102 = arith.constant 0 : index
      %159 = vector.load %arg3[%c0_101, %c0_102] : memref<2x8xbf16, #tpu.memory_space<vmem>>, vector<2x8xbf16>
      %160 = arith.truncf %158 : vector<2x8x32xf32> to vector<2x8x32xbf16>
      %161 = vector.extract_strided_slice %160 {offsets = [0, 0, 0], sizes = [1, 8, 32], strides = [1, 1, 1]} : vector<2x8x32xbf16> to vector<1x8x32xbf16>
      %162 = vector.shape_cast %161 : vector<1x8x32xbf16> to vector<8x32xbf16>
      %cst_103 = arith.constant dense<0.000000e+00> : vector<2x32xf32>
      %163 = tpu.matmul %159, %162, %cst_103 {dimension_numbers = #tpu.dot_dimension_numbers<[1], [0], [0], [1], [0, 0, 1, 1], [], []>} : vector<2x8xbf16>, vector<8x32xbf16>, vector<2x32xf32> -> vector<2x32xf32>
      %c0_104 = arith.constant 0 : index
      %c0_105 = arith.constant 0 : index
      %c0_106 = arith.constant 0 : index
      %164 = vector.load %arg19[%c0_104, %c0_105, %c0_106] : memref<2x2x32xf32, #tpu.memory_space<vmem>>, vector<1x2x32xf32>
      %165 = vector.shape_cast %164 : vector<1x2x32xf32> to vector<2x32xf32>
      %166 = vector.shape_cast %163 : vector<2x32xf32> to vector<1x2x32xf32>
      tpu.vector_store %arg19[%c0_104, %c0_105, %c0_106], %166 {strides = array<i32>} : memref<2x2x32xf32, #tpu.memory_space<vmem>>, vector<1x2x32xf32>,
      %167 = vector.extract_strided_slice %160 {offsets = [1, 0, 0], sizes = [1, 8, 32], strides = [1, 1, 1]} : vector<2x8x32xbf16> to vector<1x8x32xbf16>
      %168 = vector.shape_cast %167 : vector<1x8x32xbf16> to vector<8x32xbf16>
      %cst_107 = arith.constant dense<0.000000e+00> : vector<2x32xf32>
      %169 = tpu.matmul %159, %168, %cst_107 {dimension_numbers = #tpu.dot_dimension_numbers<[1], [0], [0], [1], [0, 0, 1, 1], [], []>} : vector<2x8xbf16>, vector<8x32xbf16>, vector<2x32xf32> -> vector<2x32xf32>
      %c1_108 = arith.constant 1 : index
      %c0_109 = arith.constant 0 : index
      %c0_110 = arith.constant 0 : index
      %170 = vector.load %arg19[%c1_108, %c0_109, %c0_110] : memref<2x2x32xf32, #tpu.memory_space<vmem>>, vector<1x2x32xf32>
      %171 = vector.shape_cast %170 : vector<1x2x32xf32> to vector<2x32xf32>
      %172 = vector.shape_cast %169 : vector<2x32xf32> to vector<1x2x32xf32>
      tpu.vector_store %arg19[%c1_108, %c0_109, %c0_110], %172 {strides = array<i32>} : memref<2x2x32xf32, #tpu.memory_space<vmem>>, vector<1x2x32xf32>,
      %c0_111 = arith.constant 0 : index
      %c0_112 = arith.constant 0 : index
      %c0_113 = arith.constant 0 : index
      %173 = vector.load %arg19[%c0_111, %c0_112, %c0_113] : memref<2x2x32xf32, #tpu.memory_space<vmem>>, vector<2x2x32xf32>
      %c0_114 = arith.constant 0 : index
      %c0_115 = arith.constant 0 : index
      %174 = vector.load %arg5[%c0_114, %c0_115] : memref<1x32xf32, #tpu.memory_space<vmem>>, vector<1x32xf32>
      %175 = vector.shape_cast %174 : vector<1x32xf32> to vector<1x1x32xf32>
      %176 = vector.broadcast %175 : vector<1x1x32xf32> to vector<2x2x32xf32>
      %177 = arith.addf %173, %176 : vector<2x2x32xf32>
      %c0_116 = arith.constant 0 : index
      %c0_117 = arith.constant 0 : index
      %178 = vector.load %arg6[%c0_116, %c0_117] : memref<1x32xf32, #tpu.memory_space<vmem>>, vector<1x32xf32>
      %c0_118 = arith.constant 0 : index
      %c0_119 = arith.constant 0 : index
      %179 = vector.load %arg7[%c0_118, %c0_119] : memref<1x32xf32, #tpu.memory_space<vmem>>, vector<1x32xf32>
      %cst_120 = arith.constant dense<0.000000e+00> : vector<2x2xf32>
      %180 = vector.multi_reduction <add>, %177, %cst_120 [2] : vector<2x2x32xf32> to vector<2x2xf32>
      %181 = vector.shape_cast %180 : vector<2x2xf32> to vector<2x2x1xf32>
      %cst_121 = arith.constant 3.200000e+01 : f32
      %182 = vector.broadcast %cst_121 : f32 to vector<2x2x1xf32>
      %183 = arith.divf %181, %182 : vector<2x2x1xf32>
      %184 = vector.broadcast %183 : vector<2x2x1xf32> to vector<2x2x32xf32>
      %185 = arith.subf %177, %184 : vector<2x2x32xf32>
      %186 = arith.mulf %185, %185 : vector<2x2x32xf32>
      %cst_122 = arith.constant dense<0.000000e+00> : vector<2x2xf32>
      %187 = vector.multi_reduction <add>, %186, %cst_122 [2] : vector<2x2x32xf32> to vector<2x2xf32>
      %188 = vector.shape_cast %187 : vector<2x2xf32> to vector<2x2x1xf32>
      %cst_123 = arith.constant 3.200000e+01 : f32
      %189 = vector.broadcast %cst_123 : f32 to vector<2x2x1xf32>
      %190 = arith.divf %188, %189 : vector<2x2x1xf32>
      %191 = vector.broadcast %183 : vector<2x2x1xf32> to vector<2x2x32xf32>
      %192 = arith.subf %177, %191 : vector<2x2x32xf32>
      %cst_124 = arith.constant 9.99999974E-6 : f32
      %193 = vector.broadcast %cst_124 : f32 to vector<2x2x1xf32>
      %194 = arith.addf %190, %193 : vector<2x2x1xf32>
      %195 = math.rsqrt %194 : vector<2x2x1xf32>
      %196 = vector.broadcast %195 : vector<2x2x1xf32> to vector<2x2x32xf32>
      %197 = arith.mulf %192, %196 : vector<2x2x32xf32>
      %198 = vector.shape_cast %178 : vector<1x32xf32> to vector<1x1x32xf32>
      %199 = vector.broadcast %198 : vector<1x1x32xf32> to vector<2x2x32xf32>
      %200 = arith.mulf %197, %199 : vector<2x2x32xf32>
      %201 = vector.shape_cast %179 : vector<1x32xf32> to vector<1x1x32xf32>
      %202 = vector.broadcast %201 : vector<1x1x32xf32> to vector<2x2x32xf32>
      %203 = arith.addf %200, %202 : vector<2x2x32xf32>
      %cst_125 = arith.constant 0.000000e+00 : f32
      %204 = vector.broadcast %cst_125 : f32 to vector<2x2x32xf32>
      %205 = arith.cmpf ogt, %203, %204 : vector<2x2x32xf32>
      %cst_126 = arith.constant 2.000000e-01 : f32
      %206 = vector.broadcast %cst_126 : f32 to vector<2x2x32xf32>
      %207 = arith.mulf %206, %203 : vector<2x2x32xf32>
      %208 = arith.select %205, %203, %207 : vector<2x2x32xi1>, vector<2x2x32xf32>
      %c0_127 = arith.constant 0 : index
      %c0_128 = arith.constant 0 : index
      %c0_129 = arith.constant 0 : index
      %209 = vector.load %arg19[%c0_127, %c0_128, %c0_129] : memref<2x2x32xf32, #tpu.memory_space<vmem>>, vector<2x2x32xf32>
      tpu.vector_store %arg19[%c0_127, %c0_128, %c0_129], %208 {strides = array<i32>} : memref<2x2x32xf32, #tpu.memory_space<vmem>>, vector<2x2x32xf32>,
    } else {
    }
    %c0 = arith.constant 0 : index
    %c0_1 = arith.constant 0 : index
    %c0_2 = arith.constant 0 : index
    %3 = vector.load %arg19[%c0, %c0_1, %c0_2] : memref<2x2x32xf32, #tpu.memory_space<vmem>>, vector<2x2x32xf32>
    %c0_3 = arith.constant 0 : index
    %c8 = arith.constant 8 : index
    %c0_4 = arith.constant 0 : index
    %4 = vector.load %arg20[%c0_3, %c8, %c0_4] : memref<2x18x32xf32, #tpu.memory_space<vmem>>, vector<2x2x32xf32>
    tpu.vector_store %arg20[%c0_3, %c8, %c0_4], %3 {strides = array<i32>} : memref<2x18x32xf32, #tpu.memory_space<vmem>>, vector<2x2x32xf32>,
    %c0_i32_5 = arith.constant 0 : i32
    %5 = arith.cmpi eq, %arg1, %c0_i32_5 : i32
    %6 = arith.extui %5 : i1 to i32
    %c0_i32_6 = arith.constant 0 : i32
    %7 = arith.cmpi ne, %6, %c0_i32_6 : i32
    scf.if %7 {
      %c0_88 = arith.constant 0 : index
      %c7 = arith.constant 7 : index
      %c0_89 = arith.constant 0 : index
      %149 = vector.load %arg20[%c0_88, %c7, %c0_89] : memref<2x18x32xf32, #tpu.memory_space<vmem>>, vector<2x2x32xf32>
      %c0_90 = arith.constant 0 : index
      %c0_91 = arith.constant 0 : index
      %c0_92 = arith.constant 0 : index
      %150 = vector.load %arg21[%c0_90, %c0_91, %c0_92] : memref<2x2x32xf32, #tpu.memory_space<vmem>>, vector<2x2x32xf32>
      tpu.vector_store %arg21[%c0_90, %c0_91, %c0_92], %149 {strides = array<i32>} : memref<2x2x32xf32, #tpu.memory_space<vmem>>, vector<2x2x32xf32>,
      %c0_93 = arith.constant 0 : index
      %c9 = arith.constant 9 : index
      %c0_94 = arith.constant 0 : index
      %151 = vector.load %arg20[%c0_93, %c9, %c0_94] : memref<2x18x32xf32, #tpu.memory_space<vmem>>, vector<2x2x32xf32>
      %c0_95 = arith.constant 0 : index
      %c0_96 = arith.constant 0 : index
      %c0_97 = arith.constant 0 : index
      %152 = vector.load %arg22[%c0_95, %c0_96, %c0_97] : memref<2x2x32xf32, #tpu.memory_space<vmem>>, vector<2x2x32xf32>
      tpu.vector_store %arg22[%c0_95, %c0_96, %c0_97], %151 {strides = array<i32>} : memref<2x2x32xf32, #tpu.memory_space<vmem>>, vector<2x2x32xf32>,
    } else {
    }
    %c1_i32 = arith.constant 1 : i32
    %8 = arith.cmpi eq, %arg1, %c1_i32 : i32
    %9 = arith.extui %8 : i1 to i32
    %c0_i32_7 = arith.constant 0 : i32
    %10 = arith.cmpi ne, %9, %c0_i32_7 : i32
    scf.if %10 {
      %c0_88 = arith.constant 0 : index
      %c6 = arith.constant 6 : index
      %c0_89 = arith.constant 0 : index
      %149 = vector.load %arg20[%c0_88, %c6, %c0_89] : memref<2x18x32xf32, #tpu.memory_space<vmem>>, vector<2x2x32xf32>
      %c0_90 = arith.constant 0 : index
      %c0_91 = arith.constant 0 : index
      %c0_92 = arith.constant 0 : index
      %150 = vector.load %arg21[%c0_90, %c0_91, %c0_92] : memref<2x2x32xf32, #tpu.memory_space<vmem>>, vector<2x2x32xf32>
      tpu.vector_store %arg21[%c0_90, %c0_91, %c0_92], %149 {strides = array<i32>} : memref<2x2x32xf32, #tpu.memory_space<vmem>>, vector<2x2x32xf32>,
      %c0_93 = arith.constant 0 : index
      %c10 = arith.constant 10 : index
      %c0_94 = arith.constant 0 : index
      %151 = vector.load %arg20[%c0_93, %c10, %c0_94] : memref<2x18x32xf32, #tpu.memory_space<vmem>>, vector<2x2x32xf32>
      %c0_95 = arith.constant 0 : index
      %c0_96 = arith.constant 0 : index
      %c0_97 = arith.constant 0 : index
      %152 = vector.load %arg22[%c0_95, %c0_96, %c0_97] : memref<2x2x32xf32, #tpu.memory_space<vmem>>, vector<2x2x32xf32>
      tpu.vector_store %arg22[%c0_95, %c0_96, %c0_97], %151 {strides = array<i32>} : memref<2x2x32xf32, #tpu.memory_space<vmem>>, vector<2x2x32xf32>,
    } else {
    }
    %c2_i32 = arith.constant 2 : i32
    %11 = arith.cmpi eq, %arg1, %c2_i32 : i32
    %12 = arith.extui %11 : i1 to i32
    %c0_i32_8 = arith.constant 0 : i32
    %13 = arith.cmpi ne, %12, %c0_i32_8 : i32
    scf.if %13 {
      %c0_88 = arith.constant 0 : index
      %c4 = arith.constant 4 : index
      %c0_89 = arith.constant 0 : index
      %149 = vector.load %arg20[%c0_88, %c4, %c0_89] : memref<2x18x32xf32, #tpu.memory_space<vmem>>, vector<2x2x32xf32>
      %c0_90 = arith.constant 0 : index
      %c0_91 = arith.constant 0 : index
      %c0_92 = arith.constant 0 : index
      %150 = vector.load %arg21[%c0_90, %c0_91, %c0_92] : memref<2x2x32xf32, #tpu.memory_space<vmem>>, vector<2x2x32xf32>
      tpu.vector_store %arg21[%c0_90, %c0_91, %c0_92], %149 {strides = array<i32>} : memref<2x2x32xf32, #tpu.memory_space<vmem>>, vector<2x2x32xf32>,
      %c0_93 = arith.constant 0 : index
      %c12 = arith.constant 12 : index
      %c0_94 = arith.constant 0 : index
      %151 = vector.load %arg20[%c0_93, %c12, %c0_94] : memref<2x18x32xf32, #tpu.memory_space<vmem>>, vector<2x2x32xf32>
      %c0_95 = arith.constant 0 : index
      %c0_96 = arith.constant 0 : index
      %c0_97 = arith.constant 0 : index
      %152 = vector.load %arg22[%c0_95, %c0_96, %c0_97] : memref<2x2x32xf32, #tpu.memory_space<vmem>>, vector<2x2x32xf32>
      tpu.vector_store %arg22[%c0_95, %c0_96, %c0_97], %151 {strides = array<i32>} : memref<2x2x32xf32, #tpu.memory_space<vmem>>, vector<2x2x32xf32>,
    } else {
    }
    %c3_i32 = arith.constant 3 : i32
    %14 = arith.cmpi eq, %arg1, %c3_i32 : i32
    %15 = arith.extui %14 : i1 to i32
    %c0_i32_9 = arith.constant 0 : i32
    %16 = arith.cmpi ne, %15, %c0_i32_9 : i32
    scf.if %16 {
      %c0_88 = arith.constant 0 : index
      %c0_89 = arith.constant 0 : index
      %c0_90 = arith.constant 0 : index
      %149 = vector.load %arg20[%c0_88, %c0_89, %c0_90] : memref<2x18x32xf32, #tpu.memory_space<vmem>>, vector<2x2x32xf32>
      %c0_91 = arith.constant 0 : index
      %c0_92 = arith.constant 0 : index
      %c0_93 = arith.constant 0 : index
      %150 = vector.load %arg21[%c0_91, %c0_92, %c0_93] : memref<2x2x32xf32, #tpu.memory_space<vmem>>, vector<2x2x32xf32>
      tpu.vector_store %arg21[%c0_91, %c0_92, %c0_93], %149 {strides = array<i32>} : memref<2x2x32xf32, #tpu.memory_space<vmem>>, vector<2x2x32xf32>,
      %c0_94 = arith.constant 0 : index
      %c16 = arith.constant 16 : index
      %c0_95 = arith.constant 0 : index
      %151 = vector.load %arg20[%c0_94, %c16, %c0_95] : memref<2x18x32xf32, #tpu.memory_space<vmem>>, vector<2x2x32xf32>
      %c0_96 = arith.constant 0 : index
      %c0_97 = arith.constant 0 : index
      %c0_98 = arith.constant 0 : index
      %152 = vector.load %arg22[%c0_96, %c0_97, %c0_98] : memref<2x2x32xf32, #tpu.memory_space<vmem>>, vector<2x2x32xf32>
      tpu.vector_store %arg22[%c0_96, %c0_97, %c0_98], %151 {strides = array<i32>} : memref<2x2x32xf32, #tpu.memory_space<vmem>>, vector<2x2x32xf32>,
    } else {
    }
    %c0_10 = arith.constant 0 : index
    %c0_11 = arith.constant 0 : index
    %c0_12 = arith.constant 0 : index
    %c0_13 = arith.constant 0 : index
    %17 = vector.load %arg8[%c0_10, %c0_11, %c0_12, %c0_13] : memref<1x2x96x32xbf16, #tpu.memory_space<vmem>>, vector<1x1x96x32xbf16>
    %18 = vector.shape_cast %17 : vector<1x1x96x32xbf16> to vector<96x32xbf16>
    %c0_14 = arith.constant 0 : index
    %c0_15 = arith.constant 0 : index
    %c0_16 = arith.constant 0 : index
    %19 = vector.load %arg21[%c0_14, %c0_15, %c0_16] : memref<2x2x32xf32, #tpu.memory_space<vmem>>, vector<2x2x32xf32>
    %20 = vector.shape_cast %19 : vector<2x2x32xf32> to vector<4x32xf32>
    %21 = vector.extract_strided_slice %18 {offsets = [0, 0], sizes = [32, 32], strides = [1, 1]} : vector<96x32xbf16> to vector<32x32xbf16>
    %22 = arith.truncf %20 : vector<4x32xf32> to vector<4x32xbf16>
    %cst = arith.constant dense<0.000000e+00> : vector<4x32xf32>
    %23 = tpu.matmul %22, %21, %cst {dimension_numbers = #tpu.dot_dimension_numbers<[1], [0], [0], [1], [0, 0, 1, 1], [], []>} : vector<4x32xbf16>, vector<32x32xbf16>, vector<4x32xf32> -> vector<4x32xf32>
    %24 = vector.shape_cast %3 : vector<2x2x32xf32> to vector<4x32xf32>
    %25 = vector.extract_strided_slice %18 {offsets = [32, 0], sizes = [32, 32], strides = [1, 1]} : vector<96x32xbf16> to vector<32x32xbf16>
    %26 = arith.truncf %24 : vector<4x32xf32> to vector<4x32xbf16>
    %cst_17 = arith.constant dense<0.000000e+00> : vector<4x32xf32>
    %27 = tpu.matmul %26, %25, %cst_17 {dimension_numbers = #tpu.dot_dimension_numbers<[1], [0], [0], [1], [0, 0, 1, 1], [], []>} : vector<4x32xbf16>, vector<32x32xbf16>, vector<4x32xf32> -> vector<4x32xf32>
    %28 = arith.addf %23, %27 : vector<4x32xf32>
    %c0_18 = arith.constant 0 : index
    %c0_19 = arith.constant 0 : index
    %c0_20 = arith.constant 0 : index
    %29 = vector.load %arg22[%c0_18, %c0_19, %c0_20] : memref<2x2x32xf32, #tpu.memory_space<vmem>>, vector<2x2x32xf32>
    %30 = vector.shape_cast %29 : vector<2x2x32xf32> to vector<4x32xf32>
    %31 = vector.extract_strided_slice %18 {offsets = [64, 0], sizes = [32, 32], strides = [1, 1]} : vector<96x32xbf16> to vector<32x32xbf16>
    %32 = arith.truncf %30 : vector<4x32xf32> to vector<4x32xbf16>
    %cst_21 = arith.constant dense<0.000000e+00> : vector<4x32xf32>
    %33 = tpu.matmul %32, %31, %cst_21 {dimension_numbers = #tpu.dot_dimension_numbers<[1], [0], [0], [1], [0, 0, 1, 1], [], []>} : vector<4x32xbf16>, vector<32x32xbf16>, vector<4x32xf32> -> vector<4x32xf32>
    %34 = arith.addf %28, %33 : vector<4x32xf32>
    %35 = vector.shape_cast %34 : vector<4x32xf32> to vector<2x2x32xf32>
    %c0_22 = arith.constant 0 : index
    %c0_23 = arith.constant 0 : index
    %c0_24 = arith.constant 0 : index
    %c0_25 = arith.constant 0 : index
    %36 = vector.load %arg9[%c0_22, %c0_23, %c0_24, %c0_25] : memref<1x2x1x32xf32, #tpu.memory_space<vmem>>, vector<1x1x1x32xf32>
    %37 = vector.shape_cast %36 : vector<1x1x1x32xf32> to vector<1x32xf32>
    %38 = vector.shape_cast %37 : vector<1x32xf32> to vector<1x1x32xf32>
    %39 = vector.broadcast %38 : vector<1x1x32xf32> to vector<2x2x32xf32>
    %40 = arith.addf %35, %39 : vector<2x2x32xf32>
    %c0_26 = arith.constant 0 : index
    %c0_27 = arith.constant 0 : index
    %c0_28 = arith.constant 0 : index
    %c0_29 = arith.constant 0 : index
    %41 = vector.load %arg10[%c0_26, %c0_27, %c0_28, %c0_29] : memref<1x2x1x32xf32, #tpu.memory_space<vmem>>, vector<1x1x1x32xf32>
    %42 = vector.shape_cast %41 : vector<1x1x1x32xf32> to vector<1x32xf32>
    %c0_30 = arith.constant 0 : index
    %c0_31 = arith.constant 0 : index
    %c0_32 = arith.constant 0 : index
    %c0_33 = arith.constant 0 : index
    %43 = vector.load %arg11[%c0_30, %c0_31, %c0_32, %c0_33] : memref<1x2x1x32xf32, #tpu.memory_space<vmem>>, vector<1x1x1x32xf32>
    %44 = vector.shape_cast %43 : vector<1x1x1x32xf32> to vector<1x32xf32>
    %cst_34 = arith.constant dense<0.000000e+00> : vector<2x2xf32>
    %45 = vector.multi_reduction <add>, %40, %cst_34 [2] : vector<2x2x32xf32> to vector<2x2xf32>
    %46 = vector.shape_cast %45 : vector<2x2xf32> to vector<2x2x1xf32>
    %cst_35 = arith.constant 3.200000e+01 : f32
    %47 = vector.broadcast %cst_35 : f32 to vector<2x2x1xf32>
    %48 = arith.divf %46, %47 : vector<2x2x1xf32>
    %49 = vector.broadcast %48 : vector<2x2x1xf32> to vector<2x2x32xf32>
    %50 = arith.subf %40, %49 : vector<2x2x32xf32>
    %51 = arith.mulf %50, %50 : vector<2x2x32xf32>
    %cst_36 = arith.constant dense<0.000000e+00> : vector<2x2xf32>
    %52 = vector.multi_reduction <add>, %51, %cst_36 [2] : vector<2x2x32xf32> to vector<2x2xf32>
    %53 = vector.shape_cast %52 : vector<2x2xf32> to vector<2x2x1xf32>
    %cst_37 = arith.constant 3.200000e+01 : f32
    %54 = vector.broadcast %cst_37 : f32 to vector<2x2x1xf32>
    %55 = arith.divf %53, %54 : vector<2x2x1xf32>
    %56 = vector.broadcast %48 : vector<2x2x1xf32> to vector<2x2x32xf32>
    %57 = arith.subf %40, %56 : vector<2x2x32xf32>
    %cst_38 = arith.constant 9.99999974E-6 : f32
    %58 = vector.broadcast %cst_38 : f32 to vector<2x2x1xf32>
    %59 = arith.addf %55, %58 : vector<2x2x1xf32>
    %60 = math.rsqrt %59 : vector<2x2x1xf32>
    %61 = vector.broadcast %60 : vector<2x2x1xf32> to vector<2x2x32xf32>
    %62 = arith.mulf %57, %61 : vector<2x2x32xf32>
    %63 = vector.shape_cast %42 : vector<1x32xf32> to vector<1x1x32xf32>
    %64 = vector.broadcast %63 : vector<1x1x32xf32> to vector<2x2x32xf32>
    %65 = arith.mulf %62, %64 : vector<2x2x32xf32>
    %66 = vector.shape_cast %44 : vector<1x32xf32> to vector<1x1x32xf32>
    %67 = vector.broadcast %66 : vector<1x1x32xf32> to vector<2x2x32xf32>
    %68 = arith.addf %65, %67 : vector<2x2x32xf32>
    %cst_39 = arith.constant 0.000000e+00 : f32
    %69 = vector.broadcast %cst_39 : f32 to vector<2x2x32xf32>
    %70 = arith.cmpf ogt, %68, %69 : vector<2x2x32xf32>
    %cst_40 = arith.constant 2.000000e-01 : f32
    %71 = vector.broadcast %cst_40 : f32 to vector<2x2x32xf32>
    %72 = arith.mulf %71, %68 : vector<2x2x32xf32>
    %73 = arith.select %70, %68, %72 : vector<2x2x32xi1>, vector<2x2x32xf32>
    %c0_41 = arith.constant 0 : index
    %c8_42 = arith.constant 8 : index
    %c0_43 = arith.constant 0 : index
    %74 = vector.load %arg20[%c0_41, %c8_42, %c0_43] : memref<2x18x32xf32, #tpu.memory_space<vmem>>, vector<2x2x32xf32>
    tpu.vector_store %arg20[%c0_41, %c8_42, %c0_43], %73 {strides = array<i32>} : memref<2x18x32xf32, #tpu.memory_space<vmem>>, vector<2x2x32xf32>,
    %c0_i32_44 = arith.constant 0 : i32
    %75 = arith.cmpi eq, %arg1, %c0_i32_44 : i32
    %76 = arith.extui %75 : i1 to i32
    %c0_i32_45 = arith.constant 0 : i32
    %77 = arith.cmpi ne, %76, %c0_i32_45 : i32
    scf.if %77 {
      %c0_88 = arith.constant 0 : index
      %c7 = arith.constant 7 : index
      %c0_89 = arith.constant 0 : index
      %149 = vector.load %arg20[%c0_88, %c7, %c0_89] : memref<2x18x32xf32, #tpu.memory_space<vmem>>, vector<2x2x32xf32>
      %c0_90 = arith.constant 0 : index
      %c0_91 = arith.constant 0 : index
      %c0_92 = arith.constant 0 : index
      %150 = vector.load %arg21[%c0_90, %c0_91, %c0_92] : memref<2x2x32xf32, #tpu.memory_space<vmem>>, vector<2x2x32xf32>
      tpu.vector_store %arg21[%c0_90, %c0_91, %c0_92], %149 {strides = array<i32>} : memref<2x2x32xf32, #tpu.memory_space<vmem>>, vector<2x2x32xf32>,
      %c0_93 = arith.constant 0 : index
      %c9 = arith.constant 9 : index
      %c0_94 = arith.constant 0 : index
      %151 = vector.load %arg20[%c0_93, %c9, %c0_94] : memref<2x18x32xf32, #tpu.memory_space<vmem>>, vector<2x2x32xf32>
      %c0_95 = arith.constant 0 : index
      %c0_96 = arith.constant 0 : index
      %c0_97 = arith.constant 0 : index
      %152 = vector.load %arg22[%c0_95, %c0_96, %c0_97] : memref<2x2x32xf32, #tpu.memory_space<vmem>>, vector<2x2x32xf32>
      tpu.vector_store %arg22[%c0_95, %c0_96, %c0_97], %151 {strides = array<i32>} : memref<2x2x32xf32, #tpu.memory_space<vmem>>, vector<2x2x32xf32>,
    } else {
    }
    %c1_i32_46 = arith.constant 1 : i32
    %78 = arith.cmpi eq, %arg1, %c1_i32_46 : i32
    %79 = arith.extui %78 : i1 to i32
    %c0_i32_47 = arith.constant 0 : i32
    %80 = arith.cmpi ne, %79, %c0_i32_47 : i32
    scf.if %80 {
      %c0_88 = arith.constant 0 : index
      %c6 = arith.constant 6 : index
      %c0_89 = arith.constant 0 : index
      %149 = vector.load %arg20[%c0_88, %c6, %c0_89] : memref<2x18x32xf32, #tpu.memory_space<vmem>>, vector<2x2x32xf32>
      %c0_90 = arith.constant 0 : index
      %c0_91 = arith.constant 0 : index
      %c0_92 = arith.constant 0 : index
      %150 = vector.load %arg21[%c0_90, %c0_91, %c0_92] : memref<2x2x32xf32, #tpu.memory_space<vmem>>, vector<2x2x32xf32>
      tpu.vector_store %arg21[%c0_90, %c0_91, %c0_92], %149 {strides = array<i32>} : memref<2x2x32xf32, #tpu.memory_space<vmem>>, vector<2x2x32xf32>,
      %c0_93 = arith.constant 0 : index
      %c10 = arith.constant 10 : index
      %c0_94 = arith.constant 0 : index
      %151 = vector.load %arg20[%c0_93, %c10, %c0_94] : memref<2x18x32xf32, #tpu.memory_space<vmem>>, vector<2x2x32xf32>
      %c0_95 = arith.constant 0 : index
      %c0_96 = arith.constant 0 : index
      %c0_97 = arith.constant 0 : index
      %152 = vector.load %arg22[%c0_95, %c0_96, %c0_97] : memref<2x2x32xf32, #tpu.memory_space<vmem>>, vector<2x2x32xf32>
      tpu.vector_store %arg22[%c0_95, %c0_96, %c0_97], %151 {strides = array<i32>} : memref<2x2x32xf32, #tpu.memory_space<vmem>>, vector<2x2x32xf32>,
    } else {
    }
    %c2_i32_48 = arith.constant 2 : i32
    %81 = arith.cmpi eq, %arg1, %c2_i32_48 : i32
    %82 = arith.extui %81 : i1 to i32
    %c0_i32_49 = arith.constant 0 : i32
    %83 = arith.cmpi ne, %82, %c0_i32_49 : i32
    scf.if %83 {
      %c0_88 = arith.constant 0 : index
      %c4 = arith.constant 4 : index
      %c0_89 = arith.constant 0 : index
      %149 = vector.load %arg20[%c0_88, %c4, %c0_89] : memref<2x18x32xf32, #tpu.memory_space<vmem>>, vector<2x2x32xf32>
      %c0_90 = arith.constant 0 : index
      %c0_91 = arith.constant 0 : index
      %c0_92 = arith.constant 0 : index
      %150 = vector.load %arg21[%c0_90, %c0_91, %c0_92] : memref<2x2x32xf32, #tpu.memory_space<vmem>>, vector<2x2x32xf32>
      tpu.vector_store %arg21[%c0_90, %c0_91, %c0_92], %149 {strides = array<i32>} : memref<2x2x32xf32, #tpu.memory_space<vmem>>, vector<2x2x32xf32>,
      %c0_93 = arith.constant 0 : index
      %c12 = arith.constant 12 : index
      %c0_94 = arith.constant 0 : index
      %151 = vector.load %arg20[%c0_93, %c12, %c0_94] : memref<2x18x32xf32, #tpu.memory_space<vmem>>, vector<2x2x32xf32>
      %c0_95 = arith.constant 0 : index
      %c0_96 = arith.constant 0 : index
      %c0_97 = arith.constant 0 : index
      %152 = vector.load %arg22[%c0_95, %c0_96, %c0_97] : memref<2x2x32xf32, #tpu.memory_space<vmem>>, vector<2x2x32xf32>
      tpu.vector_store %arg22[%c0_95, %c0_96, %c0_97], %151 {strides = array<i32>} : memref<2x2x32xf32, #tpu.memory_space<vmem>>, vector<2x2x32xf32>,
    } else {
    }
    %c3_i32_50 = arith.constant 3 : i32
    %84 = arith.cmpi eq, %arg1, %c3_i32_50 : i32
    %85 = arith.extui %84 : i1 to i32
    %c0_i32_51 = arith.constant 0 : i32
    %86 = arith.cmpi ne, %85, %c0_i32_51 : i32
    scf.if %86 {
      %c0_88 = arith.constant 0 : index
      %c0_89 = arith.constant 0 : index
      %c0_90 = arith.constant 0 : index
      %149 = vector.load %arg20[%c0_88, %c0_89, %c0_90] : memref<2x18x32xf32, #tpu.memory_space<vmem>>, vector<2x2x32xf32>
      %c0_91 = arith.constant 0 : index
      %c0_92 = arith.constant 0 : index
      %c0_93 = arith.constant 0 : index
      %150 = vector.load %arg21[%c0_91, %c0_92, %c0_93] : memref<2x2x32xf32, #tpu.memory_space<vmem>>, vector<2x2x32xf32>
      tpu.vector_store %arg21[%c0_91, %c0_92, %c0_93], %149 {strides = array<i32>} : memref<2x2x32xf32, #tpu.memory_space<vmem>>, vector<2x2x32xf32>,
      %c0_94 = arith.constant 0 : index
      %c16 = arith.constant 16 : index
      %c0_95 = arith.constant 0 : index
      %151 = vector.load %arg20[%c0_94, %c16, %c0_95] : memref<2x18x32xf32, #tpu.memory_space<vmem>>, vector<2x2x32xf32>
      %c0_96 = arith.constant 0 : index
      %c0_97 = arith.constant 0 : index
      %c0_98 = arith.constant 0 : index
      %152 = vector.load %arg22[%c0_96, %c0_97, %c0_98] : memref<2x2x32xf32, #tpu.memory_space<vmem>>, vector<2x2x32xf32>
      tpu.vector_store %arg22[%c0_96, %c0_97, %c0_98], %151 {strides = array<i32>} : memref<2x2x32xf32, #tpu.memory_space<vmem>>, vector<2x2x32xf32>,
    } else {
    }
    %c0_52 = arith.constant 0 : index
    %c1 = arith.constant 1 : index
    %c0_53 = arith.constant 0 : index
    %c0_54 = arith.constant 0 : index
    %87 = vector.load %arg8[%c0_52, %c1, %c0_53, %c0_54] : memref<1x2x96x32xbf16, #tpu.memory_space<vmem>>, vector<1x1x96x32xbf16>
    %88 = vector.shape_cast %87 : vector<1x1x96x32xbf16> to vector<96x32xbf16>
    %c0_55 = arith.constant 0 : index
    %c0_56 = arith.constant 0 : index
    %c0_57 = arith.constant 0 : index
    %89 = vector.load %arg21[%c0_55, %c0_56, %c0_57] : memref<2x2x32xf32, #tpu.memory_space<vmem>>, vector<2x2x32xf32>
    %90 = vector.shape_cast %89 : vector<2x2x32xf32> to vector<4x32xf32>
    %91 = vector.extract_strided_slice %88 {offsets = [0, 0], sizes = [32, 32], strides = [1, 1]} : vector<96x32xbf16> to vector<32x32xbf16>
    %92 = arith.truncf %90 : vector<4x32xf32> to vector<4x32xbf16>
    %cst_58 = arith.constant dense<0.000000e+00> : vector<4x32xf32>
    %93 = tpu.matmul %92, %91, %cst_58 {dimension_numbers = #tpu.dot_dimension_numbers<[1], [0], [0], [1], [0, 0, 1, 1], [], []>} : vector<4x32xbf16>, vector<32x32xbf16>, vector<4x32xf32> -> vector<4x32xf32>
    %94 = vector.shape_cast %73 : vector<2x2x32xf32> to vector<4x32xf32>
    %95 = vector.extract_strided_slice %88 {offsets = [32, 0], sizes = [32, 32], strides = [1, 1]} : vector<96x32xbf16> to vector<32x32xbf16>
    %96 = arith.truncf %94 : vector<4x32xf32> to vector<4x32xbf16>
    %cst_59 = arith.constant dense<0.000000e+00> : vector<4x32xf32>
    %97 = tpu.matmul %96, %95, %cst_59 {dimension_numbers = #tpu.dot_dimension_numbers<[1], [0], [0], [1], [0, 0, 1, 1], [], []>} : vector<4x32xbf16>, vector<32x32xbf16>, vector<4x32xf32> -> vector<4x32xf32>
    %98 = arith.addf %93, %97 : vector<4x32xf32>
    %c0_60 = arith.constant 0 : index
    %c0_61 = arith.constant 0 : index
    %c0_62 = arith.constant 0 : index
    %99 = vector.load %arg22[%c0_60, %c0_61, %c0_62] : memref<2x2x32xf32, #tpu.memory_space<vmem>>, vector<2x2x32xf32>
    %100 = vector.shape_cast %99 : vector<2x2x32xf32> to vector<4x32xf32>
    %101 = vector.extract_strided_slice %88 {offsets = [64, 0], sizes = [32, 32], strides = [1, 1]} : vector<96x32xbf16> to vector<32x32xbf16>
    %102 = arith.truncf %100 : vector<4x32xf32> to vector<4x32xbf16>
    %cst_63 = arith.constant dense<0.000000e+00> : vector<4x32xf32>
    %103 = tpu.matmul %102, %101, %cst_63 {dimension_numbers = #tpu.dot_dimension_numbers<[1], [0], [0], [1], [0, 0, 1, 1], [], []>} : vector<4x32xbf16>, vector<32x32xbf16>, vector<4x32xf32> -> vector<4x32xf32>
    %104 = arith.addf %98, %103 : vector<4x32xf32>
    %105 = vector.shape_cast %104 : vector<4x32xf32> to vector<2x2x32xf32>
    %c0_64 = arith.constant 0 : index
    %c1_65 = arith.constant 1 : index
    %c0_66 = arith.constant 0 : index
    %c0_67 = arith.constant 0 : index
    %106 = vector.load %arg9[%c0_64, %c1_65, %c0_66, %c0_67] : memref<1x2x1x32xf32, #tpu.memory_space<vmem>>, vector<1x1x1x32xf32>
    %107 = vector.shape_cast %106 : vector<1x1x1x32xf32> to vector<1x32xf32>
    %108 = vector.shape_cast %107 : vector<1x32xf32> to vector<1x1x32xf32>
    %109 = vector.broadcast %108 : vector<1x1x32xf32> to vector<2x2x32xf32>
    %110 = arith.addf %105, %109 : vector<2x2x32xf32>
    %c0_68 = arith.constant 0 : index
    %c1_69 = arith.constant 1 : index
    %c0_70 = arith.constant 0 : index
    %c0_71 = arith.constant 0 : index
    %111 = vector.load %arg10[%c0_68, %c1_69, %c0_70, %c0_71] : memref<1x2x1x32xf32, #tpu.memory_space<vmem>>, vector<1x1x1x32xf32>
    %112 = vector.shape_cast %111 : vector<1x1x1x32xf32> to vector<1x32xf32>
    %c0_72 = arith.constant 0 : index
    %c1_73 = arith.constant 1 : index
    %c0_74 = arith.constant 0 : index
    %c0_75 = arith.constant 0 : index
    %113 = vector.load %arg11[%c0_72, %c1_73, %c0_74, %c0_75] : memref<1x2x1x32xf32, #tpu.memory_space<vmem>>, vector<1x1x1x32xf32>
    %114 = vector.shape_cast %113 : vector<1x1x1x32xf32> to vector<1x32xf32>
    %cst_76 = arith.constant dense<0.000000e+00> : vector<2x2xf32>
    %115 = vector.multi_reduction <add>, %110, %cst_76 [2] : vector<2x2x32xf32> to vector<2x2xf32>
    %116 = vector.shape_cast %115 : vector<2x2xf32> to vector<2x2x1xf32>
    %cst_77 = arith.constant 3.200000e+01 : f32
    %117 = vector.broadcast %cst_77 : f32 to vector<2x2x1xf32>
    %118 = arith.divf %116, %117 : vector<2x2x1xf32>
    %119 = vector.broadcast %118 : vector<2x2x1xf32> to vector<2x2x32xf32>
    %120 = arith.subf %110, %119 : vector<2x2x32xf32>
    %121 = arith.mulf %120, %120 : vector<2x2x32xf32>
    %cst_78 = arith.constant dense<0.000000e+00> : vector<2x2xf32>
    %122 = vector.multi_reduction <add>, %121, %cst_78 [2] : vector<2x2x32xf32> to vector<2x2xf32>
    %123 = vector.shape_cast %122 : vector<2x2xf32> to vector<2x2x1xf32>
    %cst_79 = arith.constant 3.200000e+01 : f32
    %124 = vector.broadcast %cst_79 : f32 to vector<2x2x1xf32>
    %125 = arith.divf %123, %124 : vector<2x2x1xf32>
    %126 = vector.broadcast %118 : vector<2x2x1xf32> to vector<2x2x32xf32>
    %127 = arith.subf %110, %126 : vector<2x2x32xf32>
    %cst_80 = arith.constant 9.99999974E-6 : f32
    %128 = vector.broadcast %cst_80 : f32 to vector<2x2x1xf32>
    %129 = arith.addf %125, %128 : vector<2x2x1xf32>
    %130 = math.rsqrt %129 : vector<2x2x1xf32>
    %131 = vector.broadcast %130 : vector<2x2x1xf32> to vector<2x2x32xf32>
    %132 = arith.mulf %127, %131 : vector<2x2x32xf32>
    %133 = vector.shape_cast %112 : vector<1x32xf32> to vector<1x1x32xf32>
    %134 = vector.broadcast %133 : vector<1x1x32xf32> to vector<2x2x32xf32>
    %135 = arith.mulf %132, %134 : vector<2x2x32xf32>
    %136 = vector.shape_cast %114 : vector<1x32xf32> to vector<1x1x32xf32>
    %137 = vector.broadcast %136 : vector<1x1x32xf32> to vector<2x2x32xf32>
    %138 = arith.addf %135, %137 : vector<2x2x32xf32>
    %139 = arith.addf %138, %3 : vector<2x2x32xf32>
    %cst_81 = arith.constant 0.000000e+00 : f32
    %140 = vector.broadcast %cst_81 : f32 to vector<2x2x32xf32>
    %141 = arith.cmpf ogt, %139, %140 : vector<2x2x32xf32>
    %cst_82 = arith.constant 2.000000e-01 : f32
    %142 = vector.broadcast %cst_82 : f32 to vector<2x2x32xf32>
    %143 = arith.mulf %142, %139 : vector<2x2x32xf32>
    %144 = arith.select %141, %139, %143 : vector<2x2x32xi1>, vector<2x2x32xf32>
    %c0_83 = arith.constant 0 : index
    %c0_84 = arith.constant 0 : index
    %c0_85 = arith.constant 0 : index
    %145 = vector.load %arg19[%c0_83, %c0_84, %c0_85] : memref<2x2x32xf32, #tpu.memory_space<vmem>>, vector<2x2x32xf32>
    tpu.vector_store %arg19[%c0_83, %c0_84, %c0_85], %144 {strides = array<i32>} : memref<2x2x32xf32, #tpu.memory_space<vmem>>, vector<2x2x32xf32>,
    %c3_i32_86 = arith.constant 3 : i32
    %146 = arith.cmpi eq, %arg1, %c3_i32_86 : i32
    %147 = arith.extui %146 : i1 to i32
    %c0_i32_87 = arith.constant 0 : i32
    %148 = arith.cmpi ne, %147, %c0_i32_87 : i32
    scf.if %148 {
      %c0_88 = arith.constant 0 : index
      %c0_89 = arith.constant 0 : index
      %149 = vector.load %arg12[%c0_88, %c0_89] : memref<1x32xf32, #tpu.memory_space<vmem>>, vector<1x32xf32>
      %150 = vector.shape_cast %149 : vector<1x32xf32> to vector<1x1x32xf32>
      %151 = vector.broadcast %150 : vector<1x1x32xf32> to vector<2x2x32xf32>
      %152 = arith.mulf %144, %151 : vector<2x2x32xf32>
      %cst_90 = arith.constant dense<0.000000e+00> : vector<2x2xf32>
      %153 = vector.multi_reduction <add>, %152, %cst_90 [2] : vector<2x2x32xf32> to vector<2x2xf32>
      %154 = vector.shape_cast %153 : vector<2x2xf32> to vector<2x2x1xf32>
      %c0_91 = arith.constant 0 : index
      %c0_92 = arith.constant 0 : index
      %155 = vector.load %arg13[%c0_91, %c0_92] : memref<1x1xf32, #tpu.memory_space<vmem>>, vector<1x1xf32>
      %156 = vector.shape_cast %155 : vector<1x1xf32> to vector<1x1x1xf32>
      %157 = vector.broadcast %156 : vector<1x1x1xf32> to vector<2x2x1xf32>
      %158 = arith.addf %154, %157 : vector<2x2x1xf32>
      %cst_93 = arith.constant dense<0xFF800000> : vector<2x1xf32>
      %159 = vector.multi_reduction <maximumf>, %158, %cst_93 [1] : vector<2x2x1xf32> to vector<2x1xf32>
      %160 = vector.shape_cast %159 : vector<2x1xf32> to vector<2x1x1xf32>
      %161 = vector.broadcast %160 : vector<2x1x1xf32> to vector<2x2x1xf32>
      %162 = arith.subf %158, %161 : vector<2x2x1xf32>
      %163 = math.exp %162 : vector<2x2x1xf32>
      %cst_94 = arith.constant dense<0.000000e+00> : vector<2x1xf32>
      %164 = vector.multi_reduction <add>, %163, %cst_94 [1] : vector<2x2x1xf32> to vector<2x1xf32>
      %165 = vector.shape_cast %164 : vector<2x1xf32> to vector<2x1x1xf32>
      %166 = tpu.reciprocal %165 {approx = true} : vector<2x1x1xf32> -> vector<2x1x1xf32>
      %167 = vector.broadcast %166 : vector<2x1x1xf32> to vector<2x2x1xf32>
      %168 = arith.mulf %163, %167 : vector<2x2x1xf32>
      %169 = vector.broadcast %168 : vector<2x2x1xf32> to vector<2x2x32xf32>
      %170 = arith.mulf %144, %169 : vector<2x2x32xf32>
      %cst_95 = arith.constant dense<0.000000e+00> : vector<2x32xf32>
      %171 = vector.multi_reduction <add>, %170, %cst_95 [1] : vector<2x2x32xf32> to vector<2x32xf32>
      %c0_96 = arith.constant 0 : index
      %c0_97 = arith.constant 0 : index
      %172 = vector.load %arg14[%c0_96, %c0_97] : memref<32x32xbf16, #tpu.memory_space<vmem>>, vector<32x32xbf16>
      %173 = arith.truncf %171 : vector<2x32xf32> to vector<2x32xbf16>
      %cst_98 = arith.constant dense<0.000000e+00> : vector<2x32xf32>
      %174 = tpu.matmul %173, %172, %cst_98 {dimension_numbers = #tpu.dot_dimension_numbers<[1], [0], [0], [1], [0, 0, 1, 1], [], []>} : vector<2x32xbf16>, vector<32x32xbf16>, vector<2x32xf32> -> vector<2x32xf32>
      %c0_99 = arith.constant 0 : index
      %c0_100 = arith.constant 0 : index
      %175 = vector.load %arg15[%c0_99, %c0_100] : memref<1x32xf32, #tpu.memory_space<vmem>>, vector<1x32xf32>
      %176 = vector.broadcast %175 : vector<1x32xf32> to vector<2x32xf32>
      %177 = arith.addf %174, %176 : vector<2x32xf32>
      %cst_101 = arith.constant 0.000000e+00 : f32
      %178 = vector.broadcast %cst_101 : f32 to vector<2x32xf32>
      %179 = arith.cmpf ogt, %177, %178 : vector<2x32xf32>
      %cst_102 = arith.constant 2.000000e-01 : f32
      %180 = vector.broadcast %cst_102 : f32 to vector<2x32xf32>
      %181 = arith.mulf %180, %177 : vector<2x32xf32>
      %182 = arith.select %179, %177, %181 : vector<2x32xi1>, vector<2x32xf32>
      %c0_103 = arith.constant 0 : index
      %c0_104 = arith.constant 0 : index
      %183 = vector.load %arg16[%c0_103, %c0_104] : memref<1x32xf32, #tpu.memory_space<vmem>>, vector<1x32xf32>
      %184 = vector.broadcast %183 : vector<1x32xf32> to vector<2x32xf32>
      %185 = arith.mulf %182, %184 : vector<2x32xf32>
      %cst_105 = arith.constant dense<0.000000e+00> : vector<2xf32>
      %186 = vector.multi_reduction <add>, %185, %cst_105 [1] : vector<2x32xf32> to vector<2xf32>
      %187 = vector.shape_cast %186 : vector<2xf32> to vector<2x1xf32>
      %c0_106 = arith.constant 0 : index
      %c0_107 = arith.constant 0 : index
      %188 = vector.load %arg17[%c0_106, %c0_107] : memref<1x1xf32, #tpu.memory_space<vmem>>, vector<1x1xf32>
      %189 = vector.broadcast %188 : vector<1x1xf32> to vector<2x1xf32>
      %190 = arith.addf %187, %189 : vector<2x1xf32>
      %191 = vector.shape_cast %190 : vector<2x1xf32> to vector<2x1xf32>
      %192 = vector.broadcast %191 : vector<2x1xf32> to vector<2x128xf32>
      %c0_108 = arith.constant 0 : index
      %c0_109 = arith.constant 0 : index
      %193 = vector.load %arg18[%c0_108, %c0_109] : memref<2x128xf32, #tpu.memory_space<vmem>>, vector<2x128xf32>
      tpu.vector_store %arg18[%c0_108, %c0_109], %192 {strides = array<i32>} : memref<2x128xf32, #tpu.memory_space<vmem>>, vector<2x128xf32>,
    } else {
    }
    return
  }
  func.func @transform_0(%arg0: i32, %arg1: i32) -> (i32, i32, i32) {
    %c0_i32 = arith.constant 0 : i32
    %c0_i32_0 = arith.constant 0 : i32
    %c0_i32_1 = arith.constant 0 : i32
    return %arg0, %c0_i32, %c0_i32_0 : i32, i32, i32
  }
  func.func @transform_1(%arg0: i32, %arg1: i32) -> (i32, i32) {
    %c0_i32 = arith.constant 0 : i32
    %c0_i32_0 = arith.constant 0 : i32
    %c0_i32_1 = arith.constant 0 : i32
    return %c0_i32, %c0_i32_0 : i32, i32
  }
  func.func @transform_2(%arg0: i32, %arg1: i32) -> (i32, i32) {
    %c0_i32 = arith.constant 0 : i32
    %c0_i32_0 = arith.constant 0 : i32
    %c0_i32_1 = arith.constant 0 : i32
    return %c0_i32, %c0_i32_0 : i32, i32
  }
  func.func @transform_3(%arg0: i32, %arg1: i32) -> (i32, i32) {
    %c0_i32 = arith.constant 0 : i32
    %c0_i32_0 = arith.constant 0 : i32
    %c0_i32_1 = arith.constant 0 : i32
    return %c0_i32, %c0_i32_0 : i32, i32
  }
  func.func @transform_4(%arg0: i32, %arg1: i32) -> (i32, i32) {
    %c0_i32 = arith.constant 0 : i32
    %c0_i32_0 = arith.constant 0 : i32
    %c0_i32_1 = arith.constant 0 : i32
    return %c0_i32, %c0_i32_0 : i32, i32
  }
  func.func @transform_5(%arg0: i32, %arg1: i32) -> (i32, i32) {
    %c0_i32 = arith.constant 0 : i32
    %c0_i32_0 = arith.constant 0 : i32
    %c0_i32_1 = arith.constant 0 : i32
    return %c0_i32, %c0_i32_0 : i32, i32
  }
  func.func @transform_6(%arg0: i32, %arg1: i32) -> (i32, i32, i32, i32) {
    %c0_i32 = arith.constant 0 : i32
    %c0_i32_0 = arith.constant 0 : i32
    %c0_i32_1 = arith.constant 0 : i32
    %c0_i32_2 = arith.constant 0 : i32
    return %arg1, %c0_i32, %c0_i32_0, %c0_i32_1 : i32, i32, i32, i32
  }
  func.func @transform_7(%arg0: i32, %arg1: i32) -> (i32, i32, i32, i32) {
    %c0_i32 = arith.constant 0 : i32
    %c0_i32_0 = arith.constant 0 : i32
    %c0_i32_1 = arith.constant 0 : i32
    %c0_i32_2 = arith.constant 0 : i32
    return %arg1, %c0_i32, %c0_i32_0, %c0_i32_1 : i32, i32, i32, i32
  }
  func.func @transform_8(%arg0: i32, %arg1: i32) -> (i32, i32, i32, i32) {
    %c0_i32 = arith.constant 0 : i32
    %c0_i32_0 = arith.constant 0 : i32
    %c0_i32_1 = arith.constant 0 : i32
    %c0_i32_2 = arith.constant 0 : i32
    return %arg1, %c0_i32, %c0_i32_0, %c0_i32_1 : i32, i32, i32, i32
  }
  func.func @transform_9(%arg0: i32, %arg1: i32) -> (i32, i32, i32, i32) {
    %c0_i32 = arith.constant 0 : i32
    %c0_i32_0 = arith.constant 0 : i32
    %c0_i32_1 = arith.constant 0 : i32
    %c0_i32_2 = arith.constant 0 : i32
    return %arg1, %c0_i32, %c0_i32_0, %c0_i32_1 : i32, i32, i32, i32
  }
  func.func @transform_10(%arg0: i32, %arg1: i32) -> (i32, i32) {
    %c0_i32 = arith.constant 0 : i32
    %c0_i32_0 = arith.constant 0 : i32
    %c0_i32_1 = arith.constant 0 : i32
    return %c0_i32, %c0_i32_0 : i32, i32
  }
  func.func @transform_11(%arg0: i32, %arg1: i32) -> (i32, i32) {
    %c0_i32 = arith.constant 0 : i32
    %c0_i32_0 = arith.constant 0 : i32
    %c0_i32_1 = arith.constant 0 : i32
    return %c0_i32, %c0_i32_0 : i32, i32
  }
  func.func @transform_12(%arg0: i32, %arg1: i32) -> (i32, i32) {
    %c0_i32 = arith.constant 0 : i32
    %c0_i32_0 = arith.constant 0 : i32
    %c0_i32_1 = arith.constant 0 : i32
    return %c0_i32, %c0_i32_0 : i32, i32
  }
  func.func @transform_13(%arg0: i32, %arg1: i32) -> (i32, i32) {
    %c0_i32 = arith.constant 0 : i32
    %c0_i32_0 = arith.constant 0 : i32
    %c0_i32_1 = arith.constant 0 : i32
    return %c0_i32, %c0_i32_0 : i32, i32
  }
  func.func @transform_14(%arg0: i32, %arg1: i32) -> (i32, i32) {
    %c0_i32 = arith.constant 0 : i32
    %c0_i32_0 = arith.constant 0 : i32
    %c0_i32_1 = arith.constant 0 : i32
    return %c0_i32, %c0_i32_0 : i32, i32
  }
  func.func @transform_15(%arg0: i32, %arg1: i32) -> (i32, i32) {
    %c0_i32 = arith.constant 0 : i32
    %c0_i32_0 = arith.constant 0 : i32
    %c0_i32_1 = arith.constant 0 : i32
    return %c0_i32, %c0_i32_0 : i32, i32
  }
  func.func @transform_16(%arg0: i32, %arg1: i32) -> (i32, i32) {
    %c0_i32 = arith.constant 0 : i32
    %c0_i32_0 = arith.constant 0 : i32
    return %arg0, %c0_i32 : i32, i32
  }
}

module attributes {stable_mosaic.version = 11 : i64} {
  func.func @kernel(%arg0: i32, %arg1: i32, %arg2: memref<2x8x4xf32, #tpu.memory_space<vmem>>, %arg3: memref<1x1xbf16, #tpu.memory_space<vmem>>, %arg4: memref<4x32xbf16, #tpu.memory_space<vmem>>, %arg5: memref<1x32xf32, #tpu.memory_space<vmem>>, %arg6: memref<1x32xf32, #tpu.memory_space<vmem>>, %arg7: memref<1x32xf32, #tpu.memory_space<vmem>>, %arg8: memref<1x2x96x32xbf16, #tpu.memory_space<vmem>>, %arg9: memref<1x2x1x32xf32, #tpu.memory_space<vmem>>, %arg10: memref<1x2x1x32xf32, #tpu.memory_space<vmem>>, %arg11: memref<1x2x1x32xf32, #tpu.memory_space<vmem>>, %arg12: memref<1x32xf32, #tpu.memory_space<vmem>>, %arg13: memref<1x1xf32, #tpu.memory_space<vmem>>, %arg14: memref<32x32xbf16, #tpu.memory_space<vmem>>, %arg15: memref<1x32xf32, #tpu.memory_space<vmem>>, %arg16: memref<1x32xf32, #tpu.memory_space<vmem>>, %arg17: memref<1x1xf32, #tpu.memory_space<vmem>>, %arg18: memref<2x128xf32, #tpu.memory_space<vmem>>, %arg19: memref<2x8x32xf32, #tpu.memory_space<vmem>>, %arg20: memref<2x24x32xf32, #tpu.memory_space<vmem>>, %arg21: memref<2x8x32xf32, #tpu.memory_space<vmem>>, %arg22: memref<2x8x32xf32, #tpu.memory_space<vmem>>) attributes {dimension_semantics = [#tpu.dimension_semantics<parallel>, #tpu.dimension_semantics<arbitrary>], iteration_bounds = array<i64: 1, 4>, scalar_prefetch = 0 : i64, scratch_operands = 4 : i64, tpu.core_type = #tpu.core_type<tc>, window_params = [{transform_indices = @transform_0, window_bounds = array<i64: 2, 8, 4>}, {pipeline_mode = #tpu.pipeline_mode<synchronous>, transform_indices = @transform_1, window_bounds = array<i64: 1, 1>}, {pipeline_mode = #tpu.pipeline_mode<synchronous>, transform_indices = @transform_2, window_bounds = array<i64: 4, 32>}, {pipeline_mode = #tpu.pipeline_mode<synchronous>, transform_indices = @transform_3, window_bounds = array<i64: 1, 32>}, {pipeline_mode = #tpu.pipeline_mode<synchronous>, transform_indices = @transform_4, window_bounds = array<i64: 1, 32>}, {pipeline_mode = #tpu.pipeline_mode<synchronous>, transform_indices = @transform_5, window_bounds = array<i64: 1, 32>}, {transform_indices = @transform_6, window_bounds = array<i64: 1, 2, 96, 32>}, {transform_indices = @transform_7, window_bounds = array<i64: 1, 2, 1, 32>}, {transform_indices = @transform_8, window_bounds = array<i64: 1, 2, 1, 32>}, {transform_indices = @transform_9, window_bounds = array<i64: 1, 2, 1, 32>}, {pipeline_mode = #tpu.pipeline_mode<synchronous>, transform_indices = @transform_10, window_bounds = array<i64: 1, 32>}, {pipeline_mode = #tpu.pipeline_mode<synchronous>, transform_indices = @transform_11, window_bounds = array<i64: 1, 1>}, {pipeline_mode = #tpu.pipeline_mode<synchronous>, transform_indices = @transform_12, window_bounds = array<i64: 32, 32>}, {pipeline_mode = #tpu.pipeline_mode<synchronous>, transform_indices = @transform_13, window_bounds = array<i64: 1, 32>}, {pipeline_mode = #tpu.pipeline_mode<synchronous>, transform_indices = @transform_14, window_bounds = array<i64: 1, 32>}, {pipeline_mode = #tpu.pipeline_mode<synchronous>, transform_indices = @transform_15, window_bounds = array<i64: 1, 1>}, {transform_indices = @transform_16, window_bounds = array<i64: 2, 128>}]} {
    %c0_i32 = arith.constant 0 : i32
    %0 = arith.cmpi eq, %arg1, %c0_i32 : i32
    %1 = arith.extui %0 : i1 to i32
    %c0_i32_0 = arith.constant 0 : i32
    %2 = arith.cmpi ne, %1, %c0_i32_0 : i32
    scf.if %2 {
      %cst_88 = arith.constant 0.000000e+00 : f32
      %149 = vector.broadcast %cst_88 : f32 to vector<2x8x32xf32>
      %c0_89 = arith.constant 0 : index
      %c0_90 = arith.constant 0 : index
      %c0_91 = arith.constant 0 : index
      %150 = vector.load %arg20[%c0_89, %c0_90, %c0_91] : memref<2x24x32xf32, #tpu.memory_space<vmem>>, vector<2x8x32xf32>
      tpu.vector_store %arg20[%c0_89, %c0_90, %c0_91], %149 {strides = array<i32>} : memref<2x24x32xf32, #tpu.memory_space<vmem>>, vector<2x8x32xf32>,
      %cst_92 = arith.constant 0.000000e+00 : f32
      %151 = vector.broadcast %cst_92 : f32 to vector<2x8x32xf32>
      %c0_93 = arith.constant 0 : index
      %c16 = arith.constant 16 : index
      %c0_94 = arith.constant 0 : index
      %152 = vector.load %arg20[%c0_93, %c16, %c0_94] : memref<2x24x32xf32, #tpu.memory_space<vmem>>, vector<2x8x32xf32>
      tpu.vector_store %arg20[%c0_93, %c16, %c0_94], %151 {strides = array<i32>} : memref<2x24x32xf32, #tpu.memory_space<vmem>>, vector<2x8x32xf32>,
      %c0_95 = arith.constant 0 : index
      %c0_96 = arith.constant 0 : index
      %c0_97 = arith.constant 0 : index
      %153 = vector.load %arg2[%c0_95, %c0_96, %c0_97] : memref<2x8x4xf32, #tpu.memory_space<vmem>>, vector<2x8x4xf32>
      %154 = vector.shape_cast %153 : vector<2x8x4xf32> to vector<16x4xf32>
      %c0_98 = arith.constant 0 : index
      %c0_99 = arith.constant 0 : index
      %155 = vector.load %arg4[%c0_98, %c0_99] : memref<4x32xbf16, #tpu.memory_space<vmem>>, vector<4x32xbf16>
      %156 = arith.truncf %154 : vector<16x4xf32> to vector<16x4xbf16>
      %cst_100 = arith.constant dense<0.000000e+00> : vector<16x32xf32>
      %157 = tpu.matmul %156, %155, %cst_100 {dimension_numbers = #tpu.dot_dimension_numbers<[1], [0], [0], [1], [0, 0, 1, 1], [], []>} : vector<16x4xbf16>, vector<4x32xbf16>, vector<16x32xf32> -> vector<16x32xf32>
      %158 = vector.shape_cast %157 : vector<16x32xf32> to vector<2x8x32xf32>
      %c0_101 = arith.constant 0 : index
      %c0_102 = arith.constant 0 : index
      %159 = vector.load %arg5[%c0_101, %c0_102] : memref<1x32xf32, #tpu.memory_space<vmem>>, vector<1x32xf32>
      %160 = vector.shape_cast %159 : vector<1x32xf32> to vector<1x1x32xf32>
      %161 = vector.broadcast %160 : vector<1x1x32xf32> to vector<2x8x32xf32>
      %162 = arith.addf %158, %161 : vector<2x8x32xf32>
      %c0_103 = arith.constant 0 : index
      %c0_104 = arith.constant 0 : index
      %163 = vector.load %arg6[%c0_103, %c0_104] : memref<1x32xf32, #tpu.memory_space<vmem>>, vector<1x32xf32>
      %c0_105 = arith.constant 0 : index
      %c0_106 = arith.constant 0 : index
      %164 = vector.load %arg7[%c0_105, %c0_106] : memref<1x32xf32, #tpu.memory_space<vmem>>, vector<1x32xf32>
      %cst_107 = arith.constant dense<0.000000e+00> : vector<2x8xf32>
      %165 = vector.multi_reduction <add>, %162, %cst_107 [2] : vector<2x8x32xf32> to vector<2x8xf32>
      %166 = vector.shape_cast %165 : vector<2x8xf32> to vector<2x8x1xf32>
      %cst_108 = arith.constant 3.200000e+01 : f32
      %167 = vector.broadcast %cst_108 : f32 to vector<2x8x1xf32>
      %168 = arith.divf %166, %167 : vector<2x8x1xf32>
      %169 = vector.broadcast %168 : vector<2x8x1xf32> to vector<2x8x32xf32>
      %170 = arith.subf %162, %169 : vector<2x8x32xf32>
      %171 = arith.mulf %170, %170 : vector<2x8x32xf32>
      %cst_109 = arith.constant dense<0.000000e+00> : vector<2x8xf32>
      %172 = vector.multi_reduction <add>, %171, %cst_109 [2] : vector<2x8x32xf32> to vector<2x8xf32>
      %173 = vector.shape_cast %172 : vector<2x8xf32> to vector<2x8x1xf32>
      %cst_110 = arith.constant 3.200000e+01 : f32
      %174 = vector.broadcast %cst_110 : f32 to vector<2x8x1xf32>
      %175 = arith.divf %173, %174 : vector<2x8x1xf32>
      %176 = vector.broadcast %168 : vector<2x8x1xf32> to vector<2x8x32xf32>
      %177 = arith.subf %162, %176 : vector<2x8x32xf32>
      %cst_111 = arith.constant 9.99999974E-6 : f32
      %178 = vector.broadcast %cst_111 : f32 to vector<2x8x1xf32>
      %179 = arith.addf %175, %178 : vector<2x8x1xf32>
      %180 = math.rsqrt %179 : vector<2x8x1xf32>
      %181 = vector.broadcast %180 : vector<2x8x1xf32> to vector<2x8x32xf32>
      %182 = arith.mulf %177, %181 : vector<2x8x32xf32>
      %183 = vector.shape_cast %163 : vector<1x32xf32> to vector<1x1x32xf32>
      %184 = vector.broadcast %183 : vector<1x1x32xf32> to vector<2x8x32xf32>
      %185 = arith.mulf %182, %184 : vector<2x8x32xf32>
      %186 = vector.shape_cast %164 : vector<1x32xf32> to vector<1x1x32xf32>
      %187 = vector.broadcast %186 : vector<1x1x32xf32> to vector<2x8x32xf32>
      %188 = arith.addf %185, %187 : vector<2x8x32xf32>
      %cst_112 = arith.constant 0.000000e+00 : f32
      %189 = vector.broadcast %cst_112 : f32 to vector<2x8x32xf32>
      %190 = arith.cmpf ogt, %188, %189 : vector<2x8x32xf32>
      %cst_113 = arith.constant 2.000000e-01 : f32
      %191 = vector.broadcast %cst_113 : f32 to vector<2x8x32xf32>
      %192 = arith.mulf %191, %188 : vector<2x8x32xf32>
      %193 = arith.select %190, %188, %192 : vector<2x8x32xi1>, vector<2x8x32xf32>
      %c0_114 = arith.constant 0 : index
      %c0_115 = arith.constant 0 : index
      %c0_116 = arith.constant 0 : index
      %194 = vector.load %arg19[%c0_114, %c0_115, %c0_116] : memref<2x8x32xf32, #tpu.memory_space<vmem>>, vector<2x8x32xf32>
      tpu.vector_store %arg19[%c0_114, %c0_115, %c0_116], %193 {strides = array<i32>} : memref<2x8x32xf32, #tpu.memory_space<vmem>>, vector<2x8x32xf32>,
    } else {
    }
    %c0 = arith.constant 0 : index
    %c0_1 = arith.constant 0 : index
    %c0_2 = arith.constant 0 : index
    %3 = vector.load %arg19[%c0, %c0_1, %c0_2] : memref<2x8x32xf32, #tpu.memory_space<vmem>>, vector<2x8x32xf32>
    %c0_3 = arith.constant 0 : index
    %c8 = arith.constant 8 : index
    %c0_4 = arith.constant 0 : index
    %4 = vector.load %arg20[%c0_3, %c8, %c0_4] : memref<2x24x32xf32, #tpu.memory_space<vmem>>, vector<2x8x32xf32>
    tpu.vector_store %arg20[%c0_3, %c8, %c0_4], %3 {strides = array<i32>} : memref<2x24x32xf32, #tpu.memory_space<vmem>>, vector<2x8x32xf32>,
    %c0_i32_5 = arith.constant 0 : i32
    %5 = arith.cmpi eq, %arg1, %c0_i32_5 : i32
    %6 = arith.extui %5 : i1 to i32
    %c0_i32_6 = arith.constant 0 : i32
    %7 = arith.cmpi ne, %6, %c0_i32_6 : i32
    scf.if %7 {
      %c0_88 = arith.constant 0 : index
      %c7 = arith.constant 7 : index
      %c0_89 = arith.constant 0 : index
      %149 = vector.load %arg20[%c0_88, %c7, %c0_89] : memref<2x24x32xf32, #tpu.memory_space<vmem>>, vector<2x8x32xf32>
      %c0_90 = arith.constant 0 : index
      %c0_91 = arith.constant 0 : index
      %c0_92 = arith.constant 0 : index
      %150 = vector.load %arg21[%c0_90, %c0_91, %c0_92] : memref<2x8x32xf32, #tpu.memory_space<vmem>>, vector<2x8x32xf32>
      tpu.vector_store %arg21[%c0_90, %c0_91, %c0_92], %149 {strides = array<i32>} : memref<2x8x32xf32, #tpu.memory_space<vmem>>, vector<2x8x32xf32>,
      %c0_93 = arith.constant 0 : index
      %c9 = arith.constant 9 : index
      %c0_94 = arith.constant 0 : index
      %151 = vector.load %arg20[%c0_93, %c9, %c0_94] : memref<2x24x32xf32, #tpu.memory_space<vmem>>, vector<2x8x32xf32>
      %c0_95 = arith.constant 0 : index
      %c0_96 = arith.constant 0 : index
      %c0_97 = arith.constant 0 : index
      %152 = vector.load %arg22[%c0_95, %c0_96, %c0_97] : memref<2x8x32xf32, #tpu.memory_space<vmem>>, vector<2x8x32xf32>
      tpu.vector_store %arg22[%c0_95, %c0_96, %c0_97], %151 {strides = array<i32>} : memref<2x8x32xf32, #tpu.memory_space<vmem>>, vector<2x8x32xf32>,
    } else {
    }
    %c1_i32 = arith.constant 1 : i32
    %8 = arith.cmpi eq, %arg1, %c1_i32 : i32
    %9 = arith.extui %8 : i1 to i32
    %c0_i32_7 = arith.constant 0 : i32
    %10 = arith.cmpi ne, %9, %c0_i32_7 : i32
    scf.if %10 {
      %c0_88 = arith.constant 0 : index
      %c6 = arith.constant 6 : index
      %c0_89 = arith.constant 0 : index
      %149 = vector.load %arg20[%c0_88, %c6, %c0_89] : memref<2x24x32xf32, #tpu.memory_space<vmem>>, vector<2x8x32xf32>
      %c0_90 = arith.constant 0 : index
      %c0_91 = arith.constant 0 : index
      %c0_92 = arith.constant 0 : index
      %150 = vector.load %arg21[%c0_90, %c0_91, %c0_92] : memref<2x8x32xf32, #tpu.memory_space<vmem>>, vector<2x8x32xf32>
      tpu.vector_store %arg21[%c0_90, %c0_91, %c0_92], %149 {strides = array<i32>} : memref<2x8x32xf32, #tpu.memory_space<vmem>>, vector<2x8x32xf32>,
      %c0_93 = arith.constant 0 : index
      %c10 = arith.constant 10 : index
      %c0_94 = arith.constant 0 : index
      %151 = vector.load %arg20[%c0_93, %c10, %c0_94] : memref<2x24x32xf32, #tpu.memory_space<vmem>>, vector<2x8x32xf32>
      %c0_95 = arith.constant 0 : index
      %c0_96 = arith.constant 0 : index
      %c0_97 = arith.constant 0 : index
      %152 = vector.load %arg22[%c0_95, %c0_96, %c0_97] : memref<2x8x32xf32, #tpu.memory_space<vmem>>, vector<2x8x32xf32>
      tpu.vector_store %arg22[%c0_95, %c0_96, %c0_97], %151 {strides = array<i32>} : memref<2x8x32xf32, #tpu.memory_space<vmem>>, vector<2x8x32xf32>,
    } else {
    }
    %c2_i32 = arith.constant 2 : i32
    %11 = arith.cmpi eq, %arg1, %c2_i32 : i32
    %12 = arith.extui %11 : i1 to i32
    %c0_i32_8 = arith.constant 0 : i32
    %13 = arith.cmpi ne, %12, %c0_i32_8 : i32
    scf.if %13 {
      %c0_88 = arith.constant 0 : index
      %c4 = arith.constant 4 : index
      %c0_89 = arith.constant 0 : index
      %149 = vector.load %arg20[%c0_88, %c4, %c0_89] : memref<2x24x32xf32, #tpu.memory_space<vmem>>, vector<2x8x32xf32>
      %c0_90 = arith.constant 0 : index
      %c0_91 = arith.constant 0 : index
      %c0_92 = arith.constant 0 : index
      %150 = vector.load %arg21[%c0_90, %c0_91, %c0_92] : memref<2x8x32xf32, #tpu.memory_space<vmem>>, vector<2x8x32xf32>
      tpu.vector_store %arg21[%c0_90, %c0_91, %c0_92], %149 {strides = array<i32>} : memref<2x8x32xf32, #tpu.memory_space<vmem>>, vector<2x8x32xf32>,
      %c0_93 = arith.constant 0 : index
      %c12 = arith.constant 12 : index
      %c0_94 = arith.constant 0 : index
      %151 = vector.load %arg20[%c0_93, %c12, %c0_94] : memref<2x24x32xf32, #tpu.memory_space<vmem>>, vector<2x8x32xf32>
      %c0_95 = arith.constant 0 : index
      %c0_96 = arith.constant 0 : index
      %c0_97 = arith.constant 0 : index
      %152 = vector.load %arg22[%c0_95, %c0_96, %c0_97] : memref<2x8x32xf32, #tpu.memory_space<vmem>>, vector<2x8x32xf32>
      tpu.vector_store %arg22[%c0_95, %c0_96, %c0_97], %151 {strides = array<i32>} : memref<2x8x32xf32, #tpu.memory_space<vmem>>, vector<2x8x32xf32>,
    } else {
    }
    %c3_i32 = arith.constant 3 : i32
    %14 = arith.cmpi eq, %arg1, %c3_i32 : i32
    %15 = arith.extui %14 : i1 to i32
    %c0_i32_9 = arith.constant 0 : i32
    %16 = arith.cmpi ne, %15, %c0_i32_9 : i32
    scf.if %16 {
      %c0_88 = arith.constant 0 : index
      %c0_89 = arith.constant 0 : index
      %c0_90 = arith.constant 0 : index
      %149 = vector.load %arg20[%c0_88, %c0_89, %c0_90] : memref<2x24x32xf32, #tpu.memory_space<vmem>>, vector<2x8x32xf32>
      %c0_91 = arith.constant 0 : index
      %c0_92 = arith.constant 0 : index
      %c0_93 = arith.constant 0 : index
      %150 = vector.load %arg21[%c0_91, %c0_92, %c0_93] : memref<2x8x32xf32, #tpu.memory_space<vmem>>, vector<2x8x32xf32>
      tpu.vector_store %arg21[%c0_91, %c0_92, %c0_93], %149 {strides = array<i32>} : memref<2x8x32xf32, #tpu.memory_space<vmem>>, vector<2x8x32xf32>,
      %c0_94 = arith.constant 0 : index
      %c16 = arith.constant 16 : index
      %c0_95 = arith.constant 0 : index
      %151 = vector.load %arg20[%c0_94, %c16, %c0_95] : memref<2x24x32xf32, #tpu.memory_space<vmem>>, vector<2x8x32xf32>
      %c0_96 = arith.constant 0 : index
      %c0_97 = arith.constant 0 : index
      %c0_98 = arith.constant 0 : index
      %152 = vector.load %arg22[%c0_96, %c0_97, %c0_98] : memref<2x8x32xf32, #tpu.memory_space<vmem>>, vector<2x8x32xf32>
      tpu.vector_store %arg22[%c0_96, %c0_97, %c0_98], %151 {strides = array<i32>} : memref<2x8x32xf32, #tpu.memory_space<vmem>>, vector<2x8x32xf32>,
    } else {
    }
    %c0_10 = arith.constant 0 : index
    %c0_11 = arith.constant 0 : index
    %c0_12 = arith.constant 0 : index
    %c0_13 = arith.constant 0 : index
    %17 = vector.load %arg8[%c0_10, %c0_11, %c0_12, %c0_13] : memref<1x2x96x32xbf16, #tpu.memory_space<vmem>>, vector<1x1x96x32xbf16>
    %18 = vector.shape_cast %17 : vector<1x1x96x32xbf16> to vector<96x32xbf16>
    %c0_14 = arith.constant 0 : index
    %c0_15 = arith.constant 0 : index
    %c0_16 = arith.constant 0 : index
    %19 = vector.load %arg21[%c0_14, %c0_15, %c0_16] : memref<2x8x32xf32, #tpu.memory_space<vmem>>, vector<2x8x32xf32>
    %20 = vector.shape_cast %19 : vector<2x8x32xf32> to vector<16x32xf32>
    %21 = vector.extract_strided_slice %18 {offsets = [0, 0], sizes = [32, 32], strides = [1, 1]} : vector<96x32xbf16> to vector<32x32xbf16>
    %22 = arith.truncf %20 : vector<16x32xf32> to vector<16x32xbf16>
    %cst = arith.constant dense<0.000000e+00> : vector<16x32xf32>
    %23 = tpu.matmul %22, %21, %cst {dimension_numbers = #tpu.dot_dimension_numbers<[1], [0], [0], [1], [0, 0, 1, 1], [], []>} : vector<16x32xbf16>, vector<32x32xbf16>, vector<16x32xf32> -> vector<16x32xf32>
    %24 = vector.shape_cast %3 : vector<2x8x32xf32> to vector<16x32xf32>
    %25 = vector.extract_strided_slice %18 {offsets = [32, 0], sizes = [32, 32], strides = [1, 1]} : vector<96x32xbf16> to vector<32x32xbf16>
    %26 = arith.truncf %24 : vector<16x32xf32> to vector<16x32xbf16>
    %cst_17 = arith.constant dense<0.000000e+00> : vector<16x32xf32>
    %27 = tpu.matmul %26, %25, %cst_17 {dimension_numbers = #tpu.dot_dimension_numbers<[1], [0], [0], [1], [0, 0, 1, 1], [], []>} : vector<16x32xbf16>, vector<32x32xbf16>, vector<16x32xf32> -> vector<16x32xf32>
    %28 = arith.addf %23, %27 : vector<16x32xf32>
    %c0_18 = arith.constant 0 : index
    %c0_19 = arith.constant 0 : index
    %c0_20 = arith.constant 0 : index
    %29 = vector.load %arg22[%c0_18, %c0_19, %c0_20] : memref<2x8x32xf32, #tpu.memory_space<vmem>>, vector<2x8x32xf32>
    %30 = vector.shape_cast %29 : vector<2x8x32xf32> to vector<16x32xf32>
    %31 = vector.extract_strided_slice %18 {offsets = [64, 0], sizes = [32, 32], strides = [1, 1]} : vector<96x32xbf16> to vector<32x32xbf16>
    %32 = arith.truncf %30 : vector<16x32xf32> to vector<16x32xbf16>
    %cst_21 = arith.constant dense<0.000000e+00> : vector<16x32xf32>
    %33 = tpu.matmul %32, %31, %cst_21 {dimension_numbers = #tpu.dot_dimension_numbers<[1], [0], [0], [1], [0, 0, 1, 1], [], []>} : vector<16x32xbf16>, vector<32x32xbf16>, vector<16x32xf32> -> vector<16x32xf32>
    %34 = arith.addf %28, %33 : vector<16x32xf32>
    %35 = vector.shape_cast %34 : vector<16x32xf32> to vector<2x8x32xf32>
    %c0_22 = arith.constant 0 : index
    %c0_23 = arith.constant 0 : index
    %c0_24 = arith.constant 0 : index
    %c0_25 = arith.constant 0 : index
    %36 = vector.load %arg9[%c0_22, %c0_23, %c0_24, %c0_25] : memref<1x2x1x32xf32, #tpu.memory_space<vmem>>, vector<1x1x1x32xf32>
    %37 = vector.shape_cast %36 : vector<1x1x1x32xf32> to vector<1x32xf32>
    %38 = vector.shape_cast %37 : vector<1x32xf32> to vector<1x1x32xf32>
    %39 = vector.broadcast %38 : vector<1x1x32xf32> to vector<2x8x32xf32>
    %40 = arith.addf %35, %39 : vector<2x8x32xf32>
    %c0_26 = arith.constant 0 : index
    %c0_27 = arith.constant 0 : index
    %c0_28 = arith.constant 0 : index
    %c0_29 = arith.constant 0 : index
    %41 = vector.load %arg10[%c0_26, %c0_27, %c0_28, %c0_29] : memref<1x2x1x32xf32, #tpu.memory_space<vmem>>, vector<1x1x1x32xf32>
    %42 = vector.shape_cast %41 : vector<1x1x1x32xf32> to vector<1x32xf32>
    %c0_30 = arith.constant 0 : index
    %c0_31 = arith.constant 0 : index
    %c0_32 = arith.constant 0 : index
    %c0_33 = arith.constant 0 : index
    %43 = vector.load %arg11[%c0_30, %c0_31, %c0_32, %c0_33] : memref<1x2x1x32xf32, #tpu.memory_space<vmem>>, vector<1x1x1x32xf32>
    %44 = vector.shape_cast %43 : vector<1x1x1x32xf32> to vector<1x32xf32>
    %cst_34 = arith.constant dense<0.000000e+00> : vector<2x8xf32>
    %45 = vector.multi_reduction <add>, %40, %cst_34 [2] : vector<2x8x32xf32> to vector<2x8xf32>
    %46 = vector.shape_cast %45 : vector<2x8xf32> to vector<2x8x1xf32>
    %cst_35 = arith.constant 3.200000e+01 : f32
    %47 = vector.broadcast %cst_35 : f32 to vector<2x8x1xf32>
    %48 = arith.divf %46, %47 : vector<2x8x1xf32>
    %49 = vector.broadcast %48 : vector<2x8x1xf32> to vector<2x8x32xf32>
    %50 = arith.subf %40, %49 : vector<2x8x32xf32>
    %51 = arith.mulf %50, %50 : vector<2x8x32xf32>
    %cst_36 = arith.constant dense<0.000000e+00> : vector<2x8xf32>
    %52 = vector.multi_reduction <add>, %51, %cst_36 [2] : vector<2x8x32xf32> to vector<2x8xf32>
    %53 = vector.shape_cast %52 : vector<2x8xf32> to vector<2x8x1xf32>
    %cst_37 = arith.constant 3.200000e+01 : f32
    %54 = vector.broadcast %cst_37 : f32 to vector<2x8x1xf32>
    %55 = arith.divf %53, %54 : vector<2x8x1xf32>
    %56 = vector.broadcast %48 : vector<2x8x1xf32> to vector<2x8x32xf32>
    %57 = arith.subf %40, %56 : vector<2x8x32xf32>
    %cst_38 = arith.constant 9.99999974E-6 : f32
    %58 = vector.broadcast %cst_38 : f32 to vector<2x8x1xf32>
    %59 = arith.addf %55, %58 : vector<2x8x1xf32>
    %60 = math.rsqrt %59 : vector<2x8x1xf32>
    %61 = vector.broadcast %60 : vector<2x8x1xf32> to vector<2x8x32xf32>
    %62 = arith.mulf %57, %61 : vector<2x8x32xf32>
    %63 = vector.shape_cast %42 : vector<1x32xf32> to vector<1x1x32xf32>
    %64 = vector.broadcast %63 : vector<1x1x32xf32> to vector<2x8x32xf32>
    %65 = arith.mulf %62, %64 : vector<2x8x32xf32>
    %66 = vector.shape_cast %44 : vector<1x32xf32> to vector<1x1x32xf32>
    %67 = vector.broadcast %66 : vector<1x1x32xf32> to vector<2x8x32xf32>
    %68 = arith.addf %65, %67 : vector<2x8x32xf32>
    %cst_39 = arith.constant 0.000000e+00 : f32
    %69 = vector.broadcast %cst_39 : f32 to vector<2x8x32xf32>
    %70 = arith.cmpf ogt, %68, %69 : vector<2x8x32xf32>
    %cst_40 = arith.constant 2.000000e-01 : f32
    %71 = vector.broadcast %cst_40 : f32 to vector<2x8x32xf32>
    %72 = arith.mulf %71, %68 : vector<2x8x32xf32>
    %73 = arith.select %70, %68, %72 : vector<2x8x32xi1>, vector<2x8x32xf32>
    %c0_41 = arith.constant 0 : index
    %c8_42 = arith.constant 8 : index
    %c0_43 = arith.constant 0 : index
    %74 = vector.load %arg20[%c0_41, %c8_42, %c0_43] : memref<2x24x32xf32, #tpu.memory_space<vmem>>, vector<2x8x32xf32>
    tpu.vector_store %arg20[%c0_41, %c8_42, %c0_43], %73 {strides = array<i32>} : memref<2x24x32xf32, #tpu.memory_space<vmem>>, vector<2x8x32xf32>,
    %c0_i32_44 = arith.constant 0 : i32
    %75 = arith.cmpi eq, %arg1, %c0_i32_44 : i32
    %76 = arith.extui %75 : i1 to i32
    %c0_i32_45 = arith.constant 0 : i32
    %77 = arith.cmpi ne, %76, %c0_i32_45 : i32
    scf.if %77 {
      %c0_88 = arith.constant 0 : index
      %c7 = arith.constant 7 : index
      %c0_89 = arith.constant 0 : index
      %149 = vector.load %arg20[%c0_88, %c7, %c0_89] : memref<2x24x32xf32, #tpu.memory_space<vmem>>, vector<2x8x32xf32>
      %c0_90 = arith.constant 0 : index
      %c0_91 = arith.constant 0 : index
      %c0_92 = arith.constant 0 : index
      %150 = vector.load %arg21[%c0_90, %c0_91, %c0_92] : memref<2x8x32xf32, #tpu.memory_space<vmem>>, vector<2x8x32xf32>
      tpu.vector_store %arg21[%c0_90, %c0_91, %c0_92], %149 {strides = array<i32>} : memref<2x8x32xf32, #tpu.memory_space<vmem>>, vector<2x8x32xf32>,
      %c0_93 = arith.constant 0 : index
      %c9 = arith.constant 9 : index
      %c0_94 = arith.constant 0 : index
      %151 = vector.load %arg20[%c0_93, %c9, %c0_94] : memref<2x24x32xf32, #tpu.memory_space<vmem>>, vector<2x8x32xf32>
      %c0_95 = arith.constant 0 : index
      %c0_96 = arith.constant 0 : index
      %c0_97 = arith.constant 0 : index
      %152 = vector.load %arg22[%c0_95, %c0_96, %c0_97] : memref<2x8x32xf32, #tpu.memory_space<vmem>>, vector<2x8x32xf32>
      tpu.vector_store %arg22[%c0_95, %c0_96, %c0_97], %151 {strides = array<i32>} : memref<2x8x32xf32, #tpu.memory_space<vmem>>, vector<2x8x32xf32>,
    } else {
    }
    %c1_i32_46 = arith.constant 1 : i32
    %78 = arith.cmpi eq, %arg1, %c1_i32_46 : i32
    %79 = arith.extui %78 : i1 to i32
    %c0_i32_47 = arith.constant 0 : i32
    %80 = arith.cmpi ne, %79, %c0_i32_47 : i32
    scf.if %80 {
      %c0_88 = arith.constant 0 : index
      %c6 = arith.constant 6 : index
      %c0_89 = arith.constant 0 : index
      %149 = vector.load %arg20[%c0_88, %c6, %c0_89] : memref<2x24x32xf32, #tpu.memory_space<vmem>>, vector<2x8x32xf32>
      %c0_90 = arith.constant 0 : index
      %c0_91 = arith.constant 0 : index
      %c0_92 = arith.constant 0 : index
      %150 = vector.load %arg21[%c0_90, %c0_91, %c0_92] : memref<2x8x32xf32, #tpu.memory_space<vmem>>, vector<2x8x32xf32>
      tpu.vector_store %arg21[%c0_90, %c0_91, %c0_92], %149 {strides = array<i32>} : memref<2x8x32xf32, #tpu.memory_space<vmem>>, vector<2x8x32xf32>,
      %c0_93 = arith.constant 0 : index
      %c10 = arith.constant 10 : index
      %c0_94 = arith.constant 0 : index
      %151 = vector.load %arg20[%c0_93, %c10, %c0_94] : memref<2x24x32xf32, #tpu.memory_space<vmem>>, vector<2x8x32xf32>
      %c0_95 = arith.constant 0 : index
      %c0_96 = arith.constant 0 : index
      %c0_97 = arith.constant 0 : index
      %152 = vector.load %arg22[%c0_95, %c0_96, %c0_97] : memref<2x8x32xf32, #tpu.memory_space<vmem>>, vector<2x8x32xf32>
      tpu.vector_store %arg22[%c0_95, %c0_96, %c0_97], %151 {strides = array<i32>} : memref<2x8x32xf32, #tpu.memory_space<vmem>>, vector<2x8x32xf32>,
    } else {
    }
    %c2_i32_48 = arith.constant 2 : i32
    %81 = arith.cmpi eq, %arg1, %c2_i32_48 : i32
    %82 = arith.extui %81 : i1 to i32
    %c0_i32_49 = arith.constant 0 : i32
    %83 = arith.cmpi ne, %82, %c0_i32_49 : i32
    scf.if %83 {
      %c0_88 = arith.constant 0 : index
      %c4 = arith.constant 4 : index
      %c0_89 = arith.constant 0 : index
      %149 = vector.load %arg20[%c0_88, %c4, %c0_89] : memref<2x24x32xf32, #tpu.memory_space<vmem>>, vector<2x8x32xf32>
      %c0_90 = arith.constant 0 : index
      %c0_91 = arith.constant 0 : index
      %c0_92 = arith.constant 0 : index
      %150 = vector.load %arg21[%c0_90, %c0_91, %c0_92] : memref<2x8x32xf32, #tpu.memory_space<vmem>>, vector<2x8x32xf32>
      tpu.vector_store %arg21[%c0_90, %c0_91, %c0_92], %149 {strides = array<i32>} : memref<2x8x32xf32, #tpu.memory_space<vmem>>, vector<2x8x32xf32>,
      %c0_93 = arith.constant 0 : index
      %c12 = arith.constant 12 : index
      %c0_94 = arith.constant 0 : index
      %151 = vector.load %arg20[%c0_93, %c12, %c0_94] : memref<2x24x32xf32, #tpu.memory_space<vmem>>, vector<2x8x32xf32>
      %c0_95 = arith.constant 0 : index
      %c0_96 = arith.constant 0 : index
      %c0_97 = arith.constant 0 : index
      %152 = vector.load %arg22[%c0_95, %c0_96, %c0_97] : memref<2x8x32xf32, #tpu.memory_space<vmem>>, vector<2x8x32xf32>
      tpu.vector_store %arg22[%c0_95, %c0_96, %c0_97], %151 {strides = array<i32>} : memref<2x8x32xf32, #tpu.memory_space<vmem>>, vector<2x8x32xf32>,
    } else {
    }
    %c3_i32_50 = arith.constant 3 : i32
    %84 = arith.cmpi eq, %arg1, %c3_i32_50 : i32
    %85 = arith.extui %84 : i1 to i32
    %c0_i32_51 = arith.constant 0 : i32
    %86 = arith.cmpi ne, %85, %c0_i32_51 : i32
    scf.if %86 {
      %c0_88 = arith.constant 0 : index
      %c0_89 = arith.constant 0 : index
      %c0_90 = arith.constant 0 : index
      %149 = vector.load %arg20[%c0_88, %c0_89, %c0_90] : memref<2x24x32xf32, #tpu.memory_space<vmem>>, vector<2x8x32xf32>
      %c0_91 = arith.constant 0 : index
      %c0_92 = arith.constant 0 : index
      %c0_93 = arith.constant 0 : index
      %150 = vector.load %arg21[%c0_91, %c0_92, %c0_93] : memref<2x8x32xf32, #tpu.memory_space<vmem>>, vector<2x8x32xf32>
      tpu.vector_store %arg21[%c0_91, %c0_92, %c0_93], %149 {strides = array<i32>} : memref<2x8x32xf32, #tpu.memory_space<vmem>>, vector<2x8x32xf32>,
      %c0_94 = arith.constant 0 : index
      %c16 = arith.constant 16 : index
      %c0_95 = arith.constant 0 : index
      %151 = vector.load %arg20[%c0_94, %c16, %c0_95] : memref<2x24x32xf32, #tpu.memory_space<vmem>>, vector<2x8x32xf32>
      %c0_96 = arith.constant 0 : index
      %c0_97 = arith.constant 0 : index
      %c0_98 = arith.constant 0 : index
      %152 = vector.load %arg22[%c0_96, %c0_97, %c0_98] : memref<2x8x32xf32, #tpu.memory_space<vmem>>, vector<2x8x32xf32>
      tpu.vector_store %arg22[%c0_96, %c0_97, %c0_98], %151 {strides = array<i32>} : memref<2x8x32xf32, #tpu.memory_space<vmem>>, vector<2x8x32xf32>,
    } else {
    }
    %c0_52 = arith.constant 0 : index
    %c1 = arith.constant 1 : index
    %c0_53 = arith.constant 0 : index
    %c0_54 = arith.constant 0 : index
    %87 = vector.load %arg8[%c0_52, %c1, %c0_53, %c0_54] : memref<1x2x96x32xbf16, #tpu.memory_space<vmem>>, vector<1x1x96x32xbf16>
    %88 = vector.shape_cast %87 : vector<1x1x96x32xbf16> to vector<96x32xbf16>
    %c0_55 = arith.constant 0 : index
    %c0_56 = arith.constant 0 : index
    %c0_57 = arith.constant 0 : index
    %89 = vector.load %arg21[%c0_55, %c0_56, %c0_57] : memref<2x8x32xf32, #tpu.memory_space<vmem>>, vector<2x8x32xf32>
    %90 = vector.shape_cast %89 : vector<2x8x32xf32> to vector<16x32xf32>
    %91 = vector.extract_strided_slice %88 {offsets = [0, 0], sizes = [32, 32], strides = [1, 1]} : vector<96x32xbf16> to vector<32x32xbf16>
    %92 = arith.truncf %90 : vector<16x32xf32> to vector<16x32xbf16>
    %cst_58 = arith.constant dense<0.000000e+00> : vector<16x32xf32>
    %93 = tpu.matmul %92, %91, %cst_58 {dimension_numbers = #tpu.dot_dimension_numbers<[1], [0], [0], [1], [0, 0, 1, 1], [], []>} : vector<16x32xbf16>, vector<32x32xbf16>, vector<16x32xf32> -> vector<16x32xf32>
    %94 = vector.shape_cast %73 : vector<2x8x32xf32> to vector<16x32xf32>
    %95 = vector.extract_strided_slice %88 {offsets = [32, 0], sizes = [32, 32], strides = [1, 1]} : vector<96x32xbf16> to vector<32x32xbf16>
    %96 = arith.truncf %94 : vector<16x32xf32> to vector<16x32xbf16>
    %cst_59 = arith.constant dense<0.000000e+00> : vector<16x32xf32>
    %97 = tpu.matmul %96, %95, %cst_59 {dimension_numbers = #tpu.dot_dimension_numbers<[1], [0], [0], [1], [0, 0, 1, 1], [], []>} : vector<16x32xbf16>, vector<32x32xbf16>, vector<16x32xf32> -> vector<16x32xf32>
    %98 = arith.addf %93, %97 : vector<16x32xf32>
    %c0_60 = arith.constant 0 : index
    %c0_61 = arith.constant 0 : index
    %c0_62 = arith.constant 0 : index
    %99 = vector.load %arg22[%c0_60, %c0_61, %c0_62] : memref<2x8x32xf32, #tpu.memory_space<vmem>>, vector<2x8x32xf32>
    %100 = vector.shape_cast %99 : vector<2x8x32xf32> to vector<16x32xf32>
    %101 = vector.extract_strided_slice %88 {offsets = [64, 0], sizes = [32, 32], strides = [1, 1]} : vector<96x32xbf16> to vector<32x32xbf16>
    %102 = arith.truncf %100 : vector<16x32xf32> to vector<16x32xbf16>
    %cst_63 = arith.constant dense<0.000000e+00> : vector<16x32xf32>
    %103 = tpu.matmul %102, %101, %cst_63 {dimension_numbers = #tpu.dot_dimension_numbers<[1], [0], [0], [1], [0, 0, 1, 1], [], []>} : vector<16x32xbf16>, vector<32x32xbf16>, vector<16x32xf32> -> vector<16x32xf32>
    %104 = arith.addf %98, %103 : vector<16x32xf32>
    %105 = vector.shape_cast %104 : vector<16x32xf32> to vector<2x8x32xf32>
    %c0_64 = arith.constant 0 : index
    %c1_65 = arith.constant 1 : index
    %c0_66 = arith.constant 0 : index
    %c0_67 = arith.constant 0 : index
    %106 = vector.load %arg9[%c0_64, %c1_65, %c0_66, %c0_67] : memref<1x2x1x32xf32, #tpu.memory_space<vmem>>, vector<1x1x1x32xf32>
    %107 = vector.shape_cast %106 : vector<1x1x1x32xf32> to vector<1x32xf32>
    %108 = vector.shape_cast %107 : vector<1x32xf32> to vector<1x1x32xf32>
    %109 = vector.broadcast %108 : vector<1x1x32xf32> to vector<2x8x32xf32>
    %110 = arith.addf %105, %109 : vector<2x8x32xf32>
    %c0_68 = arith.constant 0 : index
    %c1_69 = arith.constant 1 : index
    %c0_70 = arith.constant 0 : index
    %c0_71 = arith.constant 0 : index
    %111 = vector.load %arg10[%c0_68, %c1_69, %c0_70, %c0_71] : memref<1x2x1x32xf32, #tpu.memory_space<vmem>>, vector<1x1x1x32xf32>
    %112 = vector.shape_cast %111 : vector<1x1x1x32xf32> to vector<1x32xf32>
    %c0_72 = arith.constant 0 : index
    %c1_73 = arith.constant 1 : index
    %c0_74 = arith.constant 0 : index
    %c0_75 = arith.constant 0 : index
    %113 = vector.load %arg11[%c0_72, %c1_73, %c0_74, %c0_75] : memref<1x2x1x32xf32, #tpu.memory_space<vmem>>, vector<1x1x1x32xf32>
    %114 = vector.shape_cast %113 : vector<1x1x1x32xf32> to vector<1x32xf32>
    %cst_76 = arith.constant dense<0.000000e+00> : vector<2x8xf32>
    %115 = vector.multi_reduction <add>, %110, %cst_76 [2] : vector<2x8x32xf32> to vector<2x8xf32>
    %116 = vector.shape_cast %115 : vector<2x8xf32> to vector<2x8x1xf32>
    %cst_77 = arith.constant 3.200000e+01 : f32
    %117 = vector.broadcast %cst_77 : f32 to vector<2x8x1xf32>
    %118 = arith.divf %116, %117 : vector<2x8x1xf32>
    %119 = vector.broadcast %118 : vector<2x8x1xf32> to vector<2x8x32xf32>
    %120 = arith.subf %110, %119 : vector<2x8x32xf32>
    %121 = arith.mulf %120, %120 : vector<2x8x32xf32>
    %cst_78 = arith.constant dense<0.000000e+00> : vector<2x8xf32>
    %122 = vector.multi_reduction <add>, %121, %cst_78 [2] : vector<2x8x32xf32> to vector<2x8xf32>
    %123 = vector.shape_cast %122 : vector<2x8xf32> to vector<2x8x1xf32>
    %cst_79 = arith.constant 3.200000e+01 : f32
    %124 = vector.broadcast %cst_79 : f32 to vector<2x8x1xf32>
    %125 = arith.divf %123, %124 : vector<2x8x1xf32>
    %126 = vector.broadcast %118 : vector<2x8x1xf32> to vector<2x8x32xf32>
    %127 = arith.subf %110, %126 : vector<2x8x32xf32>
    %cst_80 = arith.constant 9.99999974E-6 : f32
    %128 = vector.broadcast %cst_80 : f32 to vector<2x8x1xf32>
    %129 = arith.addf %125, %128 : vector<2x8x1xf32>
    %130 = math.rsqrt %129 : vector<2x8x1xf32>
    %131 = vector.broadcast %130 : vector<2x8x1xf32> to vector<2x8x32xf32>
    %132 = arith.mulf %127, %131 : vector<2x8x32xf32>
    %133 = vector.shape_cast %112 : vector<1x32xf32> to vector<1x1x32xf32>
    %134 = vector.broadcast %133 : vector<1x1x32xf32> to vector<2x8x32xf32>
    %135 = arith.mulf %132, %134 : vector<2x8x32xf32>
    %136 = vector.shape_cast %114 : vector<1x32xf32> to vector<1x1x32xf32>
    %137 = vector.broadcast %136 : vector<1x1x32xf32> to vector<2x8x32xf32>
    %138 = arith.addf %135, %137 : vector<2x8x32xf32>
    %139 = arith.addf %138, %3 : vector<2x8x32xf32>
    %cst_81 = arith.constant 0.000000e+00 : f32
    %140 = vector.broadcast %cst_81 : f32 to vector<2x8x32xf32>
    %141 = arith.cmpf ogt, %139, %140 : vector<2x8x32xf32>
    %cst_82 = arith.constant 2.000000e-01 : f32
    %142 = vector.broadcast %cst_82 : f32 to vector<2x8x32xf32>
    %143 = arith.mulf %142, %139 : vector<2x8x32xf32>
    %144 = arith.select %141, %139, %143 : vector<2x8x32xi1>, vector<2x8x32xf32>
    %c0_83 = arith.constant 0 : index
    %c0_84 = arith.constant 0 : index
    %c0_85 = arith.constant 0 : index
    %145 = vector.load %arg19[%c0_83, %c0_84, %c0_85] : memref<2x8x32xf32, #tpu.memory_space<vmem>>, vector<2x8x32xf32>
    tpu.vector_store %arg19[%c0_83, %c0_84, %c0_85], %144 {strides = array<i32>} : memref<2x8x32xf32, #tpu.memory_space<vmem>>, vector<2x8x32xf32>,
    %c3_i32_86 = arith.constant 3 : i32
    %146 = arith.cmpi eq, %arg1, %c3_i32_86 : i32
    %147 = arith.extui %146 : i1 to i32
    %c0_i32_87 = arith.constant 0 : i32
    %148 = arith.cmpi ne, %147, %c0_i32_87 : i32
    scf.if %148 {
      %c0_88 = arith.constant 0 : index
      %c0_89 = arith.constant 0 : index
      %149 = vector.load %arg12[%c0_88, %c0_89] : memref<1x32xf32, #tpu.memory_space<vmem>>, vector<1x32xf32>
      %150 = vector.shape_cast %149 : vector<1x32xf32> to vector<1x1x32xf32>
      %151 = vector.broadcast %150 : vector<1x1x32xf32> to vector<2x8x32xf32>
      %152 = arith.mulf %144, %151 : vector<2x8x32xf32>
      %cst_90 = arith.constant dense<0.000000e+00> : vector<2x8xf32>
      %153 = vector.multi_reduction <add>, %152, %cst_90 [2] : vector<2x8x32xf32> to vector<2x8xf32>
      %154 = vector.shape_cast %153 : vector<2x8xf32> to vector<2x8x1xf32>
      %c0_91 = arith.constant 0 : index
      %c0_92 = arith.constant 0 : index
      %155 = vector.load %arg13[%c0_91, %c0_92] : memref<1x1xf32, #tpu.memory_space<vmem>>, vector<1x1xf32>
      %156 = vector.shape_cast %155 : vector<1x1xf32> to vector<1x1x1xf32>
      %157 = vector.broadcast %156 : vector<1x1x1xf32> to vector<2x8x1xf32>
      %158 = arith.addf %154, %157 : vector<2x8x1xf32>
      %cst_93 = arith.constant dense<0xFF800000> : vector<2x1xf32>
      %159 = vector.multi_reduction <maximumf>, %158, %cst_93 [1] : vector<2x8x1xf32> to vector<2x1xf32>
      %160 = vector.shape_cast %159 : vector<2x1xf32> to vector<2x1x1xf32>
      %161 = vector.broadcast %160 : vector<2x1x1xf32> to vector<2x8x1xf32>
      %162 = arith.subf %158, %161 : vector<2x8x1xf32>
      %163 = math.exp %162 : vector<2x8x1xf32>
      %cst_94 = arith.constant dense<0.000000e+00> : vector<2x1xf32>
      %164 = vector.multi_reduction <add>, %163, %cst_94 [1] : vector<2x8x1xf32> to vector<2x1xf32>
      %165 = vector.shape_cast %164 : vector<2x1xf32> to vector<2x1x1xf32>
      %166 = tpu.reciprocal %165 {approx = true} : vector<2x1x1xf32> -> vector<2x1x1xf32>
      %167 = vector.broadcast %166 : vector<2x1x1xf32> to vector<2x8x1xf32>
      %168 = arith.mulf %163, %167 : vector<2x8x1xf32>
      %169 = vector.broadcast %168 : vector<2x8x1xf32> to vector<2x8x32xf32>
      %170 = arith.mulf %144, %169 : vector<2x8x32xf32>
      %cst_95 = arith.constant dense<0.000000e+00> : vector<2x32xf32>
      %171 = vector.multi_reduction <add>, %170, %cst_95 [1] : vector<2x8x32xf32> to vector<2x32xf32>
      %c0_96 = arith.constant 0 : index
      %c0_97 = arith.constant 0 : index
      %172 = vector.load %arg14[%c0_96, %c0_97] : memref<32x32xbf16, #tpu.memory_space<vmem>>, vector<32x32xbf16>
      %173 = arith.truncf %171 : vector<2x32xf32> to vector<2x32xbf16>
      %cst_98 = arith.constant dense<0.000000e+00> : vector<2x32xf32>
      %174 = tpu.matmul %173, %172, %cst_98 {dimension_numbers = #tpu.dot_dimension_numbers<[1], [0], [0], [1], [0, 0, 1, 1], [], []>} : vector<2x32xbf16>, vector<32x32xbf16>, vector<2x32xf32> -> vector<2x32xf32>
      %c0_99 = arith.constant 0 : index
      %c0_100 = arith.constant 0 : index
      %175 = vector.load %arg15[%c0_99, %c0_100] : memref<1x32xf32, #tpu.memory_space<vmem>>, vector<1x32xf32>
      %176 = vector.broadcast %175 : vector<1x32xf32> to vector<2x32xf32>
      %177 = arith.addf %174, %176 : vector<2x32xf32>
      %cst_101 = arith.constant 0.000000e+00 : f32
      %178 = vector.broadcast %cst_101 : f32 to vector<2x32xf32>
      %179 = arith.cmpf ogt, %177, %178 : vector<2x32xf32>
      %cst_102 = arith.constant 2.000000e-01 : f32
      %180 = vector.broadcast %cst_102 : f32 to vector<2x32xf32>
      %181 = arith.mulf %180, %177 : vector<2x32xf32>
      %182 = arith.select %179, %177, %181 : vector<2x32xi1>, vector<2x32xf32>
      %c0_103 = arith.constant 0 : index
      %c0_104 = arith.constant 0 : index
      %183 = vector.load %arg16[%c0_103, %c0_104] : memref<1x32xf32, #tpu.memory_space<vmem>>, vector<1x32xf32>
      %184 = vector.broadcast %183 : vector<1x32xf32> to vector<2x32xf32>
      %185 = arith.mulf %182, %184 : vector<2x32xf32>
      %cst_105 = arith.constant dense<0.000000e+00> : vector<2xf32>
      %186 = vector.multi_reduction <add>, %185, %cst_105 [1] : vector<2x32xf32> to vector<2xf32>
      %187 = vector.shape_cast %186 : vector<2xf32> to vector<2x1xf32>
      %c0_106 = arith.constant 0 : index
      %c0_107 = arith.constant 0 : index
      %188 = vector.load %arg17[%c0_106, %c0_107] : memref<1x1xf32, #tpu.memory_space<vmem>>, vector<1x1xf32>
      %189 = vector.broadcast %188 : vector<1x1xf32> to vector<2x1xf32>
      %190 = arith.addf %187, %189 : vector<2x1xf32>
      %191 = vector.shape_cast %190 : vector<2x1xf32> to vector<2x1xf32>
      %192 = vector.broadcast %191 : vector<2x1xf32> to vector<2x128xf32>
      %c0_108 = arith.constant 0 : index
      %c0_109 = arith.constant 0 : index
      %193 = vector.load %arg18[%c0_108, %c0_109] : memref<2x128xf32, #tpu.memory_space<vmem>>, vector<2x128xf32>
      tpu.vector_store %arg18[%c0_108, %c0_109], %192 {strides = array<i32>} : memref<2x128xf32, #tpu.memory_space<vmem>>, vector<2x128xf32>,
    } else {
    }
    return
  }
  func.func @transform_0(%arg0: i32, %arg1: i32) -> (i32, i32, i32) {
    %c0_i32 = arith.constant 0 : i32
    %c0_i32_0 = arith.constant 0 : i32
    %c0_i32_1 = arith.constant 0 : i32
    return %arg0, %c0_i32, %c0_i32_0 : i32, i32, i32
  }
  func.func @transform_1(%arg0: i32, %arg1: i32) -> (i32, i32) {
    %c0_i32 = arith.constant 0 : i32
    %c0_i32_0 = arith.constant 0 : i32
    %c0_i32_1 = arith.constant 0 : i32
    return %c0_i32, %c0_i32_0 : i32, i32
  }
  func.func @transform_2(%arg0: i32, %arg1: i32) -> (i32, i32) {
    %c0_i32 = arith.constant 0 : i32
    %c0_i32_0 = arith.constant 0 : i32
    %c0_i32_1 = arith.constant 0 : i32
    return %c0_i32, %c0_i32_0 : i32, i32
  }
  func.func @transform_3(%arg0: i32, %arg1: i32) -> (i32, i32) {
    %c0_i32 = arith.constant 0 : i32
    %c0_i32_0 = arith.constant 0 : i32
    %c0_i32_1 = arith.constant 0 : i32
    return %c0_i32, %c0_i32_0 : i32, i32
  }
  func.func @transform_4(%arg0: i32, %arg1: i32) -> (i32, i32) {
    %c0_i32 = arith.constant 0 : i32
    %c0_i32_0 = arith.constant 0 : i32
    %c0_i32_1 = arith.constant 0 : i32
    return %c0_i32, %c0_i32_0 : i32, i32
  }
  func.func @transform_5(%arg0: i32, %arg1: i32) -> (i32, i32) {
    %c0_i32 = arith.constant 0 : i32
    %c0_i32_0 = arith.constant 0 : i32
    %c0_i32_1 = arith.constant 0 : i32
    return %c0_i32, %c0_i32_0 : i32, i32
  }
  func.func @transform_6(%arg0: i32, %arg1: i32) -> (i32, i32, i32, i32) {
    %c0_i32 = arith.constant 0 : i32
    %c0_i32_0 = arith.constant 0 : i32
    %c0_i32_1 = arith.constant 0 : i32
    %c0_i32_2 = arith.constant 0 : i32
    return %arg1, %c0_i32, %c0_i32_0, %c0_i32_1 : i32, i32, i32, i32
  }
  func.func @transform_7(%arg0: i32, %arg1: i32) -> (i32, i32, i32, i32) {
    %c0_i32 = arith.constant 0 : i32
    %c0_i32_0 = arith.constant 0 : i32
    %c0_i32_1 = arith.constant 0 : i32
    %c0_i32_2 = arith.constant 0 : i32
    return %arg1, %c0_i32, %c0_i32_0, %c0_i32_1 : i32, i32, i32, i32
  }
  func.func @transform_8(%arg0: i32, %arg1: i32) -> (i32, i32, i32, i32) {
    %c0_i32 = arith.constant 0 : i32
    %c0_i32_0 = arith.constant 0 : i32
    %c0_i32_1 = arith.constant 0 : i32
    %c0_i32_2 = arith.constant 0 : i32
    return %arg1, %c0_i32, %c0_i32_0, %c0_i32_1 : i32, i32, i32, i32
  }
  func.func @transform_9(%arg0: i32, %arg1: i32) -> (i32, i32, i32, i32) {
    %c0_i32 = arith.constant 0 : i32
    %c0_i32_0 = arith.constant 0 : i32
    %c0_i32_1 = arith.constant 0 : i32
    %c0_i32_2 = arith.constant 0 : i32
    return %arg1, %c0_i32, %c0_i32_0, %c0_i32_1 : i32, i32, i32, i32
  }
  func.func @transform_10(%arg0: i32, %arg1: i32) -> (i32, i32) {
    %c0_i32 = arith.constant 0 : i32
    %c0_i32_0 = arith.constant 0 : i32
    %c0_i32_1 = arith.constant 0 : i32
    return %c0_i32, %c0_i32_0 : i32, i32
  }
  func.func @transform_11(%arg0: i32, %arg1: i32) -> (i32, i32) {
    %c0_i32 = arith.constant 0 : i32
    %c0_i32_0 = arith.constant 0 : i32
    %c0_i32_1 = arith.constant 0 : i32
    return %c0_i32, %c0_i32_0 : i32, i32
  }
  func.func @transform_12(%arg0: i32, %arg1: i32) -> (i32, i32) {
    %c0_i32 = arith.constant 0 : i32
    %c0_i32_0 = arith.constant 0 : i32
    %c0_i32_1 = arith.constant 0 : i32
    return %c0_i32, %c0_i32_0 : i32, i32
  }
  func.func @transform_13(%arg0: i32, %arg1: i32) -> (i32, i32) {
    %c0_i32 = arith.constant 0 : i32
    %c0_i32_0 = arith.constant 0 : i32
    %c0_i32_1 = arith.constant 0 : i32
    return %c0_i32, %c0_i32_0 : i32, i32
  }
  func.func @transform_14(%arg0: i32, %arg1: i32) -> (i32, i32) {
    %c0_i32 = arith.constant 0 : i32
    %c0_i32_0 = arith.constant 0 : i32
    %c0_i32_1 = arith.constant 0 : i32
    return %c0_i32, %c0_i32_0 : i32, i32
  }
  func.func @transform_15(%arg0: i32, %arg1: i32) -> (i32, i32) {
    %c0_i32 = arith.constant 0 : i32
    %c0_i32_0 = arith.constant 0 : i32
    %c0_i32_1 = arith.constant 0 : i32
    return %c0_i32, %c0_i32_0 : i32, i32
  }
  func.func @transform_16(%arg0: i32, %arg1: i32) -> (i32, i32) {
    %c0_i32 = arith.constant 0 : i32
    %c0_i32_0 = arith.constant 0 : i32
    return %arg0, %c0_i32 : i32, i32
  }
}

module attributes {stable_mosaic.version = 11 : i64} {
  func.func @kernel(%arg0: i32, %arg1: i32, %arg2: memref<2x8x4xf32, #tpu.memory_space<vmem>>, %arg3: memref<4x8xbf16, #tpu.memory_space<vmem>>, %arg4: memref<4x32xbf16, #tpu.memory_space<vmem>>, %arg5: memref<1x32xf32, #tpu.memory_space<vmem>>, %arg6: memref<1x32xf32, #tpu.memory_space<vmem>>, %arg7: memref<1x32xf32, #tpu.memory_space<vmem>>, %arg8: memref<1x2x96x32xbf16, #tpu.memory_space<vmem>>, %arg9: memref<1x2x1x32xf32, #tpu.memory_space<vmem>>, %arg10: memref<1x2x1x32xf32, #tpu.memory_space<vmem>>, %arg11: memref<1x2x1x32xf32, #tpu.memory_space<vmem>>, %arg12: memref<1x32xf32, #tpu.memory_space<vmem>>, %arg13: memref<1x1xf32, #tpu.memory_space<vmem>>, %arg14: memref<32x32xbf16, #tpu.memory_space<vmem>>, %arg15: memref<1x32xf32, #tpu.memory_space<vmem>>, %arg16: memref<1x32xf32, #tpu.memory_space<vmem>>, %arg17: memref<1x1xf32, #tpu.memory_space<vmem>>, %arg18: memref<2x128xf32, #tpu.memory_space<vmem>>, %arg19: memref<2x4x32xf32, #tpu.memory_space<vmem>>, %arg20: memref<2x20x32xf32, #tpu.memory_space<vmem>>, %arg21: memref<2x4x32xf32, #tpu.memory_space<vmem>>, %arg22: memref<2x4x32xf32, #tpu.memory_space<vmem>>) attributes {dimension_semantics = [#tpu.dimension_semantics<parallel>, #tpu.dimension_semantics<arbitrary>], iteration_bounds = array<i64: 1, 4>, scalar_prefetch = 0 : i64, scratch_operands = 4 : i64, tpu.core_type = #tpu.core_type<tc>, window_params = [{transform_indices = @transform_0, window_bounds = array<i64: 2, 8, 4>}, {pipeline_mode = #tpu.pipeline_mode<synchronous>, transform_indices = @transform_1, window_bounds = array<i64: 4, 8>}, {pipeline_mode = #tpu.pipeline_mode<synchronous>, transform_indices = @transform_2, window_bounds = array<i64: 4, 32>}, {pipeline_mode = #tpu.pipeline_mode<synchronous>, transform_indices = @transform_3, window_bounds = array<i64: 1, 32>}, {pipeline_mode = #tpu.pipeline_mode<synchronous>, transform_indices = @transform_4, window_bounds = array<i64: 1, 32>}, {pipeline_mode = #tpu.pipeline_mode<synchronous>, transform_indices = @transform_5, window_bounds = array<i64: 1, 32>}, {transform_indices = @transform_6, window_bounds = array<i64: 1, 2, 96, 32>}, {transform_indices = @transform_7, window_bounds = array<i64: 1, 2, 1, 32>}, {transform_indices = @transform_8, window_bounds = array<i64: 1, 2, 1, 32>}, {transform_indices = @transform_9, window_bounds = array<i64: 1, 2, 1, 32>}, {pipeline_mode = #tpu.pipeline_mode<synchronous>, transform_indices = @transform_10, window_bounds = array<i64: 1, 32>}, {pipeline_mode = #tpu.pipeline_mode<synchronous>, transform_indices = @transform_11, window_bounds = array<i64: 1, 1>}, {pipeline_mode = #tpu.pipeline_mode<synchronous>, transform_indices = @transform_12, window_bounds = array<i64: 32, 32>}, {pipeline_mode = #tpu.pipeline_mode<synchronous>, transform_indices = @transform_13, window_bounds = array<i64: 1, 32>}, {pipeline_mode = #tpu.pipeline_mode<synchronous>, transform_indices = @transform_14, window_bounds = array<i64: 1, 32>}, {pipeline_mode = #tpu.pipeline_mode<synchronous>, transform_indices = @transform_15, window_bounds = array<i64: 1, 1>}, {transform_indices = @transform_16, window_bounds = array<i64: 2, 128>}]} {
    %c0_i32 = arith.constant 0 : i32
    %0 = arith.cmpi eq, %arg1, %c0_i32 : i32
    %1 = arith.extui %0 : i1 to i32
    %c0_i32_0 = arith.constant 0 : i32
    %2 = arith.cmpi ne, %1, %c0_i32_0 : i32
    scf.if %2 {
      %cst_88 = arith.constant 0.000000e+00 : f32
      %149 = vector.broadcast %cst_88 : f32 to vector<2x8x32xf32>
      %c0_89 = arith.constant 0 : index
      %c0_90 = arith.constant 0 : index
      %c0_91 = arith.constant 0 : index
      %150 = vector.load %arg20[%c0_89, %c0_90, %c0_91] : memref<2x20x32xf32, #tpu.memory_space<vmem>>, vector<2x8x32xf32>
      tpu.vector_store %arg20[%c0_89, %c0_90, %c0_91], %149 {strides = array<i32>} : memref<2x20x32xf32, #tpu.memory_space<vmem>>, vector<2x8x32xf32>,
      %cst_92 = arith.constant 0.000000e+00 : f32
      %151 = vector.broadcast %cst_92 : f32 to vector<2x8x32xf32>
      %c0_93 = arith.constant 0 : index
      %c12 = arith.constant 12 : index
      %c0_94 = arith.constant 0 : index
      %152 = vector.load %arg20[%c0_93, %c12, %c0_94] : memref<2x20x32xf32, #tpu.memory_space<vmem>>, vector<2x8x32xf32>
      tpu.vector_store %arg20[%c0_93, %c12, %c0_94], %151 {strides = array<i32>} : memref<2x20x32xf32, #tpu.memory_space<vmem>>, vector<2x8x32xf32>,
      %c0_95 = arith.constant 0 : index
      %c0_96 = arith.constant 0 : index
      %c0_97 = arith.constant 0 : index
      %153 = vector.load %arg2[%c0_95, %c0_96, %c0_97] : memref<2x8x4xf32, #tpu.memory_space<vmem>>, vector<2x8x4xf32>
      %154 = vector.shape_cast %153 : vector<2x8x4xf32> to vector<16x4xf32>
      %c0_98 = arith.constant 0 : index
      %c0_99 = arith.constant 0 : index
      %155 = vector.load %arg4[%c0_98, %c0_99] : memref<4x32xbf16, #tpu.memory_space<vmem>>, vector<4x32xbf16>
      %156 = arith.truncf %154 : vector<16x4xf32> to vector<16x4xbf16>
      %cst_100 = arith.constant dense<0.000000e+00> : vector<16x32xf32>
      %157 = tpu.matmul %156, %155, %cst_100 {dimension_numbers = #tpu.dot_dimension_numbers<[1], [0], [0], [1], [0, 0, 1, 1], [], []>} : vector<16x4xbf16>, vector<4x32xbf16>, vector<16x32xf32> -> vector<16x32xf32>
      %158 = vector.shape_cast %157 : vector<16x32xf32> to vector<2x8x32xf32>
      %c0_101 = arith.constant 0 : index
      %c0_102 = arith.constant 0 : index
      %159 = vector.load %arg3[%c0_101, %c0_102] : memref<4x8xbf16, #tpu.memory_space<vmem>>, vector<4x8xbf16>
      %160 = arith.truncf %158 : vector<2x8x32xf32> to vector<2x8x32xbf16>
      %161 = vector.extract_strided_slice %160 {offsets = [0, 0, 0], sizes = [1, 8, 32], strides = [1, 1, 1]} : vector<2x8x32xbf16> to vector<1x8x32xbf16>
      %162 = vector.shape_cast %161 : vector<1x8x32xbf16> to vector<8x32xbf16>
      %cst_103 = arith.constant dense<0.000000e+00> : vector<4x32xf32>
      %163 = tpu.matmul %159, %162, %cst_103 {dimension_numbers = #tpu.dot_dimension_numbers<[1], [0], [0], [1], [0, 0, 1, 1], [], []>} : vector<4x8xbf16>, vector<8x32xbf16>, vector<4x32xf32> -> vector<4x32xf32>
      %c0_104 = arith.constant 0 : index
      %c0_105 = arith.constant 0 : index
      %c0_106 = arith.constant 0 : index
      %164 = vector.load %arg19[%c0_104, %c0_105, %c0_106] : memref<2x4x32xf32, #tpu.memory_space<vmem>>, vector<1x4x32xf32>
      %165 = vector.shape_cast %164 : vector<1x4x32xf32> to vector<4x32xf32>
      %166 = vector.shape_cast %163 : vector<4x32xf32> to vector<1x4x32xf32>
      tpu.vector_store %arg19[%c0_104, %c0_105, %c0_106], %166 {strides = array<i32>} : memref<2x4x32xf32, #tpu.memory_space<vmem>>, vector<1x4x32xf32>,
      %167 = vector.extract_strided_slice %160 {offsets = [1, 0, 0], sizes = [1, 8, 32], strides = [1, 1, 1]} : vector<2x8x32xbf16> to vector<1x8x32xbf16>
      %168 = vector.shape_cast %167 : vector<1x8x32xbf16> to vector<8x32xbf16>
      %cst_107 = arith.constant dense<0.000000e+00> : vector<4x32xf32>
      %169 = tpu.matmul %159, %168, %cst_107 {dimension_numbers = #tpu.dot_dimension_numbers<[1], [0], [0], [1], [0, 0, 1, 1], [], []>} : vector<4x8xbf16>, vector<8x32xbf16>, vector<4x32xf32> -> vector<4x32xf32>
      %c1_108 = arith.constant 1 : index
      %c0_109 = arith.constant 0 : index
      %c0_110 = arith.constant 0 : index
      %170 = vector.load %arg19[%c1_108, %c0_109, %c0_110] : memref<2x4x32xf32, #tpu.memory_space<vmem>>, vector<1x4x32xf32>
      %171 = vector.shape_cast %170 : vector<1x4x32xf32> to vector<4x32xf32>
      %172 = vector.shape_cast %169 : vector<4x32xf32> to vector<1x4x32xf32>
      tpu.vector_store %arg19[%c1_108, %c0_109, %c0_110], %172 {strides = array<i32>} : memref<2x4x32xf32, #tpu.memory_space<vmem>>, vector<1x4x32xf32>,
      %c0_111 = arith.constant 0 : index
      %c0_112 = arith.constant 0 : index
      %c0_113 = arith.constant 0 : index
      %173 = vector.load %arg19[%c0_111, %c0_112, %c0_113] : memref<2x4x32xf32, #tpu.memory_space<vmem>>, vector<2x4x32xf32>
      %c0_114 = arith.constant 0 : index
      %c0_115 = arith.constant 0 : index
      %174 = vector.load %arg5[%c0_114, %c0_115] : memref<1x32xf32, #tpu.memory_space<vmem>>, vector<1x32xf32>
      %175 = vector.shape_cast %174 : vector<1x32xf32> to vector<1x1x32xf32>
      %176 = vector.broadcast %175 : vector<1x1x32xf32> to vector<2x4x32xf32>
      %177 = arith.addf %173, %176 : vector<2x4x32xf32>
      %c0_116 = arith.constant 0 : index
      %c0_117 = arith.constant 0 : index
      %178 = vector.load %arg6[%c0_116, %c0_117] : memref<1x32xf32, #tpu.memory_space<vmem>>, vector<1x32xf32>
      %c0_118 = arith.constant 0 : index
      %c0_119 = arith.constant 0 : index
      %179 = vector.load %arg7[%c0_118, %c0_119] : memref<1x32xf32, #tpu.memory_space<vmem>>, vector<1x32xf32>
      %cst_120 = arith.constant dense<0.000000e+00> : vector<2x4xf32>
      %180 = vector.multi_reduction <add>, %177, %cst_120 [2] : vector<2x4x32xf32> to vector<2x4xf32>
      %181 = vector.shape_cast %180 : vector<2x4xf32> to vector<2x4x1xf32>
      %cst_121 = arith.constant 3.200000e+01 : f32
      %182 = vector.broadcast %cst_121 : f32 to vector<2x4x1xf32>
      %183 = arith.divf %181, %182 : vector<2x4x1xf32>
      %184 = vector.broadcast %183 : vector<2x4x1xf32> to vector<2x4x32xf32>
      %185 = arith.subf %177, %184 : vector<2x4x32xf32>
      %186 = arith.mulf %185, %185 : vector<2x4x32xf32>
      %cst_122 = arith.constant dense<0.000000e+00> : vector<2x4xf32>
      %187 = vector.multi_reduction <add>, %186, %cst_122 [2] : vector<2x4x32xf32> to vector<2x4xf32>
      %188 = vector.shape_cast %187 : vector<2x4xf32> to vector<2x4x1xf32>
      %cst_123 = arith.constant 3.200000e+01 : f32
      %189 = vector.broadcast %cst_123 : f32 to vector<2x4x1xf32>
      %190 = arith.divf %188, %189 : vector<2x4x1xf32>
      %191 = vector.broadcast %183 : vector<2x4x1xf32> to vector<2x4x32xf32>
      %192 = arith.subf %177, %191 : vector<2x4x32xf32>
      %cst_124 = arith.constant 9.99999974E-6 : f32
      %193 = vector.broadcast %cst_124 : f32 to vector<2x4x1xf32>
      %194 = arith.addf %190, %193 : vector<2x4x1xf32>
      %195 = math.rsqrt %194 : vector<2x4x1xf32>
      %196 = vector.broadcast %195 : vector<2x4x1xf32> to vector<2x4x32xf32>
      %197 = arith.mulf %192, %196 : vector<2x4x32xf32>
      %198 = vector.shape_cast %178 : vector<1x32xf32> to vector<1x1x32xf32>
      %199 = vector.broadcast %198 : vector<1x1x32xf32> to vector<2x4x32xf32>
      %200 = arith.mulf %197, %199 : vector<2x4x32xf32>
      %201 = vector.shape_cast %179 : vector<1x32xf32> to vector<1x1x32xf32>
      %202 = vector.broadcast %201 : vector<1x1x32xf32> to vector<2x4x32xf32>
      %203 = arith.addf %200, %202 : vector<2x4x32xf32>
      %cst_125 = arith.constant 0.000000e+00 : f32
      %204 = vector.broadcast %cst_125 : f32 to vector<2x4x32xf32>
      %205 = arith.cmpf ogt, %203, %204 : vector<2x4x32xf32>
      %cst_126 = arith.constant 2.000000e-01 : f32
      %206 = vector.broadcast %cst_126 : f32 to vector<2x4x32xf32>
      %207 = arith.mulf %206, %203 : vector<2x4x32xf32>
      %208 = arith.select %205, %203, %207 : vector<2x4x32xi1>, vector<2x4x32xf32>
      %c0_127 = arith.constant 0 : index
      %c0_128 = arith.constant 0 : index
      %c0_129 = arith.constant 0 : index
      %209 = vector.load %arg19[%c0_127, %c0_128, %c0_129] : memref<2x4x32xf32, #tpu.memory_space<vmem>>, vector<2x4x32xf32>
      tpu.vector_store %arg19[%c0_127, %c0_128, %c0_129], %208 {strides = array<i32>} : memref<2x4x32xf32, #tpu.memory_space<vmem>>, vector<2x4x32xf32>,
    } else {
    }
    %c0 = arith.constant 0 : index
    %c0_1 = arith.constant 0 : index
    %c0_2 = arith.constant 0 : index
    %3 = vector.load %arg19[%c0, %c0_1, %c0_2] : memref<2x4x32xf32, #tpu.memory_space<vmem>>, vector<2x4x32xf32>
    %c0_3 = arith.constant 0 : index
    %c8 = arith.constant 8 : index
    %c0_4 = arith.constant 0 : index
    %4 = vector.load %arg20[%c0_3, %c8, %c0_4] : memref<2x20x32xf32, #tpu.memory_space<vmem>>, vector<2x4x32xf32>
    tpu.vector_store %arg20[%c0_3, %c8, %c0_4], %3 {strides = array<i32>} : memref<2x20x32xf32, #tpu.memory_space<vmem>>, vector<2x4x32xf32>,
    %c0_i32_5 = arith.constant 0 : i32
    %5 = arith.cmpi eq, %arg1, %c0_i32_5 : i32
    %6 = arith.extui %5 : i1 to i32
    %c0_i32_6 = arith.constant 0 : i32
    %7 = arith.cmpi ne, %6, %c0_i32_6 : i32
    scf.if %7 {
      %c0_88 = arith.constant 0 : index
      %c7 = arith.constant 7 : index
      %c0_89 = arith.constant 0 : index
      %149 = vector.load %arg20[%c0_88, %c7, %c0_89] : memref<2x20x32xf32, #tpu.memory_space<vmem>>, vector<2x4x32xf32>
      %c0_90 = arith.constant 0 : index
      %c0_91 = arith.constant 0 : index
      %c0_92 = arith.constant 0 : index
      %150 = vector.load %arg21[%c0_90, %c0_91, %c0_92] : memref<2x4x32xf32, #tpu.memory_space<vmem>>, vector<2x4x32xf32>
      tpu.vector_store %arg21[%c0_90, %c0_91, %c0_92], %149 {strides = array<i32>} : memref<2x4x32xf32, #tpu.memory_space<vmem>>, vector<2x4x32xf32>,
      %c0_93 = arith.constant 0 : index
      %c9 = arith.constant 9 : index
      %c0_94 = arith.constant 0 : index
      %151 = vector.load %arg20[%c0_93, %c9, %c0_94] : memref<2x20x32xf32, #tpu.memory_space<vmem>>, vector<2x4x32xf32>
      %c0_95 = arith.constant 0 : index
      %c0_96 = arith.constant 0 : index
      %c0_97 = arith.constant 0 : index
      %152 = vector.load %arg22[%c0_95, %c0_96, %c0_97] : memref<2x4x32xf32, #tpu.memory_space<vmem>>, vector<2x4x32xf32>
      tpu.vector_store %arg22[%c0_95, %c0_96, %c0_97], %151 {strides = array<i32>} : memref<2x4x32xf32, #tpu.memory_space<vmem>>, vector<2x4x32xf32>,
    } else {
    }
    %c1_i32 = arith.constant 1 : i32
    %8 = arith.cmpi eq, %arg1, %c1_i32 : i32
    %9 = arith.extui %8 : i1 to i32
    %c0_i32_7 = arith.constant 0 : i32
    %10 = arith.cmpi ne, %9, %c0_i32_7 : i32
    scf.if %10 {
      %c0_88 = arith.constant 0 : index
      %c6 = arith.constant 6 : index
      %c0_89 = arith.constant 0 : index
      %149 = vector.load %arg20[%c0_88, %c6, %c0_89] : memref<2x20x32xf32, #tpu.memory_space<vmem>>, vector<2x4x32xf32>
      %c0_90 = arith.constant 0 : index
      %c0_91 = arith.constant 0 : index
      %c0_92 = arith.constant 0 : index
      %150 = vector.load %arg21[%c0_90, %c0_91, %c0_92] : memref<2x4x32xf32, #tpu.memory_space<vmem>>, vector<2x4x32xf32>
      tpu.vector_store %arg21[%c0_90, %c0_91, %c0_92], %149 {strides = array<i32>} : memref<2x4x32xf32, #tpu.memory_space<vmem>>, vector<2x4x32xf32>,
      %c0_93 = arith.constant 0 : index
      %c10 = arith.constant 10 : index
      %c0_94 = arith.constant 0 : index
      %151 = vector.load %arg20[%c0_93, %c10, %c0_94] : memref<2x20x32xf32, #tpu.memory_space<vmem>>, vector<2x4x32xf32>
      %c0_95 = arith.constant 0 : index
      %c0_96 = arith.constant 0 : index
      %c0_97 = arith.constant 0 : index
      %152 = vector.load %arg22[%c0_95, %c0_96, %c0_97] : memref<2x4x32xf32, #tpu.memory_space<vmem>>, vector<2x4x32xf32>
      tpu.vector_store %arg22[%c0_95, %c0_96, %c0_97], %151 {strides = array<i32>} : memref<2x4x32xf32, #tpu.memory_space<vmem>>, vector<2x4x32xf32>,
    } else {
    }
    %c2_i32 = arith.constant 2 : i32
    %11 = arith.cmpi eq, %arg1, %c2_i32 : i32
    %12 = arith.extui %11 : i1 to i32
    %c0_i32_8 = arith.constant 0 : i32
    %13 = arith.cmpi ne, %12, %c0_i32_8 : i32
    scf.if %13 {
      %c0_88 = arith.constant 0 : index
      %c4 = arith.constant 4 : index
      %c0_89 = arith.constant 0 : index
      %149 = vector.load %arg20[%c0_88, %c4, %c0_89] : memref<2x20x32xf32, #tpu.memory_space<vmem>>, vector<2x4x32xf32>
      %c0_90 = arith.constant 0 : index
      %c0_91 = arith.constant 0 : index
      %c0_92 = arith.constant 0 : index
      %150 = vector.load %arg21[%c0_90, %c0_91, %c0_92] : memref<2x4x32xf32, #tpu.memory_space<vmem>>, vector<2x4x32xf32>
      tpu.vector_store %arg21[%c0_90, %c0_91, %c0_92], %149 {strides = array<i32>} : memref<2x4x32xf32, #tpu.memory_space<vmem>>, vector<2x4x32xf32>,
      %c0_93 = arith.constant 0 : index
      %c12 = arith.constant 12 : index
      %c0_94 = arith.constant 0 : index
      %151 = vector.load %arg20[%c0_93, %c12, %c0_94] : memref<2x20x32xf32, #tpu.memory_space<vmem>>, vector<2x4x32xf32>
      %c0_95 = arith.constant 0 : index
      %c0_96 = arith.constant 0 : index
      %c0_97 = arith.constant 0 : index
      %152 = vector.load %arg22[%c0_95, %c0_96, %c0_97] : memref<2x4x32xf32, #tpu.memory_space<vmem>>, vector<2x4x32xf32>
      tpu.vector_store %arg22[%c0_95, %c0_96, %c0_97], %151 {strides = array<i32>} : memref<2x4x32xf32, #tpu.memory_space<vmem>>, vector<2x4x32xf32>,
    } else {
    }
    %c3_i32 = arith.constant 3 : i32
    %14 = arith.cmpi eq, %arg1, %c3_i32 : i32
    %15 = arith.extui %14 : i1 to i32
    %c0_i32_9 = arith.constant 0 : i32
    %16 = arith.cmpi ne, %15, %c0_i32_9 : i32
    scf.if %16 {
      %c0_88 = arith.constant 0 : index
      %c0_89 = arith.constant 0 : index
      %c0_90 = arith.constant 0 : index
      %149 = vector.load %arg20[%c0_88, %c0_89, %c0_90] : memref<2x20x32xf32, #tpu.memory_space<vmem>>, vector<2x4x32xf32>
      %c0_91 = arith.constant 0 : index
      %c0_92 = arith.constant 0 : index
      %c0_93 = arith.constant 0 : index
      %150 = vector.load %arg21[%c0_91, %c0_92, %c0_93] : memref<2x4x32xf32, #tpu.memory_space<vmem>>, vector<2x4x32xf32>
      tpu.vector_store %arg21[%c0_91, %c0_92, %c0_93], %149 {strides = array<i32>} : memref<2x4x32xf32, #tpu.memory_space<vmem>>, vector<2x4x32xf32>,
      %c0_94 = arith.constant 0 : index
      %c16 = arith.constant 16 : index
      %c0_95 = arith.constant 0 : index
      %151 = vector.load %arg20[%c0_94, %c16, %c0_95] : memref<2x20x32xf32, #tpu.memory_space<vmem>>, vector<2x4x32xf32>
      %c0_96 = arith.constant 0 : index
      %c0_97 = arith.constant 0 : index
      %c0_98 = arith.constant 0 : index
      %152 = vector.load %arg22[%c0_96, %c0_97, %c0_98] : memref<2x4x32xf32, #tpu.memory_space<vmem>>, vector<2x4x32xf32>
      tpu.vector_store %arg22[%c0_96, %c0_97, %c0_98], %151 {strides = array<i32>} : memref<2x4x32xf32, #tpu.memory_space<vmem>>, vector<2x4x32xf32>,
    } else {
    }
    %c0_10 = arith.constant 0 : index
    %c0_11 = arith.constant 0 : index
    %c0_12 = arith.constant 0 : index
    %c0_13 = arith.constant 0 : index
    %17 = vector.load %arg8[%c0_10, %c0_11, %c0_12, %c0_13] : memref<1x2x96x32xbf16, #tpu.memory_space<vmem>>, vector<1x1x96x32xbf16>
    %18 = vector.shape_cast %17 : vector<1x1x96x32xbf16> to vector<96x32xbf16>
    %c0_14 = arith.constant 0 : index
    %c0_15 = arith.constant 0 : index
    %c0_16 = arith.constant 0 : index
    %19 = vector.load %arg21[%c0_14, %c0_15, %c0_16] : memref<2x4x32xf32, #tpu.memory_space<vmem>>, vector<2x4x32xf32>
    %20 = vector.shape_cast %19 : vector<2x4x32xf32> to vector<8x32xf32>
    %21 = vector.extract_strided_slice %18 {offsets = [0, 0], sizes = [32, 32], strides = [1, 1]} : vector<96x32xbf16> to vector<32x32xbf16>
    %22 = arith.truncf %20 : vector<8x32xf32> to vector<8x32xbf16>
    %cst = arith.constant dense<0.000000e+00> : vector<8x32xf32>
    %23 = tpu.matmul %22, %21, %cst {dimension_numbers = #tpu.dot_dimension_numbers<[1], [0], [0], [1], [0, 0, 1, 1], [], []>} : vector<8x32xbf16>, vector<32x32xbf16>, vector<8x32xf32> -> vector<8x32xf32>
    %24 = vector.shape_cast %3 : vector<2x4x32xf32> to vector<8x32xf32>
    %25 = vector.extract_strided_slice %18 {offsets = [32, 0], sizes = [32, 32], strides = [1, 1]} : vector<96x32xbf16> to vector<32x32xbf16>
    %26 = arith.truncf %24 : vector<8x32xf32> to vector<8x32xbf16>
    %cst_17 = arith.constant dense<0.000000e+00> : vector<8x32xf32>
    %27 = tpu.matmul %26, %25, %cst_17 {dimension_numbers = #tpu.dot_dimension_numbers<[1], [0], [0], [1], [0, 0, 1, 1], [], []>} : vector<8x32xbf16>, vector<32x32xbf16>, vector<8x32xf32> -> vector<8x32xf32>
    %28 = arith.addf %23, %27 : vector<8x32xf32>
    %c0_18 = arith.constant 0 : index
    %c0_19 = arith.constant 0 : index
    %c0_20 = arith.constant 0 : index
    %29 = vector.load %arg22[%c0_18, %c0_19, %c0_20] : memref<2x4x32xf32, #tpu.memory_space<vmem>>, vector<2x4x32xf32>
    %30 = vector.shape_cast %29 : vector<2x4x32xf32> to vector<8x32xf32>
    %31 = vector.extract_strided_slice %18 {offsets = [64, 0], sizes = [32, 32], strides = [1, 1]} : vector<96x32xbf16> to vector<32x32xbf16>
    %32 = arith.truncf %30 : vector<8x32xf32> to vector<8x32xbf16>
    %cst_21 = arith.constant dense<0.000000e+00> : vector<8x32xf32>
    %33 = tpu.matmul %32, %31, %cst_21 {dimension_numbers = #tpu.dot_dimension_numbers<[1], [0], [0], [1], [0, 0, 1, 1], [], []>} : vector<8x32xbf16>, vector<32x32xbf16>, vector<8x32xf32> -> vector<8x32xf32>
    %34 = arith.addf %28, %33 : vector<8x32xf32>
    %35 = vector.shape_cast %34 : vector<8x32xf32> to vector<2x4x32xf32>
    %c0_22 = arith.constant 0 : index
    %c0_23 = arith.constant 0 : index
    %c0_24 = arith.constant 0 : index
    %c0_25 = arith.constant 0 : index
    %36 = vector.load %arg9[%c0_22, %c0_23, %c0_24, %c0_25] : memref<1x2x1x32xf32, #tpu.memory_space<vmem>>, vector<1x1x1x32xf32>
    %37 = vector.shape_cast %36 : vector<1x1x1x32xf32> to vector<1x32xf32>
    %38 = vector.shape_cast %37 : vector<1x32xf32> to vector<1x1x32xf32>
    %39 = vector.broadcast %38 : vector<1x1x32xf32> to vector<2x4x32xf32>
    %40 = arith.addf %35, %39 : vector<2x4x32xf32>
    %c0_26 = arith.constant 0 : index
    %c0_27 = arith.constant 0 : index
    %c0_28 = arith.constant 0 : index
    %c0_29 = arith.constant 0 : index
    %41 = vector.load %arg10[%c0_26, %c0_27, %c0_28, %c0_29] : memref<1x2x1x32xf32, #tpu.memory_space<vmem>>, vector<1x1x1x32xf32>
    %42 = vector.shape_cast %41 : vector<1x1x1x32xf32> to vector<1x32xf32>
    %c0_30 = arith.constant 0 : index
    %c0_31 = arith.constant 0 : index
    %c0_32 = arith.constant 0 : index
    %c0_33 = arith.constant 0 : index
    %43 = vector.load %arg11[%c0_30, %c0_31, %c0_32, %c0_33] : memref<1x2x1x32xf32, #tpu.memory_space<vmem>>, vector<1x1x1x32xf32>
    %44 = vector.shape_cast %43 : vector<1x1x1x32xf32> to vector<1x32xf32>
    %cst_34 = arith.constant dense<0.000000e+00> : vector<2x4xf32>
    %45 = vector.multi_reduction <add>, %40, %cst_34 [2] : vector<2x4x32xf32> to vector<2x4xf32>
    %46 = vector.shape_cast %45 : vector<2x4xf32> to vector<2x4x1xf32>
    %cst_35 = arith.constant 3.200000e+01 : f32
    %47 = vector.broadcast %cst_35 : f32 to vector<2x4x1xf32>
    %48 = arith.divf %46, %47 : vector<2x4x1xf32>
    %49 = vector.broadcast %48 : vector<2x4x1xf32> to vector<2x4x32xf32>
    %50 = arith.subf %40, %49 : vector<2x4x32xf32>
    %51 = arith.mulf %50, %50 : vector<2x4x32xf32>
    %cst_36 = arith.constant dense<0.000000e+00> : vector<2x4xf32>
    %52 = vector.multi_reduction <add>, %51, %cst_36 [2] : vector<2x4x32xf32> to vector<2x4xf32>
    %53 = vector.shape_cast %52 : vector<2x4xf32> to vector<2x4x1xf32>
    %cst_37 = arith.constant 3.200000e+01 : f32
    %54 = vector.broadcast %cst_37 : f32 to vector<2x4x1xf32>
    %55 = arith.divf %53, %54 : vector<2x4x1xf32>
    %56 = vector.broadcast %48 : vector<2x4x1xf32> to vector<2x4x32xf32>
    %57 = arith.subf %40, %56 : vector<2x4x32xf32>
    %cst_38 = arith.constant 9.99999974E-6 : f32
    %58 = vector.broadcast %cst_38 : f32 to vector<2x4x1xf32>
    %59 = arith.addf %55, %58 : vector<2x4x1xf32>
    %60 = math.rsqrt %59 : vector<2x4x1xf32>
    %61 = vector.broadcast %60 : vector<2x4x1xf32> to vector<2x4x32xf32>
    %62 = arith.mulf %57, %61 : vector<2x4x32xf32>
    %63 = vector.shape_cast %42 : vector<1x32xf32> to vector<1x1x32xf32>
    %64 = vector.broadcast %63 : vector<1x1x32xf32> to vector<2x4x32xf32>
    %65 = arith.mulf %62, %64 : vector<2x4x32xf32>
    %66 = vector.shape_cast %44 : vector<1x32xf32> to vector<1x1x32xf32>
    %67 = vector.broadcast %66 : vector<1x1x32xf32> to vector<2x4x32xf32>
    %68 = arith.addf %65, %67 : vector<2x4x32xf32>
    %cst_39 = arith.constant 0.000000e+00 : f32
    %69 = vector.broadcast %cst_39 : f32 to vector<2x4x32xf32>
    %70 = arith.cmpf ogt, %68, %69 : vector<2x4x32xf32>
    %cst_40 = arith.constant 2.000000e-01 : f32
    %71 = vector.broadcast %cst_40 : f32 to vector<2x4x32xf32>
    %72 = arith.mulf %71, %68 : vector<2x4x32xf32>
    %73 = arith.select %70, %68, %72 : vector<2x4x32xi1>, vector<2x4x32xf32>
    %c0_41 = arith.constant 0 : index
    %c8_42 = arith.constant 8 : index
    %c0_43 = arith.constant 0 : index
    %74 = vector.load %arg20[%c0_41, %c8_42, %c0_43] : memref<2x20x32xf32, #tpu.memory_space<vmem>>, vector<2x4x32xf32>
    tpu.vector_store %arg20[%c0_41, %c8_42, %c0_43], %73 {strides = array<i32>} : memref<2x20x32xf32, #tpu.memory_space<vmem>>, vector<2x4x32xf32>,
    %c0_i32_44 = arith.constant 0 : i32
    %75 = arith.cmpi eq, %arg1, %c0_i32_44 : i32
    %76 = arith.extui %75 : i1 to i32
    %c0_i32_45 = arith.constant 0 : i32
    %77 = arith.cmpi ne, %76, %c0_i32_45 : i32
    scf.if %77 {
      %c0_88 = arith.constant 0 : index
      %c7 = arith.constant 7 : index
      %c0_89 = arith.constant 0 : index
      %149 = vector.load %arg20[%c0_88, %c7, %c0_89] : memref<2x20x32xf32, #tpu.memory_space<vmem>>, vector<2x4x32xf32>
      %c0_90 = arith.constant 0 : index
      %c0_91 = arith.constant 0 : index
      %c0_92 = arith.constant 0 : index
      %150 = vector.load %arg21[%c0_90, %c0_91, %c0_92] : memref<2x4x32xf32, #tpu.memory_space<vmem>>, vector<2x4x32xf32>
      tpu.vector_store %arg21[%c0_90, %c0_91, %c0_92], %149 {strides = array<i32>} : memref<2x4x32xf32, #tpu.memory_space<vmem>>, vector<2x4x32xf32>,
      %c0_93 = arith.constant 0 : index
      %c9 = arith.constant 9 : index
      %c0_94 = arith.constant 0 : index
      %151 = vector.load %arg20[%c0_93, %c9, %c0_94] : memref<2x20x32xf32, #tpu.memory_space<vmem>>, vector<2x4x32xf32>
      %c0_95 = arith.constant 0 : index
      %c0_96 = arith.constant 0 : index
      %c0_97 = arith.constant 0 : index
      %152 = vector.load %arg22[%c0_95, %c0_96, %c0_97] : memref<2x4x32xf32, #tpu.memory_space<vmem>>, vector<2x4x32xf32>
      tpu.vector_store %arg22[%c0_95, %c0_96, %c0_97], %151 {strides = array<i32>} : memref<2x4x32xf32, #tpu.memory_space<vmem>>, vector<2x4x32xf32>,
    } else {
    }
    %c1_i32_46 = arith.constant 1 : i32
    %78 = arith.cmpi eq, %arg1, %c1_i32_46 : i32
    %79 = arith.extui %78 : i1 to i32
    %c0_i32_47 = arith.constant 0 : i32
    %80 = arith.cmpi ne, %79, %c0_i32_47 : i32
    scf.if %80 {
      %c0_88 = arith.constant 0 : index
      %c6 = arith.constant 6 : index
      %c0_89 = arith.constant 0 : index
      %149 = vector.load %arg20[%c0_88, %c6, %c0_89] : memref<2x20x32xf32, #tpu.memory_space<vmem>>, vector<2x4x32xf32>
      %c0_90 = arith.constant 0 : index
      %c0_91 = arith.constant 0 : index
      %c0_92 = arith.constant 0 : index
      %150 = vector.load %arg21[%c0_90, %c0_91, %c0_92] : memref<2x4x32xf32, #tpu.memory_space<vmem>>, vector<2x4x32xf32>
      tpu.vector_store %arg21[%c0_90, %c0_91, %c0_92], %149 {strides = array<i32>} : memref<2x4x32xf32, #tpu.memory_space<vmem>>, vector<2x4x32xf32>,
      %c0_93 = arith.constant 0 : index
      %c10 = arith.constant 10 : index
      %c0_94 = arith.constant 0 : index
      %151 = vector.load %arg20[%c0_93, %c10, %c0_94] : memref<2x20x32xf32, #tpu.memory_space<vmem>>, vector<2x4x32xf32>
      %c0_95 = arith.constant 0 : index
      %c0_96 = arith.constant 0 : index
      %c0_97 = arith.constant 0 : index
      %152 = vector.load %arg22[%c0_95, %c0_96, %c0_97] : memref<2x4x32xf32, #tpu.memory_space<vmem>>, vector<2x4x32xf32>
      tpu.vector_store %arg22[%c0_95, %c0_96, %c0_97], %151 {strides = array<i32>} : memref<2x4x32xf32, #tpu.memory_space<vmem>>, vector<2x4x32xf32>,
    } else {
    }
    %c2_i32_48 = arith.constant 2 : i32
    %81 = arith.cmpi eq, %arg1, %c2_i32_48 : i32
    %82 = arith.extui %81 : i1 to i32
    %c0_i32_49 = arith.constant 0 : i32
    %83 = arith.cmpi ne, %82, %c0_i32_49 : i32
    scf.if %83 {
      %c0_88 = arith.constant 0 : index
      %c4 = arith.constant 4 : index
      %c0_89 = arith.constant 0 : index
      %149 = vector.load %arg20[%c0_88, %c4, %c0_89] : memref<2x20x32xf32, #tpu.memory_space<vmem>>, vector<2x4x32xf32>
      %c0_90 = arith.constant 0 : index
      %c0_91 = arith.constant 0 : index
      %c0_92 = arith.constant 0 : index
      %150 = vector.load %arg21[%c0_90, %c0_91, %c0_92] : memref<2x4x32xf32, #tpu.memory_space<vmem>>, vector<2x4x32xf32>
      tpu.vector_store %arg21[%c0_90, %c0_91, %c0_92], %149 {strides = array<i32>} : memref<2x4x32xf32, #tpu.memory_space<vmem>>, vector<2x4x32xf32>,
      %c0_93 = arith.constant 0 : index
      %c12 = arith.constant 12 : index
      %c0_94 = arith.constant 0 : index
      %151 = vector.load %arg20[%c0_93, %c12, %c0_94] : memref<2x20x32xf32, #tpu.memory_space<vmem>>, vector<2x4x32xf32>
      %c0_95 = arith.constant 0 : index
      %c0_96 = arith.constant 0 : index
      %c0_97 = arith.constant 0 : index
      %152 = vector.load %arg22[%c0_95, %c0_96, %c0_97] : memref<2x4x32xf32, #tpu.memory_space<vmem>>, vector<2x4x32xf32>
      tpu.vector_store %arg22[%c0_95, %c0_96, %c0_97], %151 {strides = array<i32>} : memref<2x4x32xf32, #tpu.memory_space<vmem>>, vector<2x4x32xf32>,
    } else {
    }
    %c3_i32_50 = arith.constant 3 : i32
    %84 = arith.cmpi eq, %arg1, %c3_i32_50 : i32
    %85 = arith.extui %84 : i1 to i32
    %c0_i32_51 = arith.constant 0 : i32
    %86 = arith.cmpi ne, %85, %c0_i32_51 : i32
    scf.if %86 {
      %c0_88 = arith.constant 0 : index
      %c0_89 = arith.constant 0 : index
      %c0_90 = arith.constant 0 : index
      %149 = vector.load %arg20[%c0_88, %c0_89, %c0_90] : memref<2x20x32xf32, #tpu.memory_space<vmem>>, vector<2x4x32xf32>
      %c0_91 = arith.constant 0 : index
      %c0_92 = arith.constant 0 : index
      %c0_93 = arith.constant 0 : index
      %150 = vector.load %arg21[%c0_91, %c0_92, %c0_93] : memref<2x4x32xf32, #tpu.memory_space<vmem>>, vector<2x4x32xf32>
      tpu.vector_store %arg21[%c0_91, %c0_92, %c0_93], %149 {strides = array<i32>} : memref<2x4x32xf32, #tpu.memory_space<vmem>>, vector<2x4x32xf32>,
      %c0_94 = arith.constant 0 : index
      %c16 = arith.constant 16 : index
      %c0_95 = arith.constant 0 : index
      %151 = vector.load %arg20[%c0_94, %c16, %c0_95] : memref<2x20x32xf32, #tpu.memory_space<vmem>>, vector<2x4x32xf32>
      %c0_96 = arith.constant 0 : index
      %c0_97 = arith.constant 0 : index
      %c0_98 = arith.constant 0 : index
      %152 = vector.load %arg22[%c0_96, %c0_97, %c0_98] : memref<2x4x32xf32, #tpu.memory_space<vmem>>, vector<2x4x32xf32>
      tpu.vector_store %arg22[%c0_96, %c0_97, %c0_98], %151 {strides = array<i32>} : memref<2x4x32xf32, #tpu.memory_space<vmem>>, vector<2x4x32xf32>,
    } else {
    }
    %c0_52 = arith.constant 0 : index
    %c1 = arith.constant 1 : index
    %c0_53 = arith.constant 0 : index
    %c0_54 = arith.constant 0 : index
    %87 = vector.load %arg8[%c0_52, %c1, %c0_53, %c0_54] : memref<1x2x96x32xbf16, #tpu.memory_space<vmem>>, vector<1x1x96x32xbf16>
    %88 = vector.shape_cast %87 : vector<1x1x96x32xbf16> to vector<96x32xbf16>
    %c0_55 = arith.constant 0 : index
    %c0_56 = arith.constant 0 : index
    %c0_57 = arith.constant 0 : index
    %89 = vector.load %arg21[%c0_55, %c0_56, %c0_57] : memref<2x4x32xf32, #tpu.memory_space<vmem>>, vector<2x4x32xf32>
    %90 = vector.shape_cast %89 : vector<2x4x32xf32> to vector<8x32xf32>
    %91 = vector.extract_strided_slice %88 {offsets = [0, 0], sizes = [32, 32], strides = [1, 1]} : vector<96x32xbf16> to vector<32x32xbf16>
    %92 = arith.truncf %90 : vector<8x32xf32> to vector<8x32xbf16>
    %cst_58 = arith.constant dense<0.000000e+00> : vector<8x32xf32>
    %93 = tpu.matmul %92, %91, %cst_58 {dimension_numbers = #tpu.dot_dimension_numbers<[1], [0], [0], [1], [0, 0, 1, 1], [], []>} : vector<8x32xbf16>, vector<32x32xbf16>, vector<8x32xf32> -> vector<8x32xf32>
    %94 = vector.shape_cast %73 : vector<2x4x32xf32> to vector<8x32xf32>
    %95 = vector.extract_strided_slice %88 {offsets = [32, 0], sizes = [32, 32], strides = [1, 1]} : vector<96x32xbf16> to vector<32x32xbf16>
    %96 = arith.truncf %94 : vector<8x32xf32> to vector<8x32xbf16>
    %cst_59 = arith.constant dense<0.000000e+00> : vector<8x32xf32>
    %97 = tpu.matmul %96, %95, %cst_59 {dimension_numbers = #tpu.dot_dimension_numbers<[1], [0], [0], [1], [0, 0, 1, 1], [], []>} : vector<8x32xbf16>, vector<32x32xbf16>, vector<8x32xf32> -> vector<8x32xf32>
    %98 = arith.addf %93, %97 : vector<8x32xf32>
    %c0_60 = arith.constant 0 : index
    %c0_61 = arith.constant 0 : index
    %c0_62 = arith.constant 0 : index
    %99 = vector.load %arg22[%c0_60, %c0_61, %c0_62] : memref<2x4x32xf32, #tpu.memory_space<vmem>>, vector<2x4x32xf32>
    %100 = vector.shape_cast %99 : vector<2x4x32xf32> to vector<8x32xf32>
    %101 = vector.extract_strided_slice %88 {offsets = [64, 0], sizes = [32, 32], strides = [1, 1]} : vector<96x32xbf16> to vector<32x32xbf16>
    %102 = arith.truncf %100 : vector<8x32xf32> to vector<8x32xbf16>
    %cst_63 = arith.constant dense<0.000000e+00> : vector<8x32xf32>
    %103 = tpu.matmul %102, %101, %cst_63 {dimension_numbers = #tpu.dot_dimension_numbers<[1], [0], [0], [1], [0, 0, 1, 1], [], []>} : vector<8x32xbf16>, vector<32x32xbf16>, vector<8x32xf32> -> vector<8x32xf32>
    %104 = arith.addf %98, %103 : vector<8x32xf32>
    %105 = vector.shape_cast %104 : vector<8x32xf32> to vector<2x4x32xf32>
    %c0_64 = arith.constant 0 : index
    %c1_65 = arith.constant 1 : index
    %c0_66 = arith.constant 0 : index
    %c0_67 = arith.constant 0 : index
    %106 = vector.load %arg9[%c0_64, %c1_65, %c0_66, %c0_67] : memref<1x2x1x32xf32, #tpu.memory_space<vmem>>, vector<1x1x1x32xf32>
    %107 = vector.shape_cast %106 : vector<1x1x1x32xf32> to vector<1x32xf32>
    %108 = vector.shape_cast %107 : vector<1x32xf32> to vector<1x1x32xf32>
    %109 = vector.broadcast %108 : vector<1x1x32xf32> to vector<2x4x32xf32>
    %110 = arith.addf %105, %109 : vector<2x4x32xf32>
    %c0_68 = arith.constant 0 : index
    %c1_69 = arith.constant 1 : index
    %c0_70 = arith.constant 0 : index
    %c0_71 = arith.constant 0 : index
    %111 = vector.load %arg10[%c0_68, %c1_69, %c0_70, %c0_71] : memref<1x2x1x32xf32, #tpu.memory_space<vmem>>, vector<1x1x1x32xf32>
    %112 = vector.shape_cast %111 : vector<1x1x1x32xf32> to vector<1x32xf32>
    %c0_72 = arith.constant 0 : index
    %c1_73 = arith.constant 1 : index
    %c0_74 = arith.constant 0 : index
    %c0_75 = arith.constant 0 : index
    %113 = vector.load %arg11[%c0_72, %c1_73, %c0_74, %c0_75] : memref<1x2x1x32xf32, #tpu.memory_space<vmem>>, vector<1x1x1x32xf32>
    %114 = vector.shape_cast %113 : vector<1x1x1x32xf32> to vector<1x32xf32>
    %cst_76 = arith.constant dense<0.000000e+00> : vector<2x4xf32>
    %115 = vector.multi_reduction <add>, %110, %cst_76 [2] : vector<2x4x32xf32> to vector<2x4xf32>
    %116 = vector.shape_cast %115 : vector<2x4xf32> to vector<2x4x1xf32>
    %cst_77 = arith.constant 3.200000e+01 : f32
    %117 = vector.broadcast %cst_77 : f32 to vector<2x4x1xf32>
    %118 = arith.divf %116, %117 : vector<2x4x1xf32>
    %119 = vector.broadcast %118 : vector<2x4x1xf32> to vector<2x4x32xf32>
    %120 = arith.subf %110, %119 : vector<2x4x32xf32>
    %121 = arith.mulf %120, %120 : vector<2x4x32xf32>
    %cst_78 = arith.constant dense<0.000000e+00> : vector<2x4xf32>
    %122 = vector.multi_reduction <add>, %121, %cst_78 [2] : vector<2x4x32xf32> to vector<2x4xf32>
    %123 = vector.shape_cast %122 : vector<2x4xf32> to vector<2x4x1xf32>
    %cst_79 = arith.constant 3.200000e+01 : f32
    %124 = vector.broadcast %cst_79 : f32 to vector<2x4x1xf32>
    %125 = arith.divf %123, %124 : vector<2x4x1xf32>
    %126 = vector.broadcast %118 : vector<2x4x1xf32> to vector<2x4x32xf32>
    %127 = arith.subf %110, %126 : vector<2x4x32xf32>
    %cst_80 = arith.constant 9.99999974E-6 : f32
    %128 = vector.broadcast %cst_80 : f32 to vector<2x4x1xf32>
    %129 = arith.addf %125, %128 : vector<2x4x1xf32>
    %130 = math.rsqrt %129 : vector<2x4x1xf32>
    %131 = vector.broadcast %130 : vector<2x4x1xf32> to vector<2x4x32xf32>
    %132 = arith.mulf %127, %131 : vector<2x4x32xf32>
    %133 = vector.shape_cast %112 : vector<1x32xf32> to vector<1x1x32xf32>
    %134 = vector.broadcast %133 : vector<1x1x32xf32> to vector<2x4x32xf32>
    %135 = arith.mulf %132, %134 : vector<2x4x32xf32>
    %136 = vector.shape_cast %114 : vector<1x32xf32> to vector<1x1x32xf32>
    %137 = vector.broadcast %136 : vector<1x1x32xf32> to vector<2x4x32xf32>
    %138 = arith.addf %135, %137 : vector<2x4x32xf32>
    %139 = arith.addf %138, %3 : vector<2x4x32xf32>
    %cst_81 = arith.constant 0.000000e+00 : f32
    %140 = vector.broadcast %cst_81 : f32 to vector<2x4x32xf32>
    %141 = arith.cmpf ogt, %139, %140 : vector<2x4x32xf32>
    %cst_82 = arith.constant 2.000000e-01 : f32
    %142 = vector.broadcast %cst_82 : f32 to vector<2x4x32xf32>
    %143 = arith.mulf %142, %139 : vector<2x4x32xf32>
    %144 = arith.select %141, %139, %143 : vector<2x4x32xi1>, vector<2x4x32xf32>
    %c0_83 = arith.constant 0 : index
    %c0_84 = arith.constant 0 : index
    %c0_85 = arith.constant 0 : index
    %145 = vector.load %arg19[%c0_83, %c0_84, %c0_85] : memref<2x4x32xf32, #tpu.memory_space<vmem>>, vector<2x4x32xf32>
    tpu.vector_store %arg19[%c0_83, %c0_84, %c0_85], %144 {strides = array<i32>} : memref<2x4x32xf32, #tpu.memory_space<vmem>>, vector<2x4x32xf32>,
    %c3_i32_86 = arith.constant 3 : i32
    %146 = arith.cmpi eq, %arg1, %c3_i32_86 : i32
    %147 = arith.extui %146 : i1 to i32
    %c0_i32_87 = arith.constant 0 : i32
    %148 = arith.cmpi ne, %147, %c0_i32_87 : i32
    scf.if %148 {
      %c0_88 = arith.constant 0 : index
      %c0_89 = arith.constant 0 : index
      %149 = vector.load %arg12[%c0_88, %c0_89] : memref<1x32xf32, #tpu.memory_space<vmem>>, vector<1x32xf32>
      %150 = vector.shape_cast %149 : vector<1x32xf32> to vector<1x1x32xf32>
      %151 = vector.broadcast %150 : vector<1x1x32xf32> to vector<2x4x32xf32>
      %152 = arith.mulf %144, %151 : vector<2x4x32xf32>
      %cst_90 = arith.constant dense<0.000000e+00> : vector<2x4xf32>
      %153 = vector.multi_reduction <add>, %152, %cst_90 [2] : vector<2x4x32xf32> to vector<2x4xf32>
      %154 = vector.shape_cast %153 : vector<2x4xf32> to vector<2x4x1xf32>
      %c0_91 = arith.constant 0 : index
      %c0_92 = arith.constant 0 : index
      %155 = vector.load %arg13[%c0_91, %c0_92] : memref<1x1xf32, #tpu.memory_space<vmem>>, vector<1x1xf32>
      %156 = vector.shape_cast %155 : vector<1x1xf32> to vector<1x1x1xf32>
      %157 = vector.broadcast %156 : vector<1x1x1xf32> to vector<2x4x1xf32>
      %158 = arith.addf %154, %157 : vector<2x4x1xf32>
      %cst_93 = arith.constant dense<0xFF800000> : vector<2x1xf32>
      %159 = vector.multi_reduction <maximumf>, %158, %cst_93 [1] : vector<2x4x1xf32> to vector<2x1xf32>
      %160 = vector.shape_cast %159 : vector<2x1xf32> to vector<2x1x1xf32>
      %161 = vector.broadcast %160 : vector<2x1x1xf32> to vector<2x4x1xf32>
      %162 = arith.subf %158, %161 : vector<2x4x1xf32>
      %163 = math.exp %162 : vector<2x4x1xf32>
      %cst_94 = arith.constant dense<0.000000e+00> : vector<2x1xf32>
      %164 = vector.multi_reduction <add>, %163, %cst_94 [1] : vector<2x4x1xf32> to vector<2x1xf32>
      %165 = vector.shape_cast %164 : vector<2x1xf32> to vector<2x1x1xf32>
      %166 = tpu.reciprocal %165 {approx = true} : vector<2x1x1xf32> -> vector<2x1x1xf32>
      %167 = vector.broadcast %166 : vector<2x1x1xf32> to vector<2x4x1xf32>
      %168 = arith.mulf %163, %167 : vector<2x4x1xf32>
      %169 = vector.broadcast %168 : vector<2x4x1xf32> to vector<2x4x32xf32>
      %170 = arith.mulf %144, %169 : vector<2x4x32xf32>
      %cst_95 = arith.constant dense<0.000000e+00> : vector<2x32xf32>
      %171 = vector.multi_reduction <add>, %170, %cst_95 [1] : vector<2x4x32xf32> to vector<2x32xf32>
      %c0_96 = arith.constant 0 : index
      %c0_97 = arith.constant 0 : index
      %172 = vector.load %arg14[%c0_96, %c0_97] : memref<32x32xbf16, #tpu.memory_space<vmem>>, vector<32x32xbf16>
      %173 = arith.truncf %171 : vector<2x32xf32> to vector<2x32xbf16>
      %cst_98 = arith.constant dense<0.000000e+00> : vector<2x32xf32>
      %174 = tpu.matmul %173, %172, %cst_98 {dimension_numbers = #tpu.dot_dimension_numbers<[1], [0], [0], [1], [0, 0, 1, 1], [], []>} : vector<2x32xbf16>, vector<32x32xbf16>, vector<2x32xf32> -> vector<2x32xf32>
      %c0_99 = arith.constant 0 : index
      %c0_100 = arith.constant 0 : index
      %175 = vector.load %arg15[%c0_99, %c0_100] : memref<1x32xf32, #tpu.memory_space<vmem>>, vector<1x32xf32>
      %176 = vector.broadcast %175 : vector<1x32xf32> to vector<2x32xf32>
      %177 = arith.addf %174, %176 : vector<2x32xf32>
      %cst_101 = arith.constant 0.000000e+00 : f32
      %178 = vector.broadcast %cst_101 : f32 to vector<2x32xf32>
      %179 = arith.cmpf ogt, %177, %178 : vector<2x32xf32>
      %cst_102 = arith.constant 2.000000e-01 : f32
      %180 = vector.broadcast %cst_102 : f32 to vector<2x32xf32>
      %181 = arith.mulf %180, %177 : vector<2x32xf32>
      %182 = arith.select %179, %177, %181 : vector<2x32xi1>, vector<2x32xf32>
      %c0_103 = arith.constant 0 : index
      %c0_104 = arith.constant 0 : index
      %183 = vector.load %arg16[%c0_103, %c0_104] : memref<1x32xf32, #tpu.memory_space<vmem>>, vector<1x32xf32>
      %184 = vector.broadcast %183 : vector<1x32xf32> to vector<2x32xf32>
      %185 = arith.mulf %182, %184 : vector<2x32xf32>
      %cst_105 = arith.constant dense<0.000000e+00> : vector<2xf32>
      %186 = vector.multi_reduction <add>, %185, %cst_105 [1] : vector<2x32xf32> to vector<2xf32>
      %187 = vector.shape_cast %186 : vector<2xf32> to vector<2x1xf32>
      %c0_106 = arith.constant 0 : index
      %c0_107 = arith.constant 0 : index
      %188 = vector.load %arg17[%c0_106, %c0_107] : memref<1x1xf32, #tpu.memory_space<vmem>>, vector<1x1xf32>
      %189 = vector.broadcast %188 : vector<1x1xf32> to vector<2x1xf32>
      %190 = arith.addf %187, %189 : vector<2x1xf32>
      %191 = vector.shape_cast %190 : vector<2x1xf32> to vector<2x1xf32>
      %192 = vector.broadcast %191 : vector<2x1xf32> to vector<2x128xf32>
      %c0_108 = arith.constant 0 : index
      %c0_109 = arith.constant 0 : index
      %193 = vector.load %arg18[%c0_108, %c0_109] : memref<2x128xf32, #tpu.memory_space<vmem>>, vector<2x128xf32>
      tpu.vector_store %arg18[%c0_108, %c0_109], %192 {strides = array<i32>} : memref<2x128xf32, #tpu.memory_space<vmem>>, vector<2x128xf32>,
    } else {
    }
    return
  }
  func.func @transform_0(%arg0: i32, %arg1: i32) -> (i32, i32, i32) {
    %c0_i32 = arith.constant 0 : i32
    %c0_i32_0 = arith.constant 0 : i32
    %c0_i32_1 = arith.constant 0 : i32
    return %arg0, %c0_i32, %c0_i32_0 : i32, i32, i32
  }
  func.func @transform_1(%arg0: i32, %arg1: i32) -> (i32, i32) {
    %c0_i32 = arith.constant 0 : i32
    %c0_i32_0 = arith.constant 0 : i32
    %c0_i32_1 = arith.constant 0 : i32
    return %c0_i32, %c0_i32_0 : i32, i32
  }
  func.func @transform_2(%arg0: i32, %arg1: i32) -> (i32, i32) {
    %c0_i32 = arith.constant 0 : i32
    %c0_i32_0 = arith.constant 0 : i32
    %c0_i32_1 = arith.constant 0 : i32
    return %c0_i32, %c0_i32_0 : i32, i32
  }
  func.func @transform_3(%arg0: i32, %arg1: i32) -> (i32, i32) {
    %c0_i32 = arith.constant 0 : i32
    %c0_i32_0 = arith.constant 0 : i32
    %c0_i32_1 = arith.constant 0 : i32
    return %c0_i32, %c0_i32_0 : i32, i32
  }
  func.func @transform_4(%arg0: i32, %arg1: i32) -> (i32, i32) {
    %c0_i32 = arith.constant 0 : i32
    %c0_i32_0 = arith.constant 0 : i32
    %c0_i32_1 = arith.constant 0 : i32
    return %c0_i32, %c0_i32_0 : i32, i32
  }
  func.func @transform_5(%arg0: i32, %arg1: i32) -> (i32, i32) {
    %c0_i32 = arith.constant 0 : i32
    %c0_i32_0 = arith.constant 0 : i32
    %c0_i32_1 = arith.constant 0 : i32
    return %c0_i32, %c0_i32_0 : i32, i32
  }
  func.func @transform_6(%arg0: i32, %arg1: i32) -> (i32, i32, i32, i32) {
    %c0_i32 = arith.constant 0 : i32
    %c0_i32_0 = arith.constant 0 : i32
    %c0_i32_1 = arith.constant 0 : i32
    %c0_i32_2 = arith.constant 0 : i32
    return %arg1, %c0_i32, %c0_i32_0, %c0_i32_1 : i32, i32, i32, i32
  }
  func.func @transform_7(%arg0: i32, %arg1: i32) -> (i32, i32, i32, i32) {
    %c0_i32 = arith.constant 0 : i32
    %c0_i32_0 = arith.constant 0 : i32
    %c0_i32_1 = arith.constant 0 : i32
    %c0_i32_2 = arith.constant 0 : i32
    return %arg1, %c0_i32, %c0_i32_0, %c0_i32_1 : i32, i32, i32, i32
  }
  func.func @transform_8(%arg0: i32, %arg1: i32) -> (i32, i32, i32, i32) {
    %c0_i32 = arith.constant 0 : i32
    %c0_i32_0 = arith.constant 0 : i32
    %c0_i32_1 = arith.constant 0 : i32
    %c0_i32_2 = arith.constant 0 : i32
    return %arg1, %c0_i32, %c0_i32_0, %c0_i32_1 : i32, i32, i32, i32
  }
  func.func @transform_9(%arg0: i32, %arg1: i32) -> (i32, i32, i32, i32) {
    %c0_i32 = arith.constant 0 : i32
    %c0_i32_0 = arith.constant 0 : i32
    %c0_i32_1 = arith.constant 0 : i32
    %c0_i32_2 = arith.constant 0 : i32
    return %arg1, %c0_i32, %c0_i32_0, %c0_i32_1 : i32, i32, i32, i32
  }
  func.func @transform_10(%arg0: i32, %arg1: i32) -> (i32, i32) {
    %c0_i32 = arith.constant 0 : i32
    %c0_i32_0 = arith.constant 0 : i32
    %c0_i32_1 = arith.constant 0 : i32
    return %c0_i32, %c0_i32_0 : i32, i32
  }
  func.func @transform_11(%arg0: i32, %arg1: i32) -> (i32, i32) {
    %c0_i32 = arith.constant 0 : i32
    %c0_i32_0 = arith.constant 0 : i32
    %c0_i32_1 = arith.constant 0 : i32
    return %c0_i32, %c0_i32_0 : i32, i32
  }
  func.func @transform_12(%arg0: i32, %arg1: i32) -> (i32, i32) {
    %c0_i32 = arith.constant 0 : i32
    %c0_i32_0 = arith.constant 0 : i32
    %c0_i32_1 = arith.constant 0 : i32
    return %c0_i32, %c0_i32_0 : i32, i32
  }
  func.func @transform_13(%arg0: i32, %arg1: i32) -> (i32, i32) {
    %c0_i32 = arith.constant 0 : i32
    %c0_i32_0 = arith.constant 0 : i32
    %c0_i32_1 = arith.constant 0 : i32
    return %c0_i32, %c0_i32_0 : i32, i32
  }
  func.func @transform_14(%arg0: i32, %arg1: i32) -> (i32, i32) {
    %c0_i32 = arith.constant 0 : i32
    %c0_i32_0 = arith.constant 0 : i32
    %c0_i32_1 = arith.constant 0 : i32
    return %c0_i32, %c0_i32_0 : i32, i32
  }
  func.func @transform_15(%arg0: i32, %arg1: i32) -> (i32, i32) {
    %c0_i32 = arith.constant 0 : i32
    %c0_i32_0 = arith.constant 0 : i32
    %c0_i32_1 = arith.constant 0 : i32
    return %c0_i32, %c0_i32_0 : i32, i32
  }
  func.func @transform_16(%arg0: i32, %arg1: i32) -> (i32, i32) {
    %c0_i32 = arith.constant 0 : i32
    %c0_i32_0 = arith.constant 0 : i32
    return %arg0, %c0_i32 : i32, i32
  }
}

</mosaic_0001>

<bundles_post_ra>
// kernel: _lambda_.5
= control target key start
LH: loop header
LB: loop body
LE: loop exit
PB: predicated region body
PF: predicated region fallthrough
CT: control target
= control target key end

     0   :  { %s2625_s0 = inlined_call_operand.vmem [shape: f32[2,8,4], index: 0, kind: input, shape index: {}]   ;;  %s2626_s1 = inlined_call_operand.vmem [shape: bf16[2,8], index: 1, kind: input, shape index: {}]   ;;  %s2627_s2 = inlined_call_operand.vmem [shape: bf16[4,32], index: 2, kind: input, shape index: {}]   ;;  %s2628_s3 = inlined_call_operand.vmem [shape: f32[1,32], index: 3, kind: input, shape index: {}, may-alias: {3,5,13}]   ;;  %s2629_s4 = inlined_call_operand.vmem [shape: f32[1,32], index: 4, kind: input, shape index: {}]   ;;  %s2630_s5 = inlined_call_operand.vmem [shape: f32[1,32], index: 5, kind: input, shape index: {}, may-alias: {3,5,13}]   ;;  %s2631_s6 = inlined_call_operand.hbm [shape: bf16[4,2,96,32], index: 6, kind: input, shape index: {}]   ;;  %s2632_s7 = inlined_call_operand.vmem [shape: f32[4,2,1,32], index: 7, kind: input, shape index: {}]   ;;  %s2633_s8 = inlined_call_operand.vmem [shape: f32[4,2,1,32], index: 8, kind: input, shape index: {}]   ;;  %s2634_s9 = inlined_call_operand.vmem [shape: f32[4,2,1,32], index: 9, kind: input, shape index: {}]   ;;  %s2635_s10 = inlined_call_operand.vmem [shape: f32[1,32], index: 10, kind: input, shape index: {}]   ;;  %s2636_s11 = inlined_call_operand.<no memory space> [shape: f32[1,1], index: 11, kind: input, shape index: {}, may-alias: {11,15}]   ;;  %s2637_s12 = inlined_call_operand.vmem [shape: bf16[32,32], index: 12, kind: input, shape index: {}]   ;;  %s2638_s13 = inlined_call_operand.vmem [shape: f32[1,32], index: 13, kind: input, shape index: {}, may-alias: {3,5,13}]   ;;  %s2639_s14 = inlined_call_operand.vmem [shape: f32[1,32], index: 14, kind: input, shape index: {}]   ;;  %s2640_s16 = inlined_call_operand.vmem [shape: f32[2,128], index: 16, kind: output, shape index: {}]   ;;  %s2641_s15 = inlined_call_operand.<no memory space> [shape: f32[1,1], index: 15, kind: input, shape index: {}, may-alias: {11,15}]  }
   0x1   :  { %2645 = sst [smem:[#allocation13_spill]] %s2625_s0  ;;  %v21_v0 = vstv %s2636_s11  ;;  %v23_v1 = vstv %s2641_s15 }
   0x2   :  { %2646 = sst [smem:[#allocation14_spill]] %s2639_s14  ;;  %22 = vst [vmem:[#allocation6] sm:$0x1] %v21_v0  ;;  %24 = vst [vmem:[#allocation7] sm:$0x1] %v23_v1 }
   0x3   :  { %2647 = sst [smem:[#allocation15_spill]] %s2640_s16 }
   0x4   :  { %25 = vsyncpa [#allocation9], 0 }
   0x5   :  { %27 = vsyncpa [#allocation9 + $0x1], 0  ;;  %s2316_s25 = smov 0   ;;  %s2318_s26 = smov 0  }
   0x6   :  { %s2320_s27 = smov 0   ;;  %s2322_s28 = smov 0  }
   0x7   :  { %s2324_s29 = smov 0   ;;  %s2326_s30 = smov 0  }
   0x8 LB: > { %2648 = sst [smem:[#allocation11_spill]] %s2208_s29  ;;  %s1854_s11 = sadd.s32 4294967295, %s2212_s30   ;;  %s2212_s30 = sphi %s2326_s30, %s33_s30   ;;  %s2208_s29 = sphi %s2324_s29, %s2657_s29   ;;  %s2204_s28 = sphi %s2322_s28, %s2656_s28   ;;  %s2200_s27 = sphi %s2320_s27, %s2660_s27   ;;  %s2196_s26 = sphi %s2318_s26, %s2659_s26   ;;  %s2192_s25 = sphi %s2316_s25, %s2658_s25  }
   0x9   : > { %s42_s15 = sadd.s32 1, %s2208_s29  ;;  %s183_s0 = sadd.s32 1, %s2200_s27 }
   0xa   : > { %p43_p0 = scmp.ge.s32.totalorder %s42_s15, 4  ;;  %p190_p1 = scmp.ne.s32.totalorder %s2200_s27, %s2196_s26 }
   0xb   : > { %p191_p2 = scmp.eq.s32.totalorder %s2212_s30, 0  ;;  %p196_p4 = scmp.ne.s32.totalorder %s2196_s26, %s2192_s25 }
   0xc   : > { %s2662_s15 = smov (%p43_p0, %s42_s15), 0  ;;  %p197_p5 = scmp.eq.s32.totalorder %s1854_s11, 0 }
   0xd   : > { %2649 = sst [smem:[#allocation12_spill]] %s2662_s15  ;;  %p192_p3 = por %p191_p2, %p190_p1 }
   0xe   : > { %s180_s17 = ssub.s32 %s2208_s29, %s2662_s15  ;;  %p2355_p7 = por %p197_p5, %p196_p4 }
   0xf   : > { %p181_p6 = scmp.eq.s32.totalorder %s180_s17, 0  ;;  %p2039_p8 = scmp.lt.s32.totalorder %s2212_s30, 4 }
  0x10   : > { %s492_s20 = sand.u32 1, %s2200_s27   ;;  %s2031_s21 = smul.u32 1536, %s2208_s29 }
  0x11   : > { %s2361_s19 = scalar_select %p181_p6, %s2200_s27, %s183_s0  }
  0x12   : > { %s2030_s22 = smul.u32 96, %s492_s20  ;;  %s502_s16 = scalar_lea.hbm %s2631_s6, %s2031_s21 }
  0x13   : > { %p2368_p9 = pnand %p2039_p8, %p192_p3  ;;  %s493_s17 = scalar_lea.sflag [#allocation9], %s492_s20 }
  0x14   : > { %s496_s25 = scalar_lea.vmem [#allocation8], %s2030_s22  ;;  %s2214_s15 = smov [#allocation8]  }
  0x15   : > { %s503_s11 = sshll.u32 %s496_s25, 4  ;;  %p2136_p10 = pneg %p2368_p9  ;;  %s504_s11 = int_to_ptr.vmem [resolvable:$true] %s503_s11 }
  0x16   : > { %s2147_s0 = scalar_lea.vmem %s504_s11, 1536  ;;  %s2152_s29 = sshll.u32 %s2214_s15, 4  ;;  %s2153_s29 = int_to_ptr.vmem [resolvable:$false] %s2152_s29 }
  0x17   : > { %p2148_p11 = scmp.ne.s32.totalorder %s504_s11, %s2147_s0  ;;  %s2154_s23 = scalar_lea.vmem %s2153_s29, 3072 }
  0x18   : > { %p2155_p0 = scmp.lt.s32.totalorder %s504_s11, %s2153_s29  ;;  %p2156_p1 = scmp.lt.s32.totalorder %s2154_s23, %s2147_s0 }
  0x19   : > { %p2150_p12 = pnand %p2148_p11, %p2136_p10 }
  0x1a   : > { %p2157_p2 = por %p2156_p1, %p2155_p0 }
  0x1b   : > { %p2151_p13 = pneg %p2150_p12 }
  0x1d   : > { %p2158_p3 = pnand %p2157_p2, %p2151_p13 }
  0x1f   : > { %2161 = shalt.err (!%p2158_p3)
}
  0x20   : > { %s2215_s21 = smov 64   ;;  %s2216_s20 = smov 4  }
  0x21   : > { %2038 = dma.hbm_to_vmem [thread:$0]  (!%p2368_p9), %s502_s16, 1536, %s504_s11, %s493_s17, %s2215_s21, %s2215_s21, %s2216_s20  }
  0x22   : > { %p1859_p4 = scmp.ge.s32.totalorder %s2212_s30, 1  ;;  %p532_p5 = scmp.lt.s32.totalorder %s2212_s30, 5 }
  0x24   : > { %p533_p6 = pnand %p1859_p4, %p532_p5 }
  0x25   : > { %s538_s15 = sand.u32 (!%p533_p6), 1, %s2196_s26  }
  0x26   : > { %536 = sbr.rel (%p533_p6) target bundleno = 2742 (0xab6), region = 84  ;;  %s539_s29 = scalar_lea.sflag (!%p533_p6), [#allocation9], %s538_s15 }
  0x27   : > { %s2032_s22 = smul.u32 (!%p533_p6), 96, %s538_s15 }
  0x29   : > { %s2379_s24 = scalar_lea.vmem (!%p533_p6), [#allocation8], %s2032_s22 }
  0x2b   : > { %2187 = dma.done.wait (%p2355_p7), %s539_s29, 1536  }
  0x2c   : > { %2189 = vsyncadd (%p2355_p7), %s539_s29, 4294965760  ;;  %p613_p8 = scmp.lt.s32.totalorder %s2204_s28, 3  ;;  %p1863_p7 = scmp.ne.s32.totalorder %s2204_s28, 0 }
  0x2d   : > { %s2652_s25 = sld [smem:[#allocation13_spill]] (!%p1863_p7) }
  0x2e   : > { %s614_s14 = scalar_select %p613_p8, %s2204_s28, 3 }
  0x2f   : > { %633 = sbr.rel (%p1863_p7) target bundleno = 775 (0x307), region = 92 }
  0x30   : > { %s1860_s16 = sshll.u32 %s614_s14, 1 }
  0x31   : > { %s2390_s17 = scalar_lea.vmem %s2632_s7, %s1860_s16  ;;  %s2395_s21 = scalar_lea.vmem %s2633_s8, %s1860_s16 }
  0x32   : > { %s2400_s18 = scalar_lea.vmem %s2634_s9, %s1860_s16 }
  0x33   : > { %s2653_s11 = smov (!%p1863_p7), %s2652_s25 }
  0x34   : > { %vm634_vm0 = vcmask 261120   ;;  %v641_v2 = vld [vmem:[%s2627_s2] sm:$0x3]  ;;  %vm647_vm1 = vcmask 1041408   ;;  %v2217_v3 = vmov 0.0   ;;  %vm2218_vm2 = vmmov 0  }
  0x35   : > { %635 = vst.msk [vmem:[#allocation3] sm:$0xff] %vm634_vm0, %v2217_v3  ;;  %636 = vst.msk [vmem:[#allocation3 + $0x18] sm:$0xff] %vm634_vm0, %v2217_v3  ;;  %1956 = vmatprep.subr.bf16.mxu0 %v2217_v3  ;;  %v649_v4 = vsel %vm647_vm1, %v641_v2, 0  ;;  %1958 = vmatprep.mubr.msk.bf16.mxu0 %vm2218_vm2, %v2217_v3  ;;  %v639_v5 = vld [vmem:[%s2652_s25] sm:$0xff]  ;;  %v640_v6 = vld [vmem:[%s2653_s11 + $0x8] sm:$0xff]  ;;  %vm643_vm3 = vcmask 31744  }
  0x36   : > { %637 = vst.msk [vmem:[#allocation3 + $0xa] sm:$0xff] %vm634_vm0, %v2217_v3  ;;  %638 = vst.msk [vmem:[#allocation3 + $0x22] sm:$0xff] %vm634_vm0, %v2217_v3  ;;  %1957 = vmatpush3.bf16.msra.mxu0 %v649_v4  ;;  %v642_v7 = vpack.c.bf16 %v640_v6, %v639_v5  ;;  %1962 = vmatprep.subr.bf16.mxu1 %v2217_v3  ;;  %vm699_vm4 = vcmask 1043456   ;;  %v692_v13 = vld [vmem:[%s2626_s1] sm:$0x1]  ;;  %vm695_vm5 = vcmask 64512  }
  0x37   : > { %1964 = vmatprep.mubr.msk.bf16.mxu1 %vm2218_vm2, %v2217_v3  ;;  %1968 = vmatprep.subr.bf16.mxu0 %v2217_v3  ;;  %vm743_vm6 = vcmask 254976   ;;  %v1867_v23 = vld [vmem:[%s2628_s3] ss:$0 sm:$0xff] }
  0x38   : > { %v1868_v49 = vld [vmem:[%s2629_s4] ss:$0 sm:$0xff] }
  0x39   : > { %1959 = vmatmul.mubr.msk.bf16.vlgmr.msra.gmra.mxu0 %vm643_vm3, %v642_v7  ;;  %v1869_v51 = vld [vmem:[%s2630_s5] ss:$0 sm:$0xff] }
  0x3a   : > { %1970 = vmatprep.mubr.msk.bf16.mxu0 %vm2218_vm2, %v2217_v3 }
  0xf9   : > { %v685_v8 = vpop.f32.mrf.mxu0 }
  0xfa   : > { %v693_v9 = vpack.c.bf16 %v685_v8, %v685_v8 }
  0xfb   : > { %v1960_v10 = vpop.f32.mrf.mxu0 }
  0xfc   : > { %v701_v11 = vsel %vm699_vm4, %v693_v9, 0 }
  0xfd   : > { %v688_v12 = vpop.f32.mrf.mxu0  ;;  %1963 = vmatpush3.bf16.msra.mxu1 %v701_v11 }
  0xfe   : > { %v694_v14 = vpack.c.bf16 %v688_v12, %v688_v12 }
  0xff   : > { %v1961_v15 = vpop.f32.mrf.mxu0 }
 0x100   : > { %v746_v16 = vsel %vm699_vm4, %v694_v14, 0  ;;  %1965 = vmatmul.mubr.msk.bf16.vlgmr.msra.gmra.mxu1 %vm695_vm5, %v692_v13 }
 0x101   : > { %1969 = vmatpush3.bf16.msra.mxu0 %v746_v16 }
 0x104   : > { %1971 = vmatmul.mubr.msk.bf16.vlgmr.msra.gmra.mxu0 %vm695_vm5, %v692_v13 }
 0x1c0   : > { %v737_v17 = vpop.f32.mrf.mxu1 }
 0x1c1   : > { %744 = vst.msk [vmem:[#allocation2] sm:$0x3] %vm743_vm6, %v737_v17 }
 0x1c2   : > { %v1966_v18 = vpop.f32.mrf.mxu1 }
 0x1c4   : > { %v740_v19 = vpop.f32.mrf.mxu1  ;;  %v782_v20 = vpop.f32.mrf.mxu0 }
 0x1c5   : > { %789 = vst.msk [vmem:[#allocation2 + $0x2] sm:$0x3] %vm743_vm6, %v782_v20 }
 0x1c6   : > { %v1967_v21 = vpop.f32.mrf.mxu1  ;;  %v1972_v22 = vpop.f32.mrf.mxu0 }
 0x1c8   : > { %v785_v24 = vpop.f32.mrf.mxu0  ;;  %v790_v25 = vld [vmem:[#allocation2] sm:$0x3] }
 0x1c9   : > { %v799_v26 = vadd.f32 %v1867_v23, %v790_v25 }
 0x1ca   : > { %v1973_v27 = vpop.f32.mrf.mxu0 }
 0x1cb   : > { %v803_v28 = vsel %vm743_vm6, %v799_v26, 0.0 }
 0x1cc   : > { %804 = vadd.xlane.f32.xlu0 %v803_v28  ;;  %v791_v29 = vld [vmem:[#allocation2 + $0x2] sm:$0x3] }
 0x1cd   : > { %v800_v30 = vadd.f32 %v1867_v23, %v791_v29 }
 0x1cf   : > { %v806_v31 = vsel %vm743_vm6, %v800_v30, 0.0 }
 0x1d0   : > { %807 = vadd.xlane.f32.xlu0 %v806_v31 }
 0x255   : > { %v805_v32 = vpop.xlane.xlu0 %804 }
 0x256   : > { %v810_v33 = vmul.f32 0.03125, %v805_v32 }
 0x258   : > { %v812_v34 = vsub.f32 %v799_v26, %v810_v33 }
 0x259   : > { %v808_v35 = vpop.xlane.xlu0 %807 }
 0x25a   : > { %v811_v36 = vmul.f32 0.03125, %v808_v35  ;;  %v814_v37 = vmul.f32 %v812_v34, %v812_v34 }
 0x25c   : > { %v813_v38 = vsub.f32 %v800_v30, %v811_v36  ;;  %v816_v39 = vsel %vm743_vm6, %v814_v37, 0.0 }
 0x25d   : > { %817 = vadd.xlane.f32.xlu1 %v816_v39 }
 0x25e   : > { %v815_v40 = vmul.f32 %v813_v38, %v813_v38 }
 0x260   : > { %v819_v41 = vsel %vm743_vm6, %v815_v40, 0.0 }
 0x261   : > { %820 = vadd.xlane.f32.xlu1 %v819_v41 }
 0x2e6   : > { %v818_v42 = vpop.xlane.xlu1 %817 }
 0x2e7   : > { %v822_v43 = vmul.f32 0.03125, %v818_v42 }
 0x2e9   : > { %v824_v44 = vadd.f32 1e-05, %v822_v43 }
 0x2ea   : > { %v821_v45 = vpop.xlane.xlu1 %820 }
 0x2eb   : > { %2098 = vrsqrt.f32 %v824_v44  ;;  %v823_v46 = vmul.f32 0.03125, %v821_v45 }
 0x2ed   : > { %v825_v47 = vadd.f32 1e-05, %v823_v46 }
 0x2ef   : > { %2100 = vrsqrt.f32 %v825_v47 }
 0x2f8   : > { %v2099_v48 = vpop.eup %2098 }
 0x2f9   : > { %v828_v50 = vmul.f32 %v2099_v48, %v812_v34 }
 0x2fb   : > { %v836_v52 = vmul.f32 %v1868_v49, %v828_v50 }
 0x2fc   : > { %v2101_v53 = vpop.eup %2100 }
 0x2fd   : > { %v844_v54 = vadd.f32 %v1869_v51, %v836_v52  ;;  %v829_v55 = vmul.f32 %v2101_v53, %v813_v38 }
 0x2ff   : > { %vm846_vm7 = vcmp.gt.f32.partialorder %v844_v54, 0.0  ;;  %v848_v56 = vmul.f32 0.2, %v844_v54  ;;  %v837_v57 = vmul.f32 %v1868_v49, %v829_v55 }
 0x301   : > { %v850_v58 = vsel %vm846_vm7, %v844_v54, %v848_v56  ;;  %v845_v59 = vadd.f32 %v1869_v51, %v837_v57 }
 0x302   : > { %852 = vst.msk [vmem:[#allocation2] sm:$0x3] %vm743_vm6, %v850_v58 }
 0x303   : > { %vm847_vm8 = vcmp.gt.f32.partialorder %v845_v59, 0.0  ;;  %v849_v60 = vmul.f32 0.2, %v845_v59 }
 0x305   : > { %v851_v61 = vsel %vm847_vm8, %v845_v59, %v849_v60 }
 0x306   : > { %853 = vst.msk [vmem:[#allocation2 + $0x2] sm:$0x3] %vm743_vm6, %v851_v61 }
 0x307 PF: > { %vm856_vm9 = vcmask 254976  }
 0x309   : > { %v2434_v62 = vld [vmem:[#allocation2] sm:$0x3] }
 0x30a   : > { %857 = vst.msk [vmem:[#allocation3 + $0x8] sm:$0x3] %vm856_vm9, %v2434_v62  ;;  %861 = sbr.rel (%p1863_p7) target bundleno = 791 (0x317), region = 96 }
 0x30d   : > { %v2436_v63 = vld [vmem:[#allocation2 + $0x2] sm:$0x3] }
 0x30e   : > { %858 = vst.msk [vmem:[#allocation3 + $0x20] sm:$0x3] %vm856_vm9, %v2436_v63 }
 0x311   : > { %v862_v0 = vld [vmem:[#allocation3 + $0x7] sm:$0x3]  ;;  %v866_v2 = vld [vmem:[#allocation3 + $0x9] sm:$0x3] }
 0x312   : > { %864 = vst.msk [vmem:[#allocation4] sm:$0x3] %vm856_vm9, %v862_v0  ;;  %868 = vst.msk [vmem:[#allocation5] sm:$0x3] %vm856_vm9, %v866_v2 }
 0x315   : > { %v863_v1 = vld [vmem:[#allocation3 + $0x1f] sm:$0x3]  ;;  %v867_v3 = vld [vmem:[#allocation3 + $0x21] sm:$0x3] }
 0x316   : > { %865 = vst.msk [vmem:[#allocation4 + $0x2] sm:$0x3] %vm856_vm9, %v863_v1  ;;  %869 = vst.msk [vmem:[#allocation5 + $0x2] sm:$0x3] %vm856_vm9, %v867_v3 }
 0x317 PF: > { %p1871_p9 = scmp.ne.s32.totalorder %s2204_s28, 1 }
 0x319   : > { %873 = sbr.rel (%p1871_p9) target bundleno = 801 (0x321), region = 100 }
 0x31e   : > { %v874_v4 = vld [vmem:[#allocation3 + $0x6] sm:$0x3]  ;;  %v875_v5 = vld [vmem:[#allocation3 + $0x1e] sm:$0x3]  ;;  %v878_v6 = vld [vmem:[#allocation3 + $0xa] sm:$0x3] }
 0x31f   : > { %876 = vst.msk [vmem:[#allocation4] sm:$0x3] %vm856_vm9, %v874_v4  ;;  %877 = vst.msk [vmem:[#allocation4 + $0x2] sm:$0x3] %vm856_vm9, %v875_v5  ;;  %v879_v7 = vld [vmem:[#allocation3 + $0x22] sm:$0x3] }
 0x320   : > { %880 = vst.msk [vmem:[#allocation5] sm:$0x3] %vm856_vm9, %v878_v6  ;;  %881 = vst.msk [vmem:[#allocation5 + $0x2] sm:$0x3] %vm856_vm9, %v879_v7 }
 0x321 PF: > { %p1872_p10 = scmp.ne.s32.totalorder %s2204_s28, 2 }
 0x323   : > { %885 = sbr.rel (%p1872_p10) target bundleno = 811 (0x32b), region = 104 }
 0x328   : > { %v886_v8 = vld [vmem:[#allocation3 + $0x4] sm:$0x3]  ;;  %v887_v9 = vld [vmem:[#allocation3 + $0x1c] sm:$0x3]  ;;  %v890_v10 = vld [vmem:[#allocation3 + $0xc] sm:$0x3] }
 0x329   : > { %888 = vst.msk [vmem:[#allocation4] sm:$0x3] %vm856_vm9, %v886_v8  ;;  %889 = vst.msk [vmem:[#allocation4 + $0x2] sm:$0x3] %vm856_vm9, %v887_v9  ;;  %v891_v11 = vld [vmem:[#allocation3 + $0x24] sm:$0x3] }
 0x32a   : > { %892 = vst.msk [vmem:[#allocation5] sm:$0x3] %vm856_vm9, %v890_v10  ;;  %893 = vst.msk [vmem:[#allocation5 + $0x2] sm:$0x3] %vm856_vm9, %v891_v11 }
 0x32b PF: > { %p1873_p11 = scmp.ne.s32.totalorder %s2204_s28, 3 }
 0x32d   : > { %897 = sbr.rel (%p1873_p11) target bundleno = 821 (0x335), region = 108 }
 0x332   : > { %v898_v12 = vld [vmem:[#allocation3] sm:$0x3]  ;;  %v899_v13 = vld [vmem:[#allocation3 + $0x18] sm:$0x3]  ;;  %v902_v14 = vld [vmem:[#allocation3 + $0x10] sm:$0x3] }
 0x333   : > { %900 = vst.msk [vmem:[#allocation4] sm:$0x3] %vm856_vm9, %v898_v12  ;;  %901 = vst.msk [vmem:[#allocation4 + $0x2] sm:$0x3] %vm856_vm9, %v899_v13  ;;  %v903_v15 = vld [vmem:[#allocation3 + $0x28] sm:$0x3] }
 0x334   : > { %904 = vst.msk [vmem:[#allocation5] sm:$0x3] %vm856_vm9, %v902_v14  ;;  %905 = vst.msk [vmem:[#allocation5 + $0x2] sm:$0x3] %vm856_vm9, %v903_v15 }
 0x335 PF: > { %v2102_v16 = vld [vmem:[%s2379_s24 + $0x18] sm:$0xff]   ;;  %v2219_v17 = vmov 0.0   ;;  %v2103_v18 = vld [vmem:[%s2379_s24 + $0x8] sm:$0xff]   ;;  %v926_v19 = vlaneseq  ;;  %v2104_v20 = vld [vmem:[%s2379_s24 + $0x10] sm:$0xff]   ;;  %vm2220_vm10 = vmmov 0   ;;  %v934_v28 = vcombine.low %v2434_v62, %v2436_v63 }
 0x336   : > { %1974 = vmatprep.subr.bf16.mxu0 %v2219_v17  ;;  %1982 = vmatprep.subr.bf16.mxu1 %v2219_v17  ;;  %v2105_v21 = vld [vmem:[%s2379_s24] sm:$0xff]   ;;  %v2221_v24 = vmov 1983009808   ;;  %vm956_vm11 = vcmask 261120   ;;  %v2106_v36 = vld [vmem:[%s2379_s24 + $0x28] sm:$0xff]  }
 0x337   : > { %1975 = vmatpush3.bf16.msra.mxu0 %v2102_v16  ;;  %1978 = vmatprep.mubr.msk.bf16.mxu0 %vm2220_vm10, %v2219_v17  ;;  %v924_v25 = vunpack.c.l.s4 %v2221_v24  ;;  %v927_v26 = vshrl.u32 %v926_v19, 7  ;;  %v2107_v40 = vld [vmem:[%s2379_s24 + $0x20] sm:$0xff]  }
 0x338   : > { %1983 = vmatpush3.bf16.msra.mxu1 %v2103_v18  ;;  %1976 = vmatprep.subr.bf16.mxu0 %v2219_v17  ;;  %v1883_v54 = vld [vmem:[%s2390_s17] ss:$0 sm:$0xff] }
 0x339   : > { %1984 = vmatprep.subr.bf16.mxu1 %v2219_v17  ;;  %1986 = vmatprep.mubr.msk.bf16.mxu1 %vm2220_vm10, %v2219_v17  ;;  %v925_v27 = vunpack.c.0.s8 %v924_v25  ;;  %v1884_v19 = vld [vmem:[%s2395_s21] ss:$0 sm:$0xff] }
 0x33a   : > { %v918_v22 = vld [vmem:[#allocation4] sm:$0x3]  ;;  %v919_v23 = vld [vmem:[#allocation4 + $0x2] sm:$0x3] }
 0x33b   : > { %1977 = vmatpush3.bf16.msra.mxu0 %v2104_v20  ;;  %v922_v29 = vcombine.low %v918_v22, %v919_v23  ;;  %v1055_v30 = vld [vmem:[#allocation5] sm:$0x3]  ;;  %v1056_v31 = vld [vmem:[#allocation5 + $0x2] sm:$0x3]  ;;  %v2484_v32 = vsub.s32 %v925_v27, %v927_v26 }
 0x33c   : > { %1985 = vmatpush3.bf16.msra.mxu1 %v2105_v21  ;;  %1990 = vmatprep.subr.bf16.mxu0 %v2219_v17  ;;  %v1059_v35 = vcombine.low %v1055_v30, %v1056_v31  ;;  %v1885_v21 = vld [vmem:[%s2400_s18] ss:$0 sm:$0xff] }
 0x33d   : > { %v941_v33 = vrot.slane %v934_v28, %v2484_v32  ;;  %v929_v34 = vrot.slane %v922_v29, %v2484_v32 }
 0x33e   : > { %v1066_v39 = vrot.slane %v1059_v35, %v2484_v32 }
 0x33f   : > { %v943_v37 = vpack.c.bf16 %v941_v33, %v941_v33  ;;  %v931_v38 = vpack.c.bf16 %v929_v34, %v929_v34 }
 0x340   : > { %v1068_v41 = vpack.c.bf16 %v1066_v39, %v1066_v39 }
 0x341   : > { %1979 = vmatmul.mubr.msk.bf16.vlgmr.msra.gmra.mxu0 %vm956_vm11, %v943_v37  ;;  %1987 = vmatmul.mubr.msk.bf16.vlgmr.msra.gmra.mxu1 %vm956_vm11, %v931_v38 }
 0x342   : > { %1991 = vmatpush3.bf16.msra.mxu0 %v2106_v36  ;;  %1994 = vmatprep.mubr.msk.bf16.mxu0 %vm2220_vm10, %v2219_v17 }
 0x343   : > { %1992 = vmatprep.subr.bf16.mxu0 %v2219_v17 }
 0x346   : > { %1993 = vmatpush3.bf16.msra.mxu0 %v2107_v40 }
 0x349   : > { %1995 = vmatmul.mubr.msk.bf16.vlgmr.msra.gmra.mxu0 %vm956_vm11, %v1068_v41 }
 0x401   : > { %v994_v42 = vpop.f32.mrf.mxu0  ;;  %v1049_v43 = vpop.f32.mrf.mxu1 }
 0x402   : > { %v1050_v50 = vadd.f32 %v1049_v43, %v994_v42 }
 0x403   : > { %v1980_v44 = vpop.f32.mrf.mxu0  ;;  %v1988_v45 = vpop.f32.mrf.mxu1 }
 0x405   : > { %v997_v46 = vpop.f32.mrf.mxu0  ;;  %v1052_v47 = vpop.f32.mrf.mxu1 }
 0x407   : > { %v1981_v48 = vpop.f32.mrf.mxu0  ;;  %v1989_v49 = vpop.f32.mrf.mxu1 }
 0x409   : > { %v1118_v51 = vpop.f32.mrf.mxu0 }
 0x40a   : > { %v1124_v52 = vadd.f32 %v1118_v51, %v1050_v50 }
 0x40b   : > { %v1996_v53 = vpop.f32.mrf.mxu0 }
 0x40c   : > { %v1132_v55 = vrot.slane %v1124_v52, %v2484_v32 }
 0x40d   : > { %v1121_v56 = vpop.f32.mrf.mxu0 }
 0x40e   : > { %v1143_v57 = vadd.f32 %v1883_v54, %v1132_v55  ;;  %v1133_v58 = vcombine.high %v1132_v55, %v1132_v55 }
 0x40f   : > { %v1997_v59 = vpop.f32.mrf.mxu0 }
 0x410   : > { %v1147_v60 = vsel %vm856_vm9, %v1143_v57, 0.0  ;;  %v1144_v61 = vadd.f32 %v1883_v54, %v1133_v58 }
 0x411   : > { %1148 = vadd.xlane.f32.xlu0 %v1147_v60 }
 0x412   : > { %v1150_v0 = vsel %vm856_vm9, %v1144_v61, 0.0 }
 0x415   : > { %1151 = vadd.xlane.f32.xlu0 %v1150_v0 }
 0x49a   : > { %v1149_v1 = vpop.xlane.xlu0 %1148 }
 0x49b   : > { %v1154_v2 = vmul.f32 0.03125, %v1149_v1 }
 0x49d   : > { %v1156_v3 = vsub.f32 %v1143_v57, %v1154_v2 }
 0x49e   : > { %v1152_v4 = vpop.xlane.xlu0 %1151 }
 0x49f   : > { %v1155_v5 = vmul.f32 0.03125, %v1152_v4  ;;  %v1158_v6 = vmul.f32 %v1156_v3, %v1156_v3 }
 0x4a1   : > { %v1157_v7 = vsub.f32 %v1144_v61, %v1155_v5  ;;  %v1160_v8 = vsel %vm856_vm9, %v1158_v6, 0.0 }
 0x4a2   : > { %1161 = vadd.xlane.f32.xlu1 %v1160_v8 }
 0x4a3   : > { %v1159_v9 = vmul.f32 %v1157_v7, %v1157_v7 }
 0x4a5   : > { %v1163_v10 = vsel %vm856_vm9, %v1159_v9, 0.0 }
 0x4a6   : > { %1164 = vadd.xlane.f32.xlu1 %v1163_v10 }
 0x52b   : > { %v1162_v11 = vpop.xlane.xlu1 %1161 }
 0x52c   : > { %v1166_v12 = vmul.f32 0.03125, %v1162_v11 }
 0x52e   : > { %v1168_v13 = vadd.f32 1e-05, %v1166_v12 }
 0x52f   : > { %v1165_v14 = vpop.xlane.xlu1 %1164 }
 0x530   : > { %2108 = vrsqrt.f32 %v1168_v13  ;;  %v1167_v15 = vmul.f32 0.03125, %v1165_v14 }
 0x532   : > { %v1169_v16 = vadd.f32 1e-05, %v1167_v15 }
 0x534   : > { %2110 = vrsqrt.f32 %v1169_v16 }
 0x53d   : > { %v2109_v18 = vpop.eup %2108 }
 0x53e   : > { %v1172_v20 = vmul.f32 %v2109_v18, %v1156_v3 }
 0x540   : > { %v1180_v22 = vmul.f32 %v1884_v19, %v1172_v20 }
 0x541   : > { %v2111_v23 = vpop.eup %2110 }
 0x542   : > { %v1188_v24 = vadd.f32 %v1885_v21, %v1180_v22  ;;  %v1173_v25 = vmul.f32 %v2111_v23, %v1157_v7 }
 0x544   : > { %vm1190_vm12 = vcmp.gt.f32.partialorder %v1188_v24, 0.0  ;;  %v1192_v26 = vmul.f32 0.2, %v1188_v24  ;;  %v1181_v27 = vmul.f32 %v1884_v19, %v1173_v25 }
 0x546   : > { %v1194_v28 = vsel %vm1190_vm12, %v1188_v24, %v1192_v26  ;;  %v1189_v29 = vadd.f32 %v1885_v21, %v1181_v27 }
 0x547   : > { %1196 = vst.msk [vmem:[#allocation3 + $0x8] sm:$0x3] %vm856_vm9, %v1194_v28  ;;  %1200 = sbr.rel (%p1863_p7) target bundleno = 1364 (0x554), region = 112 }
 0x548   : > { %vm1191_vm13 = vcmp.gt.f32.partialorder %v1189_v29, 0.0  ;;  %v1193_v30 = vmul.f32 0.2, %v1189_v29 }
 0x54a   : > { %v1195_v31 = vsel %vm1191_vm13, %v1189_v29, %v1193_v30 }
 0x54b   : > { %1197 = vst.msk [vmem:[#allocation3 + $0x20] sm:$0x3] %vm856_vm9, %v1195_v31 }
 0x54e   : > { %v1201_v33 = vld [vmem:[#allocation3 + $0x7] sm:$0x3]  ;;  %v1205_v35 = vld [vmem:[#allocation3 + $0x9] sm:$0x3] }
 0x54f   : > { %1203 = vst.msk [vmem:[#allocation4] sm:$0x3] %vm856_vm9, %v1201_v33  ;;  %1207 = vst.msk [vmem:[#allocation5] sm:$0x3] %vm856_vm9, %v1205_v35 }
 0x552   : > { %v1202_v34 = vld [vmem:[#allocation3 + $0x1f] sm:$0x3]  ;;  %v1206_v36 = vld [vmem:[#allocation3 + $0x21] sm:$0x3] }
 0x553   : > { %1204 = vst.msk [vmem:[#allocation4 + $0x2] sm:$0x3] %vm856_vm9, %v1202_v34  ;;  %1208 = vst.msk [vmem:[#allocation5 + $0x2] sm:$0x3] %vm856_vm9, %v1206_v36 }
 0x554 PF: > { %1211 = sbr.rel (%p1871_p9) target bundleno = 1372 (0x55c), region = 116 }
 0x559   : > { %v1212_v37 = vld [vmem:[#allocation3 + $0x6] sm:$0x3]  ;;  %v1213_v38 = vld [vmem:[#allocation3 + $0x1e] sm:$0x3]  ;;  %v1216_v39 = vld [vmem:[#allocation3 + $0xa] sm:$0x3] }
 0x55a   : > { %1214 = vst.msk [vmem:[#allocation4] sm:$0x3] %vm856_vm9, %v1212_v37  ;;  %1215 = vst.msk [vmem:[#allocation4 + $0x2] sm:$0x3] %vm856_vm9, %v1213_v38  ;;  %v1217_v40 = vld [vmem:[#allocation3 + $0x22] sm:$0x3] }
 0x55b   : > { %1218 = vst.msk [vmem:[#allocation5] sm:$0x3] %vm856_vm9, %v1216_v39  ;;  %1219 = vst.msk [vmem:[#allocation5 + $0x2] sm:$0x3] %vm856_vm9, %v1217_v40 }
 0x55c PF: > { %1222 = sbr.rel (%p1872_p10) target bundleno = 1380 (0x564), region = 120 }
 0x561   : > { %v1223_v41 = vld [vmem:[#allocation3 + $0x4] sm:$0x3]  ;;  %v1224_v42 = vld [vmem:[#allocation3 + $0x1c] sm:$0x3]  ;;  %v1227_v43 = vld [vmem:[#allocation3 + $0xc] sm:$0x3] }
 0x562   : > { %1225 = vst.msk [vmem:[#allocation4] sm:$0x3] %vm856_vm9, %v1223_v41  ;;  %1226 = vst.msk [vmem:[#allocation4 + $0x2] sm:$0x3] %vm856_vm9, %v1224_v42  ;;  %v1228_v44 = vld [vmem:[#allocation3 + $0x24] sm:$0x3] }
 0x563   : > { %1229 = vst.msk [vmem:[#allocation5] sm:$0x3] %vm856_vm9, %v1227_v43  ;;  %1230 = vst.msk [vmem:[#allocation5 + $0x2] sm:$0x3] %vm856_vm9, %v1228_v44 }
 0x564 PF: > { %1233 = sbr.rel (%p1873_p11) target bundleno = 1388 (0x56c), region = 124 }
 0x569   : > { %v1234_v45 = vld [vmem:[#allocation3] sm:$0x3]  ;;  %v1235_v46 = vld [vmem:[#allocation3 + $0x18] sm:$0x3]  ;;  %v1238_v47 = vld [vmem:[#allocation3 + $0x10] sm:$0x3] }
 0x56a   : > { %1236 = vst.msk [vmem:[#allocation4] sm:$0x3] %vm856_vm9, %v1234_v45  ;;  %1237 = vst.msk [vmem:[#allocation4 + $0x2] sm:$0x3] %vm856_vm9, %v1235_v46  ;;  %v1239_v48 = vld [vmem:[#allocation3 + $0x28] sm:$0x3] }
 0x56b   : > { %1240 = vst.msk [vmem:[#allocation5] sm:$0x3] %vm856_vm9, %v1238_v47  ;;  %1241 = vst.msk [vmem:[#allocation5 + $0x2] sm:$0x3] %vm856_vm9, %v1239_v48 }
 0x56c PF: > { %1998 = vmatprep.subr.bf16.mxu1 %v2219_v17  ;;  %v2112_v49 = vld [vmem:[%s2379_s24 + $0x48] sm:$0xff]   ;;  %2006 = vmatprep.subr.bf16.mxu0 %v2219_v17  ;;  %v1271_v50 = vcombine.low %v1194_v28, %v1195_v31  ;;  %v2113_v51 = vld [vmem:[%s2379_s24 + $0x38] sm:$0xff]   ;;  %v2114_v52 = vld [vmem:[%s2379_s24 + $0x40] sm:$0xff]   ;;  %s2654_s14 = sld [smem:[#allocation14_spill]] (!%p1873_p11) }
 0x56d   : > { %2002 = vmatprep.mubr.msk.bf16.mxu1 %vm2220_vm10, %v2219_v17  ;;  %2010 = vmatprep.mubr.msk.bf16.mxu0 %vm2220_vm10, %v2219_v17  ;;  %v2115_v54 = vld [vmem:[%s2379_s24 + $0x30] sm:$0xff]   ;;  %v2116_v59 = vld [vmem:[%s2379_s24 + $0x58] sm:$0xff]   ;;  %v1912_v19 = vld [vmem:[%s2390_s17 + $0x1] ss:$0 sm:$0xff]  ;;  %s2655_s0 = sld [smem:[#allocation15_spill]] (!%p1873_p11) }
 0x56e   : > { %1999 = vmatpush3.bf16.msra.mxu1 %v2112_v49  ;;  %v1278_v53 = vrot.slane %v1271_v50, %v2484_v32  ;;  %2007 = vmatpush3.bf16.msra.mxu0 %v2113_v51  ;;  %v2117_v3 = vld [vmem:[%s2379_s24 + $0x50] sm:$0xff]   ;;  %v1915_v44 = vld [vmem:[%s2395_s21 + $0x1] ss:$0 sm:$0xff] }
 0x56f   : > { %2000 = vmatprep.subr.bf16.mxu1 %v2219_v17  ;;  %2008 = vmatprep.subr.bf16.mxu0 %v2219_v17  ;;  %v1916_v46 = vld [vmem:[%s2400_s18 + $0x1] ss:$0 sm:$0xff] }
 0x570   : > { %v1280_v57 = vpack.c.bf16 %v1278_v53, %v1278_v53 }
 0x571   : > { %v1255_v55 = vld [vmem:[#allocation4] sm:$0x3]  ;;  %v1256_v56 = vld [vmem:[#allocation4 + $0x2] sm:$0x3] }
 0x572   : > { %v1259_v58 = vcombine.low %v1255_v55, %v1256_v56  ;;  %2001 = vmatpush3.bf16.msra.mxu1 %v2114_v52  ;;  %v1391_v60 = vld [vmem:[#allocation5] sm:$0x3]  ;;  %2009 = vmatpush3.bf16.msra.mxu0 %v2115_v54  ;;  %v1392_v0 = vld [vmem:[#allocation5 + $0x2] sm:$0x3] }
 0x573   : > { %2014 = vmatprep.subr.bf16.mxu1 %v2219_v17  ;;  %v1395_v1 = vcombine.low %v1391_v60, %v1392_v0 }
 0x574   : > { %v1266_v61 = vrot.slane %v1259_v58, %v2484_v32 }
 0x575   : > { %2003 = vmatmul.mubr.msk.bf16.vlgmr.msra.gmra.mxu1 %vm956_vm11, %v1280_v57  ;;  %v1402_v4 = vrot.slane %v1395_v1, %v2484_v32 }
 0x576   : > { %v1268_v2 = vpack.c.bf16 %v1266_v61, %v1266_v61  ;;  %2015 = vmatpush3.bf16.msra.mxu1 %v2116_v59  ;;  %2018 = vmatprep.mubr.msk.bf16.mxu1 %vm2220_vm10, %v2219_v17 }
 0x577   : > { %2016 = vmatprep.subr.bf16.mxu1 %v2219_v17  ;;  %v1404_v5 = vpack.c.bf16 %v1402_v4, %v1402_v4 }
 0x578   : > { %2011 = vmatmul.mubr.msk.bf16.vlgmr.msra.gmra.mxu0 %vm956_vm11, %v1268_v2 }
 0x57a   : > { %2017 = vmatpush3.bf16.msra.mxu1 %v2117_v3 }
 0x57d   : > { %2019 = vmatmul.mubr.msk.bf16.vlgmr.msra.gmra.mxu1 %vm956_vm11, %v1404_v5 }
 0x635   : > { %v1330_v6 = vpop.f32.mrf.mxu1 }
 0x637   : > { %v2004_v8 = vpop.f32.mrf.mxu1 }
 0x638   : > { %v1385_v7 = vpop.f32.mrf.mxu0 }
 0x639   : > { %v1333_v10 = vpop.f32.mrf.mxu1  ;;  %v1386_v13 = vadd.f32 %v1385_v7, %v1330_v6 }
 0x63a   : > { %v2012_v9 = vpop.f32.mrf.mxu0 }
 0x63b   : > { %v2005_v12 = vpop.f32.mrf.mxu1 }
 0x63c   : > { %v1388_v11 = vpop.f32.mrf.mxu0 }
 0x63d   : > { %v1454_v15 = vpop.f32.mrf.mxu1 }
 0x63e   : > { %v2013_v14 = vpop.f32.mrf.mxu0  ;;  %v1460_v16 = vadd.f32 %v1454_v15, %v1386_v13 }
 0x63f   : > { %v2020_v18 = vpop.f32.mrf.mxu1 }
 0x640   : > { %v1468_v17 = vrot.slane %v1460_v16, %v2484_v32 }
 0x641   : > { %v1457_v20 = vpop.f32.mrf.mxu1 }
 0x642   : > { %v1469_v21 = vcombine.high %v1468_v17, %v1468_v17  ;;  %v1480_v22 = vadd.f32 %v1912_v19, %v1468_v17 }
 0x643   : > { %v2021_v23 = vpop.f32.mrf.mxu1 }
 0x644   : > { %v1486_v24 = vsel %vm856_vm9, %v1480_v22, 0.0  ;;  %v1481_v25 = vadd.f32 %v1912_v19, %v1469_v21 }
 0x645   : > { %1487 = vadd.xlane.f32.xlu0 %v1486_v24 }
 0x646   : > { %v1489_v26 = vsel %vm856_vm9, %v1481_v25, 0.0 }
 0x649   : > { %1490 = vadd.xlane.f32.xlu0 %v1489_v26 }
 0x6ce   : > { %v1488_v27 = vpop.xlane.xlu0 %1487 }
 0x6cf   : > { %v1492_v28 = vmul.f32 0.03125, %v1488_v27 }
 0x6d1   : > { %v1494_v29 = vsub.f32 %v1480_v22, %v1492_v28 }
 0x6d2   : > { %v1491_v30 = vpop.xlane.xlu0 %1490 }
 0x6d3   : > { %v1493_v31 = vmul.f32 0.03125, %v1491_v30  ;;  %v1496_v33 = vmul.f32 %v1494_v29, %v1494_v29 }
 0x6d5   : > { %v1495_v34 = vsub.f32 %v1481_v25, %v1493_v31  ;;  %v1498_v32 = vsel %vm856_vm9, %v1496_v33, 0.0 }
 0x6d6   : > { %1499 = vadd.xlane.f32.xlu1 %v1498_v32 }
 0x6d7   : > { %v1497_v35 = vmul.f32 %v1495_v34, %v1495_v34 }
 0x6d9   : > { %v1501_v36 = vsel %vm856_vm9, %v1497_v35, 0.0 }
 0x6da   : > { %1502 = vadd.xlane.f32.xlu1 %v1501_v36 }
 0x75f   : > { %v1500_v37 = vpop.xlane.xlu1 %1499 }
 0x760   : > { %v1504_v38 = vmul.f32 0.03125, %v1500_v37 }
 0x762   : > { %v1506_v39 = vadd.f32 1e-05, %v1504_v38 }
 0x763   : > { %v1503_v40 = vpop.xlane.xlu1 %1502 }
 0x764   : > { %2118 = vrsqrt.f32 %v1506_v39  ;;  %v1505_v41 = vmul.f32 0.03125, %v1503_v40 }
 0x766   : > { %v1507_v42 = vadd.f32 1e-05, %v1505_v41 }
 0x768   : > { %2120 = vrsqrt.f32 %v1507_v42 }
 0x771   : > { %v2119_v43 = vpop.eup %2118 }
 0x772   : > { %v1510_v45 = vmul.f32 %v2119_v43, %v1494_v29 }
 0x774   : > { %v1518_v47 = vmul.f32 %v1915_v44, %v1510_v45 }
 0x775   : > { %v2121_v48 = vpop.eup %2120 }
 0x776   : > { %v1526_v49 = vadd.f32 %v1916_v46, %v1518_v47  ;;  %v1511_v50 = vmul.f32 %v2121_v48, %v1495_v34 }
 0x778   : > { %v1528_v51 = vadd.f32 %v1526_v49, %v2434_v62  ;;  %v1519_v52 = vmul.f32 %v1915_v44, %v1511_v50 }
 0x77a   : > { %vm1530_vm14 = vcmp.gt.f32.partialorder %v1528_v51, 0.0  ;;  %v1532_v53 = vmul.f32 0.2, %v1528_v51  ;;  %v1527_v54 = vadd.f32 %v1916_v46, %v1519_v52 }
 0x77c   : > { %v2564_v55 = vsel %vm1530_vm14, %v1528_v51, %v1532_v53  ;;  %v1529_v56 = vadd.f32 %v1527_v54, %v2436_v63 }
 0x77d   : > { %1536 = vst.msk [vmem:[#allocation2] sm:$0x3] %vm856_vm9, %v2564_v55  ;;  %1540 = sbr.rel (%p1873_p11) target bundleno = 2742 (0xab6), region = 128 }
 0x77e   : > { %vm1531_vm15 = vcmp.gt.f32.partialorder %v1529_v56, 0.0  ;;  %v1533_v57 = vmul.f32 0.2, %v1529_v56 }
 0x780   : > { %v2569_v58 = vsel %vm1531_vm15, %v1529_v56, %v1533_v57 }
 0x781   : > { %1537 = vst.msk [vmem:[#allocation2 + $0x2] sm:$0x3] %vm856_vm9, %v2569_v58 }
 0x782   : > { %v1918_v62 = vld [vmem:[%s2635_s10] ss:$0 sm:$0xff]  ;;  %v2222_v0 = vmov 0   ;;  %v1919_v1 = vld [vmem:[#allocation6] ss:$0 sm:$0xff]  ;;  %vm1565_vm0 = vcmask 1024  }
 0x783   : > { %v1548_v59 = vmul.f32 %v1918_v62, %v2564_v55  ;;  %v1549_v63 = vmul.f32 %v1918_v62, %v2569_v58  ;;  %2122 = vset.pattern.permute.xlu1 %v2222_v0  ;;  %2123 = vset.pattern.permute.xlu0 %v2222_v0  ;;  %v2124_v44 = vld [vmem:[%s2637_s12 + $0x8] sm:$0xff]   ;;  %v2223_v45 = vmov 0.0   ;;  %v2125_v46 = vld [vmem:[%s2637_s12] sm:$0xff]   ;;  %vm2224_vm1 = vmmov 0  }
 0x784   : > { %2022 = vmatprep.subr.bf16.mxu0 %v2223_v45  ;;  %2026 = vmatprep.mubr.msk.bf16.mxu0 %vm2224_vm1, %v2223_v45  ;;  %vm1647_vm2 = vcmask 1041409  }
 0x785   : > { %v1550_v60 = vsel %vm856_vm9, %v1548_v59, 0.0  ;;  %v1553_v61 = vsel %vm856_vm9, %v1549_v63, 0.0  ;;  %2023 = vmatpush3.bf16.msra.mxu0 %v2124_v44 }
 0x786   : > { %1551 = vadd.xlane.f32.xlu0 %v1550_v60  ;;  %2024 = vmatprep.subr.bf16.mxu0 %v2223_v45 }
 0x789   : > { %2025 = vmatpush3.bf16.msra.mxu0 %v2125_v46 }
 0x78a   : > { %1554 = vadd.xlane.f32.xlu0 %v1553_v61 }
 0x80f   : > { %v1552_v2 = vpop.xlane.xlu0 %1551 }
 0x810   : > { %v1563_v3 = vadd.f32 %v1919_v1, %v1552_v2 }
 0x812   : > { %v1566_v4 = vsel %vm1565_vm0, %v1563_v3, -inf }
 0x813   : > { %v1567_v5 = vrot.slane %v1566_v4, 4  ;;  %v1555_v6 = vpop.xlane.xlu0 %1554 }
 0x814   : > { %v1564_v7 = vadd.f32 %v1919_v1, %v1555_v6 }
 0x815   : > { %v1568_v8 = vmax.f32 %v1566_v4, %v1567_v5 }
 0x816   : > { %v1573_v9 = vsel %vm1565_vm0, %v1564_v7, -inf }
 0x817   : > { %v1569_v10 = vrot.slane %v1568_v8, 2  ;;  %v1574_v11 = vrot.slane %v1573_v9, 4 }
 0x819   : > { %v1570_v12 = vmax.f32 %v1568_v8, %v1569_v10  ;;  %v1575_v13 = vmax.f32 %v1573_v9, %v1574_v11 }
 0x81b   : > { %v1571_v14 = vrot.slane %v1570_v12, 1  ;;  %v1576_v15 = vrot.slane %v1575_v13, 2 }
 0x81d   : > { %v1572_v16 = vmax.f32 %v1570_v12, %v1571_v14  ;;  %v1577_v18 = vmax.f32 %v1575_v13, %v1576_v15  ;;  %v1924_v12 = vld [vmem:[%s2654_s14] ss:$0 sm:$0xff] }
 0x81f   : > { %v1580_v19 = vsub.f32 %v1563_v3, %v1572_v16  ;;  %v1578_v17 = vrot.slane %v1577_v18, 1 }
 0x821   : > { %v1582_v20 = vmul.f32 1.442695, %v1580_v19  ;;  %v1579_v21 = vmax.f32 %v1577_v18, %v1578_v17  ;;  %v1925_v19 = vld [vmem:[#allocation7] ss:$0 sm:$0xff] }
 0x823   : > { %2126 = vpow2.f32 %v1582_v20  ;;  %v1581_v22 = vsub.f32 %v1564_v7, %v1579_v21  ;;  %v1920_v7 = vld [vmem:[%s2638_s13] ss:$0 sm:$0xff] }
 0x825   : > { %v1584_v23 = vmul.f32 1.442695, %v1581_v22 }
 0x827   : > { %2128 = vpow2.f32 %v1584_v23 }
 0x830   : > { %v2127_v24 = vpop.eup %2126 }
 0x831   : > { %v1586_v25 = vsel %vm1565_vm0, %v2127_v24, 0.0 }
 0x832   : > { %v1587_v26 = vrot.slane %v1586_v25, 4 }
 0x834   : > { %v2129_v27 = vpop.eup %2128  ;;  %v1588_v28 = vadd.f32 %v1587_v26, %v1586_v25 }
 0x835   : > { %v1593_v29 = vsel %vm1565_vm0, %v2129_v27, 0.0 }
 0x836   : > { %v1589_v30 = vrot.slane %v1588_v28, 2  ;;  %v1594_v31 = vrot.slane %v1593_v29, 4 }
 0x838   : > { %v1590_v33 = vadd.f32 %v1589_v30, %v1588_v28  ;;  %v1595_v34 = vadd.f32 %v1594_v31, %v1593_v29 }
 0x83a   : > { %v1591_v32 = vrot.slane %v1590_v33, 1  ;;  %v1596_v35 = vrot.slane %v1595_v34, 2 }
 0x83c   : > { %v1592_v36 = vadd.f32 %v1591_v32, %v1590_v33  ;;  %v1597_v37 = vadd.f32 %v1596_v35, %v1595_v34 }
 0x83e   : > { %2130 = vrcp.f32 %v1592_v36  ;;  %v1598_v38 = vrot.slane %v1597_v37, 1 }
 0x840   : > { %v1599_v39 = vadd.f32 %v1598_v38, %v1597_v37 }
 0x842   : > { %2132 = vrcp.f32 %v1599_v39 }
 0x84b   : > { %v2131_v40 = vpop.eup %2130 }
 0x84c   : > { %v1602_v41 = vmul.f32 %v2131_v40, %v2127_v24 }
 0x84e   : > { %1606 = vperm.xlu1 %2122, %v1602_v41  }
 0x84f   : > { %v2133_v42 = vpop.eup %2132 }
 0x850   : > { %v1603_v43 = vmul.f32 %v2133_v42, %v2129_v27 }
 0x852   : > { %1611 = vperm.xlu1 %2122, %v1603_v43  }
 0x8c9   : > { %v1607_v47 = vpop.permute.xlu1 %1606 }
 0x8ca   : > { %v1614_v48 = vmul.f32 %v1607_v47, %v2564_v55 }
 0x8cc   : > { %v1616_v49 = vsel %vm856_vm9, %v1614_v48, 0.0 }
 0x8cd   : > { %v1617_v50 = vrot.slane %v1616_v49, 4  ;;  %v1612_v51 = vpop.permute.xlu1 %1611 }
 0x8ce   : > { %v1615_v52 = vmul.f32 %v1612_v51, %v2569_v58 }
 0x8cf   : > { %v1618_v53 = vadd.f32 %v1617_v50, %v1616_v49 }
 0x8d0   : > { %v1623_v54 = vsel %vm856_vm9, %v1615_v52, 0.0 }
 0x8d1   : > { %v1619_v56 = vrot.slane %v1618_v53, 2  ;;  %v1624_v57 = vrot.slane %v1623_v54, 4 }
 0x8d3   : > { %v1620_v62 = vadd.f32 %v1619_v56, %v1618_v53  ;;  %v1625_v59 = vadd.f32 %v1624_v57, %v1623_v54 }
 0x8d5   : > { %v1621_v63 = vrot.slane %v1620_v62, 1  ;;  %v1626_v60 = vrot.slane %v1625_v59, 2 }
 0x8d7   : > { %v1622_v61 = vadd.f32 %v1621_v63, %v1620_v62  ;;  %v1627_v0 = vadd.f32 %v1626_v60, %v1625_v59 }
 0x8d9   : > { %v1628_v1 = vrot.slane %v1627_v0, 1  ;;  %v1634_v2 = vpack.c.bf16 %v1622_v61, %v1622_v61 }
 0x8db   : > { %v1629_v55 = vadd.f32 %v1628_v1, %v1627_v0  ;;  %v1645_v4 = vunpack.c.l.b16 %v1634_v2 }
 0x8dd   : > { %v1635_v3 = vpack.c.bf16 %v1629_v55, %v1629_v55 }
 0x8df   : > { %v1646_v5 = vunpack.c.l.b16 %v1635_v3 }
 0x8e1   : > { %v1648_v6 = vsel %vm1647_vm2, %v1646_v5, %v1645_v4 }
 0x8e2   : > { %v1649_v58 = vpack.c.b16 %v1648_v6, %v1648_v6 }
 0x8e4   : > { %2027 = vmatmul.mubr.msk.bf16.vlgmr.msra.gmra.mxu0 %vm956_vm11, %v1649_v58 }
 0x9a4   : > { %v1699_v8 = vpop.f32.mrf.mxu0 }
 0x9a5   : > { %v1700_v9 = vadd.f32 %v1920_v7, %v1699_v8 }
 0x9a6   : > { %v2028_v10 = vpop.f32.mrf.mxu0 }
 0x9a7   : > { %v1706_v11 = vmul.f32 0.2, %v1700_v9  ;;  %vm1705_vm3 = vcmp.gt.f32.partialorder %v1700_v9, 0.0 }
 0x9a8   : > { %v1702_v13 = vpop.f32.mrf.mxu0 }
 0x9a9   : > { %v1707_v14 = vsel %vm1705_vm3, %v1700_v9, %v1706_v11 }
 0x9aa   : > { %v2029_v15 = vpop.f32.mrf.mxu0  ;;  %v1715_v16 = vmul.f32 %v1924_v12, %v1707_v14 }
 0x9ac   : > { %v1716_v18 = vsel %vm856_vm9, %v1715_v16, 0.0 }
 0x9ad   : > { %1717 = vadd.xlane.f32.xlu0 %v1716_v18 }
 0xa36   : > { %v1718_v17 = vpop.xlane.xlu0 %1717 }
 0xa37   : > { %v1726_v20 = vadd.f32 %v1925_v19, %v1718_v17 }
 0xa39   : > { %1729 = vperm.xlu1 %2122, %v1726_v20  }
 0xab4   : > { %v1730_v21 = vpop.permute.xlu1 %1729 }
 0xab5   : > { %1732 = vst [vmem:[%s2655_s0] sm:$0x3] %v1730_v21 }
 0xab6 PF: > { %s33_s30 = sadd.s32 1, %s2212_s30   ;;  %s2656_s28 = sld [smem:[#allocation11_spill]] }
 0xab7   : > { %p30_p12 = scmp.ge.s32.totalorder %s33_s30, 6   ;;  %s2657_s29 = sld [smem:[#allocation12_spill]] }
 0xab8   : > { %s2658_s25 = smov %s2196_s26  ;;  %s2659_s26 = smov %s2200_s27 }
 0xab9   : > { %s2660_s27 = smov %s2361_s19  ;;  %32 = sbr.rel (!%p30_p12) target bundleno = 8 (0x8), region = 181 }
 0xabe   :  { %1752 = vsyncpa [#allocation9], 1 }
 0xabf   :  { %1754 = vsyncpa [#allocation9 + $0x1], 1 }

// kernel: _lambda_.4
= control target key start
LH: loop header
LB: loop body
LE: loop exit
PB: predicated region body
PF: predicated region fallthrough
CT: control target
= control target key end

     0   :  { %s2136_s25 = smov 0   ;;  %s2138_s26 = smov 0   ;;  %s2381_s0 = inlined_call_operand.vmem [shape: f32[2,8,4], index: 0, kind: input, shape index: {}]   ;;  %s2382_s1 = inlined_call_operand.vmem [shape: bf16[4,8], index: 1, kind: input, shape index: {}]   ;;  %s2383_s2 = inlined_call_operand.vmem [shape: bf16[4,32], index: 2, kind: input, shape index: {}]   ;;  %s2384_s3 = inlined_call_operand.vmem [shape: f32[1,32], index: 3, kind: input, shape index: {}, may-alias: {3,5,13}]   ;;  %s2385_s4 = inlined_call_operand.vmem [shape: f32[1,32], index: 4, kind: input, shape index: {}]   ;;  %s2386_s5 = inlined_call_operand.vmem [shape: f32[1,32], index: 5, kind: input, shape index: {}, may-alias: {3,5,13}]   ;;  %s2387_s6 = inlined_call_operand.vmem [shape: bf16[4,2,96,32], index: 6, kind: input, shape index: {}]   ;;  %s2388_s7 = inlined_call_operand.vmem [shape: f32[4,2,1,32], index: 7, kind: input, shape index: {}]   ;;  %s2389_s8 = inlined_call_operand.vmem [shape: f32[4,2,1,32], index: 8, kind: input, shape index: {}]   ;;  %s2390_s9 = inlined_call_operand.vmem [shape: f32[4,2,1,32], index: 9, kind: input, shape index: {}]   ;;  %s2391_s10 = inlined_call_operand.vmem [shape: f32[1,32], index: 10, kind: input, shape index: {}]   ;;  %s2392_s11 = inlined_call_operand.<no memory space> [shape: f32[1,1], index: 11, kind: input, shape index: {}, may-alias: {11,15}]   ;;  %s2393_s12 = inlined_call_operand.vmem [shape: bf16[32,32], index: 12, kind: input, shape index: {}]   ;;  %s2394_s13 = inlined_call_operand.vmem [shape: f32[1,32], index: 13, kind: input, shape index: {}, may-alias: {3,5,13}]   ;;  %s2395_s14 = inlined_call_operand.vmem [shape: f32[1,32], index: 14, kind: input, shape index: {}]   ;;  %s2396_s16 = inlined_call_operand.vmem [shape: f32[2,128], index: 16, kind: output, shape index: {}]   ;;  %s2397_s15 = inlined_call_operand.<no memory space> [shape: f32[1,1], index: 15, kind: input, shape index: {}, may-alias: {11,15}]  }
   0x1   :  { %2400 = sst [smem:[#allocation10_spill]] %s2381_s0  ;;  %v21_v0 = vstv %s2392_s11  ;;  %v23_v1 = vstv %s2397_s15  ;;  %s2140_s27 = smov 0  }
   0x2   :  { %22 = vst [vmem:[#allocation6] sm:$0x1] %v21_v0  ;;  %24 = vst [vmem:[#allocation7] sm:$0x1] %v23_v1 }
   0x3 LB: > { %2401 = sst [smem:[#allocation8_spill]] %s2032_s26  ;;  %s39_s11 = sadd.s32 1, %s2032_s26  ;;  %s2036_s27 = sphi %s2140_s27, %s30_s27   ;;  %s2032_s26 = sphi %s2138_s26, %s2405_s26   ;;  %s2028_s25 = sphi %s2136_s25, %s2404_s25  }
   0x4   : > { %p1770_p0 = scmp.ge.s32.totalorder %s2036_s27, 1  ;;  %p40_p1 = scmp.ge.s32.totalorder %s39_s11, 4 }
   0x5   : > { %p516_p2 = scmp.lt.s32.totalorder %s2036_s27, 5 }
   0x6   : > { %s2407_s11 = smov (%p40_p1, %s39_s11), 0 }
   0x7   : > { %2402 = sst [smem:[#allocation9_spill]] %s2407_s11  ;;  %p517_p3 = pnand %p1770_p0, %p516_p2 }
   0x8   : > { %p588_p4 = scmp.lt.s32.totalorder (!%p517_p3), %s2028_s25, 3  ;;  %p1775_p5 = scmp.ne.s32.totalorder (!%p517_p3), %s2028_s25, 0 }
   0x9   : > { %520 = sbr.rel (%p517_p3) target bundleno = 2709 (0xa95), region = 84 }
   0xe   : > { %s589_s15 = scalar_select %p588_p4, %s2028_s25, 3 }
   0xf   : > { %613 = sbr.rel (%p1775_p5) target bundleno = 746 (0x2ea), region = 88 }
  0x10   : > { %s1942_s28 = smul.u32 96, %s589_s15  ;;  %s1772_s29 = sshll.u32 %s589_s15, 1 }
  0x11   : > { %s2161_s17 = scalar_lea.vmem %s2388_s7, %s1772_s29  ;;  %s2166_s20 = scalar_lea.vmem %s2389_s8, %s1772_s29 }
  0x12   : > { %s2171_s23 = scalar_lea.vmem %s2387_s6, %s1942_s28  ;;  %s2176_s26 = scalar_lea.vmem %s2390_s9, %s1772_s29 }
  0x13   : > { %s2403_s29 = sld [smem:[#allocation10_spill]] (!%p1775_p5) }
  0x14   : > { %vm614_vm0 = vcmask 261120   ;;  %v621_v2 = vld [vmem:[%s2383_s2] sm:$0x3]  ;;  %vm627_vm1 = vcmask 1041408   ;;  %v2038_v3 = vmov 0.0   ;;  %vm2039_vm2 = vmmov 0  }
  0x15   : > { %615 = vst.msk [vmem:[#allocation3] sm:$0xff] %vm614_vm0, %v2038_v3  ;;  %616 = vst.msk [vmem:[#allocation3 + $0x18] sm:$0xff] %vm614_vm0, %v2038_v3  ;;  %1868 = vmatprep.subr.bf16.mxu0 %v2038_v3  ;;  %v629_v4 = vsel %vm627_vm1, %v621_v2, 0  ;;  %1870 = vmatprep.mubr.msk.bf16.mxu0 %vm2039_vm2, %v2038_v3  ;;  %vm623_vm3 = vcmask 31744   ;;  %vm679_vm4 = vcmask 1043456   ;;  %vm675_vm5 = vcmask 64512  }
  0x16   : > { %617 = vst.msk [vmem:[#allocation3 + $0xc] sm:$0xff] %vm614_vm0, %v2038_v3  ;;  %618 = vst.msk [vmem:[#allocation3 + $0x24] sm:$0xff] %vm614_vm0, %v2038_v3  ;;  %1869 = vmatpush3.bf16.msra.mxu0 %v629_v4  ;;  %1874 = vmatprep.subr.bf16.mxu1 %v2038_v3  ;;  %v672_v13 = vld [vmem:[%s2382_s1] sm:$0x3]  ;;  %vm723_vm6 = vcmask 257024  }
  0x17   : > { %1876 = vmatprep.mubr.msk.bf16.mxu1 %vm2039_vm2, %v2038_v3  ;;  %1880 = vmatprep.subr.bf16.mxu0 %v2038_v3  ;;  %v1779_v23 = vld [vmem:[%s2384_s3] ss:$0 sm:$0xff] }
  0x18   : > { %v1780_v49 = vld [vmem:[%s2385_s4] ss:$0 sm:$0xff] }
  0x19   : > { %v619_v5 = vld [vmem:[%s2403_s29] sm:$0xff]  ;;  %v620_v6 = vld [vmem:[%s2403_s29 + $0x8] sm:$0xff] }
  0x1a   : > { %v622_v7 = vpack.c.bf16 %v620_v6, %v619_v5  ;;  %v1781_v51 = vld [vmem:[%s2386_s5] ss:$0 sm:$0xff] }
  0x1c   : > { %1871 = vmatmul.mubr.msk.bf16.vlgmr.msra.gmra.mxu0 %vm623_vm3, %v622_v7 }
  0x1d   : > { %1882 = vmatprep.mubr.msk.bf16.mxu0 %vm2039_vm2, %v2038_v3 }
  0xdc   : > { %v665_v8 = vpop.f32.mrf.mxu0 }
  0xdd   : > { %v673_v9 = vpack.c.bf16 %v665_v8, %v665_v8 }
  0xde   : > { %v1872_v10 = vpop.f32.mrf.mxu0 }
  0xdf   : > { %v681_v11 = vsel %vm679_vm4, %v673_v9, 0 }
  0xe0   : > { %v668_v12 = vpop.f32.mrf.mxu0  ;;  %1875 = vmatpush3.bf16.msra.mxu1 %v681_v11 }
  0xe1   : > { %v674_v14 = vpack.c.bf16 %v668_v12, %v668_v12 }
  0xe2   : > { %v1873_v15 = vpop.f32.mrf.mxu0 }
  0xe3   : > { %v726_v16 = vsel %vm679_vm4, %v674_v14, 0  ;;  %1877 = vmatmul.mubr.msk.bf16.vlgmr.msra.gmra.mxu1 %vm675_vm5, %v672_v13 }
  0xe4   : > { %1881 = vmatpush3.bf16.msra.mxu0 %v726_v16 }
  0xe7   : > { %1883 = vmatmul.mubr.msk.bf16.vlgmr.msra.gmra.mxu0 %vm675_vm5, %v672_v13 }
 0x1a3   : > { %v717_v17 = vpop.f32.mrf.mxu1 }
 0x1a4   : > { %724 = vst.msk [vmem:[#allocation2] sm:$0xf] %vm723_vm6, %v717_v17 }
 0x1a5   : > { %v1878_v18 = vpop.f32.mrf.mxu1 }
 0x1a7   : > { %v720_v19 = vpop.f32.mrf.mxu1  ;;  %v762_v20 = vpop.f32.mrf.mxu0 }
 0x1a8   : > { %769 = vst.msk [vmem:[#allocation2 + $0x4] sm:$0xf] %vm723_vm6, %v762_v20 }
 0x1a9   : > { %v1879_v21 = vpop.f32.mrf.mxu1  ;;  %v1884_v22 = vpop.f32.mrf.mxu0 }
 0x1ab   : > { %v765_v24 = vpop.f32.mrf.mxu0  ;;  %v770_v25 = vld [vmem:[#allocation2] sm:$0xf] }
 0x1ac   : > { %v779_v26 = vadd.f32 %v1779_v23, %v770_v25 }
 0x1ad   : > { %v1885_v27 = vpop.f32.mrf.mxu0 }
 0x1ae   : > { %v783_v28 = vsel %vm723_vm6, %v779_v26, 0.0 }
 0x1af   : > { %784 = vadd.xlane.f32.xlu0 %v783_v28  ;;  %v771_v29 = vld [vmem:[#allocation2 + $0x4] sm:$0xf] }
 0x1b0   : > { %v780_v30 = vadd.f32 %v1779_v23, %v771_v29 }
 0x1b2   : > { %v786_v31 = vsel %vm723_vm6, %v780_v30, 0.0 }
 0x1b3   : > { %787 = vadd.xlane.f32.xlu0 %v786_v31 }
 0x238   : > { %v785_v32 = vpop.xlane.xlu0 %784 }
 0x239   : > { %v790_v33 = vmul.f32 0.03125, %v785_v32 }
 0x23b   : > { %v792_v34 = vsub.f32 %v779_v26, %v790_v33 }
 0x23c   : > { %v788_v35 = vpop.xlane.xlu0 %787 }
 0x23d   : > { %v791_v36 = vmul.f32 0.03125, %v788_v35  ;;  %v794_v37 = vmul.f32 %v792_v34, %v792_v34 }
 0x23f   : > { %v793_v38 = vsub.f32 %v780_v30, %v791_v36  ;;  %v796_v39 = vsel %vm723_vm6, %v794_v37, 0.0 }
 0x240   : > { %797 = vadd.xlane.f32.xlu1 %v796_v39 }
 0x241   : > { %v795_v40 = vmul.f32 %v793_v38, %v793_v38 }
 0x243   : > { %v799_v41 = vsel %vm723_vm6, %v795_v40, 0.0 }
 0x244   : > { %800 = vadd.xlane.f32.xlu1 %v799_v41 }
 0x2c9   : > { %v798_v42 = vpop.xlane.xlu1 %797 }
 0x2ca   : > { %v802_v43 = vmul.f32 0.03125, %v798_v42 }
 0x2cc   : > { %v804_v44 = vadd.f32 1e-05, %v802_v43 }
 0x2cd   : > { %v801_v45 = vpop.xlane.xlu1 %800 }
 0x2ce   : > { %1974 = vrsqrt.f32 %v804_v44  ;;  %v803_v46 = vmul.f32 0.03125, %v801_v45 }
 0x2d0   : > { %v805_v47 = vadd.f32 1e-05, %v803_v46 }
 0x2d2   : > { %1976 = vrsqrt.f32 %v805_v47 }
 0x2db   : > { %v1975_v48 = vpop.eup %1974 }
 0x2dc   : > { %v808_v50 = vmul.f32 %v1975_v48, %v792_v34 }
 0x2de   : > { %v816_v52 = vmul.f32 %v1780_v49, %v808_v50 }
 0x2df   : > { %v1977_v53 = vpop.eup %1976 }
 0x2e0   : > { %v824_v54 = vadd.f32 %v1781_v51, %v816_v52  ;;  %v809_v55 = vmul.f32 %v1977_v53, %v793_v38 }
 0x2e2   : > { %vm826_vm7 = vcmp.gt.f32.partialorder %v824_v54, 0.0  ;;  %v828_v56 = vmul.f32 0.2, %v824_v54  ;;  %v817_v57 = vmul.f32 %v1780_v49, %v809_v55 }
 0x2e4   : > { %v830_v58 = vsel %vm826_vm7, %v824_v54, %v828_v56  ;;  %v825_v59 = vadd.f32 %v1781_v51, %v817_v57 }
 0x2e5   : > { %832 = vst.msk [vmem:[#allocation2] sm:$0xf] %vm723_vm6, %v830_v58 }
 0x2e6   : > { %vm827_vm8 = vcmp.gt.f32.partialorder %v825_v59, 0.0  ;;  %v829_v60 = vmul.f32 0.2, %v825_v59 }
 0x2e8   : > { %v831_v61 = vsel %vm827_vm8, %v825_v59, %v829_v60 }
 0x2e9   : > { %833 = vst.msk [vmem:[#allocation2 + $0x4] sm:$0xf] %vm723_vm6, %v831_v61 }
 0x2ea PF: > { %vm836_vm9 = vcmask 257024  }
 0x2ec   : > { %v2210_v62 = vld [vmem:[#allocation2] sm:$0xf] }
 0x2ed   : > { %837 = vst.msk [vmem:[#allocation3 + $0x8] sm:$0xf] %vm836_vm9, %v2210_v62  ;;  %841 = sbr.rel (%p1775_p5) target bundleno = 763 (0x2fb), region = 92 }
 0x2f0   : > { %v2212_v63 = vld [vmem:[#allocation2 + $0x4] sm:$0xf] }
 0x2f1   : > { %838 = vst.msk [vmem:[#allocation3 + $0x20] sm:$0xf] %vm836_vm9, %v2212_v63 }
 0x2f4   : > { %v842_v0 = vld [vmem:[#allocation3 + $0x7] sm:$0xf] }
 0x2f5   : > { %v846_v2 = vld [vmem:[#allocation3 + $0x9] sm:$0xf]  ;;  %844 = vst.msk [vmem:[#allocation4] sm:$0xf] %vm836_vm9, %v842_v0 }
 0x2f6   : > { %848 = vst.msk [vmem:[#allocation5] sm:$0xf] %vm836_vm9, %v846_v2 }
 0x2f8   : > { %v843_v1 = vld [vmem:[#allocation3 + $0x1f] sm:$0xf] }
 0x2f9   : > { %845 = vst.msk [vmem:[#allocation4 + $0x4] sm:$0xf] %vm836_vm9, %v843_v1  ;;  %v847_v3 = vld [vmem:[#allocation3 + $0x21] sm:$0xf] }
 0x2fa   : > { %849 = vst.msk [vmem:[#allocation5 + $0x4] sm:$0xf] %vm836_vm9, %v847_v3 }
 0x2fb PF: > { %p1783_p6 = scmp.ne.s32.totalorder %s2028_s25, 1 }
 0x2fd   : > { %853 = sbr.rel (%p1783_p6) target bundleno = 773 (0x305), region = 96 }
 0x302   : > { %v854_v4 = vld [vmem:[#allocation3 + $0x6] sm:$0xf]  ;;  %v855_v5 = vld [vmem:[#allocation3 + $0x1e] sm:$0xf]  ;;  %v858_v6 = vld [vmem:[#allocation3 + $0xa] sm:$0xf] }
 0x303   : > { %856 = vst.msk [vmem:[#allocation4] sm:$0xf] %vm836_vm9, %v854_v4  ;;  %857 = vst.msk [vmem:[#allocation4 + $0x4] sm:$0xf] %vm836_vm9, %v855_v5  ;;  %v859_v7 = vld [vmem:[#allocation3 + $0x22] sm:$0xf] }
 0x304   : > { %860 = vst.msk [vmem:[#allocation5] sm:$0xf] %vm836_vm9, %v858_v6  ;;  %861 = vst.msk [vmem:[#allocation5 + $0x4] sm:$0xf] %vm836_vm9, %v859_v7 }
 0x305 PF: > { %p1784_p7 = scmp.ne.s32.totalorder %s2028_s25, 2 }
 0x307   : > { %865 = sbr.rel (%p1784_p7) target bundleno = 783 (0x30f), region = 100 }
 0x30c   : > { %v866_v8 = vld [vmem:[#allocation3 + $0x4] sm:$0xf]  ;;  %v867_v9 = vld [vmem:[#allocation3 + $0x1c] sm:$0xf]  ;;  %v870_v10 = vld [vmem:[#allocation3 + $0xc] sm:$0xf] }
 0x30d   : > { %868 = vst.msk [vmem:[#allocation4] sm:$0xf] %vm836_vm9, %v866_v8  ;;  %869 = vst.msk [vmem:[#allocation4 + $0x4] sm:$0xf] %vm836_vm9, %v867_v9  ;;  %v871_v11 = vld [vmem:[#allocation3 + $0x24] sm:$0xf] }
 0x30e   : > { %872 = vst.msk [vmem:[#allocation5] sm:$0xf] %vm836_vm9, %v870_v10  ;;  %873 = vst.msk [vmem:[#allocation5 + $0x4] sm:$0xf] %vm836_vm9, %v871_v11 }
 0x30f PF: > { %p1785_p8 = scmp.ne.s32.totalorder %s2028_s25, 3 }
 0x311   : > { %877 = sbr.rel (%p1785_p8) target bundleno = 793 (0x319), region = 104 }
 0x316   : > { %v878_v12 = vld [vmem:[#allocation3] sm:$0xf]  ;;  %v879_v13 = vld [vmem:[#allocation3 + $0x18] sm:$0xf]  ;;  %v882_v14 = vld [vmem:[#allocation3 + $0x10] sm:$0xf] }
 0x317   : > { %880 = vst.msk [vmem:[#allocation4] sm:$0xf] %vm836_vm9, %v878_v12  ;;  %881 = vst.msk [vmem:[#allocation4 + $0x4] sm:$0xf] %vm836_vm9, %v879_v13  ;;  %v883_v15 = vld [vmem:[#allocation3 + $0x28] sm:$0xf] }
 0x318   : > { %884 = vst.msk [vmem:[#allocation5] sm:$0xf] %vm836_vm9, %v882_v14  ;;  %885 = vst.msk [vmem:[#allocation5 + $0x4] sm:$0xf] %vm836_vm9, %v883_v15 }
 0x319 PF: > { %v1978_v16 = vld [vmem:[%s2171_s23 + $0x18] sm:$0xff]   ;;  %v2040_v17 = vmov 0.0   ;;  %v1979_v18 = vld [vmem:[%s2171_s23 + $0x8] sm:$0xff]   ;;  %v907_v19 = vcombine.low %v2210_v62, %v2212_v63  ;;  %v1980_v20 = vld [vmem:[%s2171_s23 + $0x10] sm:$0xff]   ;;  %vm2041_vm10 = vmmov 0   ;;  %vm922_vm11 = vcmask 261120  }
 0x31a   : > { %1886 = vmatprep.subr.bf16.mxu0 %v2040_v17  ;;  %1894 = vmatprep.subr.bf16.mxu1 %v2040_v17  ;;  %v1981_v21 = vld [vmem:[%s2171_s23] sm:$0xff]   ;;  %v1983_v25 = vld [vmem:[%s2171_s23 + $0x28] sm:$0xff]  }
 0x31b   : > { %1887 = vmatpush3.bf16.msra.mxu0 %v1978_v16  ;;  %1890 = vmatprep.mubr.msk.bf16.mxu0 %vm2041_vm10, %v2040_v17  ;;  %v909_v23 = vpack.c.bf16 %v907_v19, %v907_v19  ;;  %v1984_v27 = vld [vmem:[%s2171_s23 + $0x20] sm:$0xff]  }
 0x31c   : > { %1895 = vmatpush3.bf16.msra.mxu1 %v1979_v18  ;;  %1888 = vmatprep.subr.bf16.mxu0 %v2040_v17  ;;  %v1795_v39 = vld [vmem:[%s2161_s17] ss:$0 sm:$0xff] }
 0x31d   : > { %1896 = vmatprep.subr.bf16.mxu1 %v2040_v17  ;;  %1898 = vmatprep.mubr.msk.bf16.mxu1 %vm2041_vm10, %v2040_v17  ;;  %v1796_v4 = vld [vmem:[%s2166_s20] ss:$0 sm:$0xff] }
 0x31e   : > { %v1982_v22 = vld [vmem:[#allocation4] sm:$0xff]   ;;  %v1797_v6 = vld [vmem:[%s2176_s26] ss:$0 sm:$0xff] }
 0x31f   : > { %1889 = vmatpush3.bf16.msra.mxu0 %v1980_v20  ;;  %v904_v24 = vpack.c.bf16 %v1982_v22, %v1982_v22  ;;  %v1985_v26 = vld [vmem:[#allocation5] sm:$0xff]  }
 0x320   : > { %1897 = vmatpush3.bf16.msra.mxu1 %v1981_v21  ;;  %1902 = vmatprep.subr.bf16.mxu0 %v2040_v17  ;;  %v1027_v28 = vpack.c.bf16 %v1985_v26, %v1985_v26 }
 0x322   : > { %1891 = vmatmul.mubr.msk.bf16.vlgmr.msra.gmra.mxu0 %vm922_vm11, %v909_v23 }
 0x323   : > { %1899 = vmatmul.mubr.msk.bf16.vlgmr.msra.gmra.mxu1 %vm922_vm11, %v904_v24  ;;  %1903 = vmatpush3.bf16.msra.mxu0 %v1983_v25 }
 0x324   : > { %1904 = vmatprep.subr.bf16.mxu0 %v2040_v17  ;;  %1906 = vmatprep.mubr.msk.bf16.mxu0 %vm2041_vm10, %v2040_v17 }
 0x327   : > { %1905 = vmatpush3.bf16.msra.mxu0 %v1984_v27 }
 0x32a   : > { %1907 = vmatmul.mubr.msk.bf16.vlgmr.msra.gmra.mxu0 %vm922_vm11, %v1027_v28 }
 0x3e2   : > { %v960_v29 = vpop.f32.mrf.mxu0 }
 0x3e3   : > { %v1015_v30 = vpop.f32.mrf.mxu1 }
 0x3e4   : > { %v1892_v31 = vpop.f32.mrf.mxu0  ;;  %v1016_v36 = vadd.f32 %v1015_v30, %v960_v29 }
 0x3e5   : > { %v1900_v32 = vpop.f32.mrf.mxu1 }
 0x3e6   : > { %v963_v33 = vpop.f32.mrf.mxu0 }
 0x3e7   : > { %v1018_v34 = vpop.f32.mrf.mxu1 }
 0x3e8   : > { %v1893_v35 = vpop.f32.mrf.mxu0 }
 0x3e9   : > { %v1901_v37 = vpop.f32.mrf.mxu1 }
 0x3ea   : > { %v1077_v38 = vpop.f32.mrf.mxu0 }
 0x3eb   : > { %v1083_v40 = vadd.f32 %v1077_v38, %v1016_v36 }
 0x3ec   : > { %v1908_v41 = vpop.f32.mrf.mxu0 }
 0x3ed   : > { %v1085_v42 = vcombine.high %v1083_v40, %v1083_v40  ;;  %v1094_v43 = vadd.f32 %v1795_v39, %v1083_v40 }
 0x3ee   : > { %v1080_v44 = vpop.f32.mrf.mxu0 }
 0x3ef   : > { %v1098_v45 = vsel %vm836_vm9, %v1094_v43, 0.0  ;;  %v1095_v46 = vadd.f32 %v1795_v39, %v1085_v42 }
 0x3f0   : > { %v1909_v47 = vpop.f32.mrf.mxu0  ;;  %1099 = vadd.xlane.f32.xlu0 %v1098_v45 }
 0x3f1   : > { %v1101_v48 = vsel %vm836_vm9, %v1095_v46, 0.0 }
 0x3f4   : > { %1102 = vadd.xlane.f32.xlu0 %v1101_v48 }
 0x479   : > { %v1100_v49 = vpop.xlane.xlu0 %1099 }
 0x47a   : > { %v1105_v50 = vmul.f32 0.03125, %v1100_v49 }
 0x47c   : > { %v1107_v51 = vsub.f32 %v1094_v43, %v1105_v50 }
 0x47d   : > { %v1103_v52 = vpop.xlane.xlu0 %1102 }
 0x47e   : > { %v1106_v53 = vmul.f32 0.03125, %v1103_v52  ;;  %v1109_v54 = vmul.f32 %v1107_v51, %v1107_v51 }
 0x480   : > { %v1108_v55 = vsub.f32 %v1095_v46, %v1106_v53  ;;  %v1111_v56 = vsel %vm836_vm9, %v1109_v54, 0.0 }
 0x481   : > { %1112 = vadd.xlane.f32.xlu1 %v1111_v56 }
 0x482   : > { %v1110_v57 = vmul.f32 %v1108_v55, %v1108_v55 }
 0x484   : > { %v1114_v58 = vsel %vm836_vm9, %v1110_v57, 0.0 }
 0x485   : > { %1115 = vadd.xlane.f32.xlu1 %v1114_v58 }
 0x50a   : > { %v1113_v59 = vpop.xlane.xlu1 %1112 }
 0x50b   : > { %v1117_v60 = vmul.f32 0.03125, %v1113_v59 }
 0x50d   : > { %v1119_v61 = vadd.f32 1e-05, %v1117_v60 }
 0x50e   : > { %v1116_v0 = vpop.xlane.xlu1 %1115 }
 0x50f   : > { %1986 = vrsqrt.f32 %v1119_v61  ;;  %v1118_v1 = vmul.f32 0.03125, %v1116_v0 }
 0x511   : > { %v1120_v2 = vadd.f32 1e-05, %v1118_v1 }
 0x513   : > { %1988 = vrsqrt.f32 %v1120_v2 }
 0x51c   : > { %v1987_v3 = vpop.eup %1986 }
 0x51d   : > { %v1123_v5 = vmul.f32 %v1987_v3, %v1107_v51 }
 0x51f   : > { %v1131_v7 = vmul.f32 %v1796_v4, %v1123_v5 }
 0x520   : > { %v1989_v8 = vpop.eup %1988 }
 0x521   : > { %v1139_v9 = vadd.f32 %v1797_v6, %v1131_v7  ;;  %v1124_v10 = vmul.f32 %v1989_v8, %v1108_v55 }
 0x523   : > { %vm1141_vm12 = vcmp.gt.f32.partialorder %v1139_v9, 0.0  ;;  %v1143_v11 = vmul.f32 0.2, %v1139_v9  ;;  %v1132_v12 = vmul.f32 %v1796_v4, %v1124_v10 }
 0x525   : > { %v1145_v13 = vsel %vm1141_vm12, %v1139_v9, %v1143_v11  ;;  %v1140_v14 = vadd.f32 %v1797_v6, %v1132_v12 }
 0x526   : > { %1147 = vst.msk [vmem:[#allocation3 + $0x8] sm:$0xf] %vm836_vm9, %v1145_v13  ;;  %1151 = sbr.rel (%p1775_p5) target bundleno = 1332 (0x534), region = 108 }
 0x527   : > { %vm1142_vm13 = vcmp.gt.f32.partialorder %v1140_v14, 0.0  ;;  %v1144_v15 = vmul.f32 0.2, %v1140_v14 }
 0x529   : > { %v1146_v16 = vsel %vm1142_vm13, %v1140_v14, %v1144_v15 }
 0x52a   : > { %1148 = vst.msk [vmem:[#allocation3 + $0x20] sm:$0xf] %vm836_vm9, %v1146_v16 }
 0x52d   : > { %v1152_v18 = vld [vmem:[#allocation3 + $0x7] sm:$0xf] }
 0x52e   : > { %v1156_v20 = vld [vmem:[#allocation3 + $0x9] sm:$0xf]  ;;  %1154 = vst.msk [vmem:[#allocation4] sm:$0xf] %vm836_vm9, %v1152_v18 }
 0x52f   : > { %1158 = vst.msk [vmem:[#allocation5] sm:$0xf] %vm836_vm9, %v1156_v20 }
 0x531   : > { %v1153_v19 = vld [vmem:[#allocation3 + $0x1f] sm:$0xf] }
 0x532   : > { %1155 = vst.msk [vmem:[#allocation4 + $0x4] sm:$0xf] %vm836_vm9, %v1153_v19  ;;  %v1157_v21 = vld [vmem:[#allocation3 + $0x21] sm:$0xf] }
 0x533   : > { %1159 = vst.msk [vmem:[#allocation5 + $0x4] sm:$0xf] %vm836_vm9, %v1157_v21 }
 0x534 PF: > { %1162 = sbr.rel (%p1783_p6) target bundleno = 1341 (0x53d), region = 112 }
 0x539   : > { %v1163_v22 = vld [vmem:[#allocation3 + $0x6] sm:$0xf]  ;;  %v1167_v24 = vld [vmem:[#allocation3 + $0xa] sm:$0xf] }
 0x53a   : > { %v1164_v23 = vld [vmem:[#allocation3 + $0x1e] sm:$0xf]  ;;  %1165 = vst.msk [vmem:[#allocation4] sm:$0xf] %vm836_vm9, %v1163_v22  ;;  %1169 = vst.msk [vmem:[#allocation5] sm:$0xf] %vm836_vm9, %v1167_v24 }
 0x53b   : > { %1166 = vst.msk [vmem:[#allocation4 + $0x4] sm:$0xf] %vm836_vm9, %v1164_v23  ;;  %v1168_v25 = vld [vmem:[#allocation3 + $0x22] sm:$0xf] }
 0x53c   : > { %1170 = vst.msk [vmem:[#allocation5 + $0x4] sm:$0xf] %vm836_vm9, %v1168_v25 }
 0x53d PF: > { %1173 = sbr.rel (%p1784_p7) target bundleno = 1349 (0x545), region = 116 }
 0x542   : > { %v1174_v26 = vld [vmem:[#allocation3 + $0x4] sm:$0xf]  ;;  %v1175_v27 = vld [vmem:[#allocation3 + $0x1c] sm:$0xf]  ;;  %v1178_v28 = vld [vmem:[#allocation3 + $0xc] sm:$0xf] }
 0x543   : > { %1176 = vst.msk [vmem:[#allocation4] sm:$0xf] %vm836_vm9, %v1174_v26  ;;  %1177 = vst.msk [vmem:[#allocation4 + $0x4] sm:$0xf] %vm836_vm9, %v1175_v27  ;;  %v1179_v29 = vld [vmem:[#allocation3 + $0x24] sm:$0xf] }
 0x544   : > { %1180 = vst.msk [vmem:[#allocation5] sm:$0xf] %vm836_vm9, %v1178_v28  ;;  %1181 = vst.msk [vmem:[#allocation5 + $0x4] sm:$0xf] %vm836_vm9, %v1179_v29 }
 0x545 PF: > { %1184 = sbr.rel (%p1785_p8) target bundleno = 1357 (0x54d), region = 120 }
 0x54a   : > { %v1185_v30 = vld [vmem:[#allocation3] sm:$0xf]  ;;  %v1186_v31 = vld [vmem:[#allocation3 + $0x18] sm:$0xf]  ;;  %v1189_v32 = vld [vmem:[#allocation3 + $0x10] sm:$0xf] }
 0x54b   : > { %1187 = vst.msk [vmem:[#allocation4] sm:$0xf] %vm836_vm9, %v1185_v30  ;;  %1188 = vst.msk [vmem:[#allocation4 + $0x4] sm:$0xf] %vm836_vm9, %v1186_v31  ;;  %v1190_v33 = vld [vmem:[#allocation3 + $0x28] sm:$0xf] }
 0x54c   : > { %1191 = vst.msk [vmem:[#allocation5] sm:$0xf] %vm836_vm9, %v1189_v32  ;;  %1192 = vst.msk [vmem:[#allocation5 + $0x4] sm:$0xf] %vm836_vm9, %v1190_v33 }
 0x54d PF: > { %1910 = vmatprep.subr.bf16.mxu1 %v2040_v17  ;;  %v1990_v34 = vld [vmem:[%s2171_s23 + $0x48] sm:$0xff]   ;;  %1918 = vmatprep.subr.bf16.mxu0 %v2040_v17  ;;  %v1991_v35 = vld [vmem:[%s2171_s23 + $0x38] sm:$0xff]   ;;  %v1215_v36 = vcombine.low %v1145_v13, %v1146_v16  ;;  %v1992_v37 = vld [vmem:[%s2171_s23 + $0x40] sm:$0xff]  }
 0x54e   : > { %1914 = vmatprep.mubr.msk.bf16.mxu1 %vm2041_vm10, %v2040_v17  ;;  %1922 = vmatprep.mubr.msk.bf16.mxu0 %vm2041_vm10, %v2040_v17  ;;  %v1993_v38 = vld [vmem:[%s2171_s23 + $0x30] sm:$0xff]   ;;  %v1995_v42 = vld [vmem:[%s2171_s23 + $0x58] sm:$0xff]   ;;  %v1824_v56 = vld [vmem:[%s2161_s17 + $0x1] ss:$0 sm:$0xff] }
 0x54f   : > { %1911 = vmatpush3.bf16.msra.mxu1 %v1990_v34  ;;  %1919 = vmatpush3.bf16.msra.mxu0 %v1991_v35  ;;  %v1217_v40 = vpack.c.bf16 %v1215_v36, %v1215_v36  ;;  %v1996_v44 = vld [vmem:[%s2171_s23 + $0x50] sm:$0xff]   ;;  %v1827_v21 = vld [vmem:[%s2166_s20 + $0x1] ss:$0 sm:$0xff] }
 0x550   : > { %1912 = vmatprep.subr.bf16.mxu1 %v2040_v17  ;;  %1920 = vmatprep.subr.bf16.mxu0 %v2040_v17  ;;  %v1828_v23 = vld [vmem:[%s2176_s26 + $0x1] ss:$0 sm:$0xff] }
 0x552   : > { %v1994_v39 = vld [vmem:[#allocation4] sm:$0xff]  }
 0x553   : > { %1913 = vmatpush3.bf16.msra.mxu1 %v1992_v37  ;;  %v1212_v41 = vpack.c.bf16 %v1994_v39, %v1994_v39  ;;  %1921 = vmatpush3.bf16.msra.mxu0 %v1993_v38  ;;  %v1997_v43 = vld [vmem:[#allocation5] sm:$0xff]  }
 0x554   : > { %1926 = vmatprep.subr.bf16.mxu1 %v2040_v17  ;;  %v1334_v45 = vpack.c.bf16 %v1997_v43, %v1997_v43 }
 0x556   : > { %1915 = vmatmul.mubr.msk.bf16.vlgmr.msra.gmra.mxu1 %vm922_vm11, %v1217_v40  ;;  %1923 = vmatmul.mubr.msk.bf16.vlgmr.msra.gmra.mxu0 %vm922_vm11, %v1212_v41 }
 0x557   : > { %1927 = vmatpush3.bf16.msra.mxu1 %v1995_v42  ;;  %1930 = vmatprep.mubr.msk.bf16.mxu1 %vm2041_vm10, %v2040_v17 }
 0x558   : > { %1928 = vmatprep.subr.bf16.mxu1 %v2040_v17 }
 0x55b   : > { %1929 = vmatpush3.bf16.msra.mxu1 %v1996_v44 }
 0x55e   : > { %1931 = vmatmul.mubr.msk.bf16.vlgmr.msra.gmra.mxu1 %vm922_vm11, %v1334_v45 }
 0x616   : > { %v1267_v46 = vpop.f32.mrf.mxu1  ;;  %v1322_v47 = vpop.f32.mrf.mxu0 }
 0x617   : > { %v1323_v53 = vadd.f32 %v1322_v47, %v1267_v46 }
 0x618   : > { %v1916_v48 = vpop.f32.mrf.mxu1  ;;  %v1924_v49 = vpop.f32.mrf.mxu0 }
 0x61a   : > { %v1270_v50 = vpop.f32.mrf.mxu1  ;;  %v1325_v51 = vpop.f32.mrf.mxu0 }
 0x61c   : > { %v1917_v52 = vpop.f32.mrf.mxu1  ;;  %v1925_v54 = vpop.f32.mrf.mxu0 }
 0x61e   : > { %v1384_v55 = vpop.f32.mrf.mxu1 }
 0x61f   : > { %v1390_v57 = vadd.f32 %v1384_v55, %v1323_v53 }
 0x620   : > { %v1932_v58 = vpop.f32.mrf.mxu1 }
 0x621   : > { %v1392_v59 = vcombine.high %v1390_v57, %v1390_v57  ;;  %v1402_v60 = vadd.f32 %v1824_v56, %v1390_v57 }
 0x622   : > { %v1387_v17 = vpop.f32.mrf.mxu1 }
 0x623   : > { %v1408_v61 = vsel %vm836_vm9, %v1402_v60, 0.0  ;;  %v1403_v0 = vadd.f32 %v1824_v56, %v1392_v59 }
 0x624   : > { %v1933_v1 = vpop.f32.mrf.mxu1  ;;  %1409 = vadd.xlane.f32.xlu0 %v1408_v61 }
 0x625   : > { %v1411_v2 = vsel %vm836_vm9, %v1403_v0, 0.0 }
 0x628   : > { %1412 = vadd.xlane.f32.xlu0 %v1411_v2 }
 0x6ad   : > { %v1410_v3 = vpop.xlane.xlu0 %1409 }
 0x6ae   : > { %v1414_v4 = vmul.f32 0.03125, %v1410_v3 }
 0x6b0   : > { %v1416_v5 = vsub.f32 %v1402_v60, %v1414_v4 }
 0x6b1   : > { %v1413_v6 = vpop.xlane.xlu0 %1412 }
 0x6b2   : > { %v1415_v7 = vmul.f32 0.03125, %v1413_v6  ;;  %v1418_v8 = vmul.f32 %v1416_v5, %v1416_v5 }
 0x6b4   : > { %v1417_v9 = vsub.f32 %v1403_v0, %v1415_v7  ;;  %v1420_v10 = vsel %vm836_vm9, %v1418_v8, 0.0 }
 0x6b5   : > { %1421 = vadd.xlane.f32.xlu1 %v1420_v10 }
 0x6b6   : > { %v1419_v11 = vmul.f32 %v1417_v9, %v1417_v9 }
 0x6b8   : > { %v1423_v12 = vsel %vm836_vm9, %v1419_v11, 0.0 }
 0x6b9   : > { %1424 = vadd.xlane.f32.xlu1 %v1423_v12 }
 0x73e   : > { %v1422_v13 = vpop.xlane.xlu1 %1421 }
 0x73f   : > { %v1426_v14 = vmul.f32 0.03125, %v1422_v13 }
 0x741   : > { %v1428_v15 = vadd.f32 1e-05, %v1426_v14 }
 0x742   : > { %v1425_v16 = vpop.xlane.xlu1 %1424 }
 0x743   : > { %1998 = vrsqrt.f32 %v1428_v15  ;;  %v1427_v18 = vmul.f32 0.03125, %v1425_v16 }
 0x745   : > { %v1429_v19 = vadd.f32 1e-05, %v1427_v18 }
 0x747   : > { %2000 = vrsqrt.f32 %v1429_v19 }
 0x750   : > { %v1999_v20 = vpop.eup %1998 }
 0x751   : > { %v1432_v22 = vmul.f32 %v1999_v20, %v1416_v5 }
 0x753   : > { %v1440_v24 = vmul.f32 %v1827_v21, %v1432_v22 }
 0x754   : > { %v2001_v25 = vpop.eup %2000 }
 0x755   : > { %v1448_v26 = vadd.f32 %v1828_v23, %v1440_v24  ;;  %v1433_v27 = vmul.f32 %v2001_v25, %v1417_v9 }
 0x757   : > { %v1450_v28 = vadd.f32 %v1448_v26, %v2210_v62  ;;  %v1441_v29 = vmul.f32 %v1827_v21, %v1433_v27 }
 0x759   : > { %vm1452_vm14 = vcmp.gt.f32.partialorder %v1450_v28, 0.0  ;;  %v1454_v30 = vmul.f32 0.2, %v1450_v28  ;;  %v1449_v31 = vadd.f32 %v1828_v23, %v1441_v29 }
 0x75b   : > { %v2330_v32 = vsel %vm1452_vm14, %v1450_v28, %v1454_v30  ;;  %v1451_v33 = vadd.f32 %v1449_v31, %v2212_v63 }
 0x75c   : > { %1458 = vst.msk [vmem:[#allocation2] sm:$0xf] %vm836_vm9, %v2330_v32  ;;  %1462 = sbr.rel (%p1785_p8) target bundleno = 2709 (0xa95), region = 124 }
 0x75d   : > { %vm1453_vm15 = vcmp.gt.f32.partialorder %v1451_v33, 0.0  ;;  %v1455_v34 = vmul.f32 0.2, %v1451_v33 }
 0x75f   : > { %v2335_v35 = vsel %vm1453_vm15, %v1451_v33, %v1455_v34 }
 0x760   : > { %1459 = vst.msk [vmem:[#allocation2 + $0x4] sm:$0xf] %vm836_vm9, %v2335_v35 }
 0x761   : > { %v1830_v62 = vld [vmem:[%s2391_s10] ss:$0 sm:$0xff]  ;;  %v2042_v39 = vmov 0   ;;  %v1831_v40 = vld [vmem:[#allocation6] ss:$0 sm:$0xff]  ;;  %vm1487_vm0 = vcmask 3072  }
 0x762   : > { %v1470_v36 = vmul.f32 %v1830_v62, %v2330_v32  ;;  %v1471_v63 = vmul.f32 %v1830_v62, %v2335_v35  ;;  %2002 = vset.pattern.permute.xlu1 %v2042_v39  ;;  %2003 = vset.pattern.permute.xlu0 %v2042_v39  ;;  %v2004_v21 = vld [vmem:[%s2393_s12 + $0x8] sm:$0xff]   ;;  %v2043_v22 = vmov 0.0   ;;  %v2005_v23 = vld [vmem:[%s2393_s12] sm:$0xff]   ;;  %vm2044_vm1 = vmmov 0  }
 0x763   : > { %1934 = vmatprep.subr.bf16.mxu0 %v2043_v22  ;;  %1938 = vmatprep.mubr.msk.bf16.mxu0 %vm2044_vm1, %v2043_v22  ;;  %vm1569_vm2 = vcmask 1041409   ;;  %vm1638_vm4 = vcmask 254976  }
 0x764   : > { %v1472_v37 = vsel %vm836_vm9, %v1470_v36, 0.0  ;;  %v1475_v38 = vsel %vm836_vm9, %v1471_v63, 0.0  ;;  %1935 = vmatpush3.bf16.msra.mxu0 %v2004_v21 }
 0x765   : > { %1473 = vadd.xlane.f32.xlu0 %v1472_v37  ;;  %1936 = vmatprep.subr.bf16.mxu0 %v2043_v22 }
 0x768   : > { %1937 = vmatpush3.bf16.msra.mxu0 %v2005_v23 }
 0x769   : > { %1476 = vadd.xlane.f32.xlu0 %v1475_v38 }
 0x7ee   : > { %v1474_v41 = vpop.xlane.xlu0 %1473 }
 0x7ef   : > { %v1485_v42 = vadd.f32 %v1831_v40, %v1474_v41 }
 0x7f1   : > { %v1488_v43 = vsel %vm1487_vm0, %v1485_v42, -inf }
 0x7f2   : > { %v1489_v44 = vrot.slane %v1488_v43, 4  ;;  %v1477_v45 = vpop.xlane.xlu0 %1476 }
 0x7f3   : > { %v1486_v46 = vadd.f32 %v1831_v40, %v1477_v45 }
 0x7f4   : > { %v1490_v47 = vmax.f32 %v1488_v43, %v1489_v44 }
 0x7f5   : > { %v1495_v48 = vsel %vm1487_vm0, %v1486_v46, -inf }
 0x7f6   : > { %v1491_v49 = vrot.slane %v1490_v47, 2  ;;  %v1496_v50 = vrot.slane %v1495_v48, 4 }
 0x7f8   : > { %v1492_v51 = vmax.f32 %v1490_v47, %v1491_v49  ;;  %v1497_v52 = vmax.f32 %v1495_v48, %v1496_v50 }
 0x7fa   : > { %v1493_v53 = vrot.slane %v1492_v51, 1  ;;  %v1498_v54 = vrot.slane %v1497_v52, 2 }
 0x7fc   : > { %v1494_v55 = vmax.f32 %v1492_v51, %v1493_v53  ;;  %v1499_v56 = vmax.f32 %v1497_v52, %v1498_v54  ;;  %v1836_v51 = vld [vmem:[%s2395_s14] ss:$0 sm:$0xff] }
 0x7fe   : > { %v1502_v57 = vsub.f32 %v1485_v42, %v1494_v55  ;;  %v1500_v58 = vrot.slane %v1499_v56, 1 }
 0x800   : > { %v1504_v59 = vmul.f32 1.442695, %v1502_v57  ;;  %v1501_v60 = vmax.f32 %v1499_v56, %v1500_v58  ;;  %v1837_v57 = vld [vmem:[#allocation7] ss:$0 sm:$0xff] }
 0x802   : > { %2006 = vpow2.f32 %v1504_v59  ;;  %v1503_v17 = vsub.f32 %v1486_v46, %v1501_v60  ;;  %v1832_v46 = vld [vmem:[%s2394_s13] ss:$0 sm:$0xff] }
 0x804   : > { %v1506_v61 = vmul.f32 1.442695, %v1503_v17 }
 0x806   : > { %2008 = vpow2.f32 %v1506_v61 }
 0x80f   : > { %v2007_v0 = vpop.eup %2006 }
 0x810   : > { %v1508_v1 = vsel %vm1487_vm0, %v2007_v0, 0.0 }
 0x811   : > { %v1509_v2 = vrot.slane %v1508_v1, 4 }
 0x813   : > { %v2009_v3 = vpop.eup %2008  ;;  %v1510_v4 = vadd.f32 %v1509_v2, %v1508_v1 }
 0x814   : > { %v1515_v5 = vsel %vm1487_vm0, %v2009_v3, 0.0 }
 0x815   : > { %v1511_v6 = vrot.slane %v1510_v4, 2  ;;  %v1516_v7 = vrot.slane %v1515_v5, 4 }
 0x817   : > { %v1512_v8 = vadd.f32 %v1511_v6, %v1510_v4  ;;  %v1517_v9 = vadd.f32 %v1516_v7, %v1515_v5 }
 0x819   : > { %v1513_v10 = vrot.slane %v1512_v8, 1  ;;  %v1518_v11 = vrot.slane %v1517_v9, 2 }
 0x81b   : > { %v1514_v12 = vadd.f32 %v1513_v10, %v1512_v8  ;;  %v1519_v13 = vadd.f32 %v1518_v11, %v1517_v9 }
 0x81d   : > { %2010 = vrcp.f32 %v1514_v12  ;;  %v1520_v14 = vrot.slane %v1519_v13, 1 }
 0x81f   : > { %v1521_v15 = vadd.f32 %v1520_v14, %v1519_v13 }
 0x821   : > { %2012 = vrcp.f32 %v1521_v15 }
 0x82a   : > { %v2011_v16 = vpop.eup %2010 }
 0x82b   : > { %v1524_v18 = vmul.f32 %v2011_v16, %v2007_v0 }
 0x82d   : > { %1528 = vperm.xlu1 %2002, %v1524_v18  }
 0x82e   : > { %v2013_v19 = vpop.eup %2012 }
 0x82f   : > { %v1525_v20 = vmul.f32 %v2013_v19, %v2009_v3 }
 0x831   : > { %1533 = vperm.xlu1 %2002, %v1525_v20  }
 0x8a8   : > { %v1529_v24 = vpop.permute.xlu1 %1528 }
 0x8a9   : > { %v1536_v25 = vmul.f32 %v1529_v24, %v2330_v32 }
 0x8ab   : > { %v1538_v26 = vsel %vm836_vm9, %v1536_v25, 0.0 }
 0x8ac   : > { %v1539_v27 = vrot.slane %v1538_v26, 4  ;;  %v1534_v28 = vpop.permute.xlu1 %1533 }
 0x8ad   : > { %v1537_v29 = vmul.f32 %v1534_v28, %v2335_v35 }
 0x8ae   : > { %v1540_v30 = vadd.f32 %v1539_v27, %v1538_v26 }
 0x8af   : > { %v1545_v31 = vsel %vm836_vm9, %v1537_v29, 0.0 }
 0x8b0   : > { %v1541_v33 = vrot.slane %v1540_v30, 2  ;;  %v1546_v34 = vrot.slane %v1545_v31, 4 }
 0x8b2   : > { %v1542_v62 = vadd.f32 %v1541_v33, %v1540_v30  ;;  %v1547_v36 = vadd.f32 %v1546_v34, %v1545_v31 }
 0x8b4   : > { %v1543_v63 = vrot.slane %v1542_v62, 1  ;;  %v1548_v37 = vrot.slane %v1547_v36, 2 }
 0x8b6   : > { %v1544_v38 = vadd.f32 %v1543_v63, %v1542_v62  ;;  %v1549_v39 = vadd.f32 %v1548_v37, %v1547_v36 }
 0x8b8   : > { %v1550_v40 = vrot.slane %v1549_v39, 1  ;;  %v1556_v41 = vpack.c.bf16 %v1544_v38, %v1544_v38 }
 0x8ba   : > { %v1551_v32 = vadd.f32 %v1550_v40, %v1549_v39  ;;  %v1567_v43 = vunpack.c.l.b16 %v1556_v41 }
 0x8bc   : > { %v1557_v42 = vpack.c.bf16 %v1551_v32, %v1551_v32 }
 0x8be   : > { %v1568_v44 = vunpack.c.l.b16 %v1557_v42 }
 0x8c0   : > { %v1570_v45 = vsel %vm1569_vm2, %v1568_v44, %v1567_v43 }
 0x8c1   : > { %v1571_v35 = vpack.c.b16 %v1570_v45, %v1570_v45 }
 0x8c3   : > { %1939 = vmatmul.mubr.msk.bf16.vlgmr.msra.gmra.mxu0 %vm922_vm11, %v1571_v35 }
 0x983   : > { %v1621_v47 = vpop.f32.mrf.mxu0 }
 0x984   : > { %v1622_v48 = vadd.f32 %v1832_v46, %v1621_v47 }
 0x985   : > { %v1940_v49 = vpop.f32.mrf.mxu0 }
 0x986   : > { %vm1627_vm3 = vcmp.gt.f32.partialorder %v1622_v48, 0.0  ;;  %v1628_v50 = vmul.f32 0.2, %v1622_v48 }
 0x987   : > { %v1624_v52 = vpop.f32.mrf.mxu0 }
 0x988   : > { %v1629_v53 = vsel %vm1627_vm3, %v1622_v48, %v1628_v50 }
 0x989   : > { %v1941_v54 = vpop.f32.mrf.mxu0  ;;  %v1637_v55 = vmul.f32 %v1836_v51, %v1629_v53 }
 0x98b   : > { %v1639_v56 = vsel %vm1638_vm4, %v1637_v55, 0.0 }
 0x98c   : > { %1640 = vadd.xlane.f32.xlu0 %v1639_v56 }
 0xa15   : > { %v1641_v58 = vpop.xlane.xlu0 %1640 }
 0xa16   : > { %v1649_v59 = vadd.f32 %v1837_v57, %v1641_v58 }
 0xa18   : > { %1652 = vperm.xlu1 %2002, %v1649_v59  }
 0xa93   : > { %v1653_v60 = vpop.permute.xlu1 %1652 }
 0xa94   : > { %1655 = vst [vmem:[%s2396_s16] sm:$0x3] %v1653_v60 }
 0xa95 PF: > { %s30_s27 = sadd.s32 1, %s2036_s27   ;;  %s2404_s25 = sld [smem:[#allocation8_spill]] }
 0xa96   : > { %p27_p9 = scmp.ge.s32.totalorder %s30_s27, 6   ;;  %s2405_s26 = sld [smem:[#allocation9_spill]] }
 0xa98   :  { %29 = sbr.rel (!%p27_p9) target bundleno = 3 (0x3), region = 171 }

// kernel: _lambda_.3
= control target key start
LH: loop header
LB: loop body
LE: loop exit
PB: predicated region body
PF: predicated region fallthrough
CT: control target
= control target key end

     0   :  { %s1993_s23 = smov 0   ;;  %s1995_s24 = smov 0   ;;  %s2245_s0 = inlined_call_operand.vmem [shape: f32[2,8,4], index: 0, kind: input, shape index: {}]   ;;  %s2246_s1 = inlined_call_operand.<no memory space> [shape: bf16[1,1], index: 1, kind: input, shape index: {}]   ;;  %s2247_s2 = inlined_call_operand.vmem [shape: bf16[4,32], index: 2, kind: input, shape index: {}]   ;;  %s2248_s3 = inlined_call_operand.vmem [shape: f32[1,32], index: 3, kind: input, shape index: {}, may-alias: {3,5,13}]   ;;  %s2249_s4 = inlined_call_operand.vmem [shape: f32[1,32], index: 4, kind: input, shape index: {}]   ;;  %s2250_s5 = inlined_call_operand.vmem [shape: f32[1,32], index: 5, kind: input, shape index: {}, may-alias: {3,5,13}]   ;;  %s2251_s6 = inlined_call_operand.vmem [shape: bf16[4,2,96,32], index: 6, kind: input, shape index: {}]   ;;  %s2252_s7 = inlined_call_operand.vmem [shape: f32[4,2,1,32], index: 7, kind: input, shape index: {}]   ;;  %s2253_s8 = inlined_call_operand.vmem [shape: f32[4,2,1,32], index: 8, kind: input, shape index: {}]   ;;  %s2254_s9 = inlined_call_operand.vmem [shape: f32[4,2,1,32], index: 9, kind: input, shape index: {}]   ;;  %s2255_s10 = inlined_call_operand.vmem [shape: f32[1,32], index: 10, kind: input, shape index: {}]   ;;  %s2256_s12 = inlined_call_operand.vmem [shape: bf16[32,32], index: 12, kind: input, shape index: {}]   ;;  %s2257_s13 = inlined_call_operand.vmem [shape: f32[1,32], index: 13, kind: input, shape index: {}, may-alias: {3,5,13}]   ;;  %s2258_s14 = inlined_call_operand.vmem [shape: f32[1,32], index: 14, kind: input, shape index: {}]   ;;  %s2259_s16 = inlined_call_operand.vmem [shape: f32[2,128], index: 16, kind: output, shape index: {}]   ;;  %s2260_s11 = inlined_call_operand.<no memory space> [shape: f32[1,1], index: 11, kind: input, shape index: {}, may-alias: {11,15}]   ;;  %s2261_s15 = inlined_call_operand.<no memory space> [shape: f32[1,1], index: 15, kind: input, shape index: {}, may-alias: {11,15}]  }
   0x1   :  { %2263 = sst [smem:[#allocation10_spill]] %s2245_s0  ;;  %v23_v0 = vstv %s2260_s11  ;;  %v25_v1 = vstv %s2261_s15  ;;  %s1997_s25 = smov 0  }
   0x2   :  { %24 = vst [vmem:[#allocation7] sm:$0x1] %v23_v0  ;;  %26 = vst [vmem:[#allocation8] sm:$0x1] %v25_v1 }
   0x3 LB: > { %s41_s11 = sadd.s32 1, %s1889_s24  ;;  %p1649_p0 = scmp.ge.s32.totalorder %s1893_s25, 1  ;;  %s1893_s25 = sphi %s1997_s25, %s32_s25   ;;  %s1889_s24 = sphi %s1995_s24, %s2268_s24   ;;  %s1885_s23 = sphi %s1993_s23, %s2267_s23  }
   0x4   : > { %p42_p1 = scmp.ge.s32.totalorder %s41_s11, 4  ;;  %p518_p2 = scmp.lt.s32.totalorder %s1893_s25, 5 }
   0x6   : > { %s2270_s11 = smov (%p42_p1, %s41_s11), 0  ;;  %p519_p3 = pnand %p1649_p0, %p518_p2 }
   0x7   : > { %2264 = sst [smem:[#allocation9_spill]] %s2270_s11  ;;  %p590_p4 = scmp.lt.s32.totalorder (!%p519_p3), %s1885_s23, 3 }
   0x8   : > { %522 = sbr.rel (%p519_p3) target bundleno = 2498 (0x9c2), region = 84  ;;  %p1654_p5 = scmp.ne.s32.totalorder (!%p519_p3), %s1885_s23, 0 }
   0xd   : > { %s591_s15 = scalar_select %p590_p4, %s1885_s23, 3 }
   0xe   : > { %615 = sbr.rel (%p1654_p5) target bundleno = 535 (0x217), region = 88  ;;  %s2265_s29 = sld [smem:[#allocation10_spill]] (!%p1654_p5) }
   0xf   : > { %s1803_s26 = smul.u32 96, %s591_s15  ;;  %s1651_s27 = sshll.u32 %s591_s15, 1 }
  0x10   : > { %s2018_s0 = scalar_lea.vmem %s2252_s7, %s1651_s27  ;;  %s2023_s18 = scalar_lea.vmem %s2253_s8, %s1651_s27 }
  0x11   : > { %s2028_s20 = scalar_lea.vmem %s2251_s6, %s1803_s26  ;;  %s2033_s11 = scalar_lea.vmem %s2254_s9, %s1651_s27 }
  0x13   : > { %vm616_vm0 = vcmask 261120   ;;  %v623_v2 = vld [vmem:[%s2247_s2] sm:$0x3]  ;;  %vm629_vm1 = vcmask 1041408   ;;  %v1895_v3 = vmov 0.0   ;;  %vm1896_vm2 = vmmov 0  }
  0x14   : > { %617 = vst.msk [vmem:[#allocation3] sm:$0xff] %vm616_vm0, %v1895_v3  ;;  %618 = vst.msk [vmem:[#allocation3 + $0x18] sm:$0xff] %vm616_vm0, %v1895_v3  ;;  %1741 = vmatprep.subr.bf16.mxu0 %v1895_v3  ;;  %v631_v4 = vsel %vm629_vm1, %v623_v2, 0  ;;  %1743 = vmatprep.mubr.msk.bf16.mxu0 %vm1896_vm2, %v1895_v3  ;;  %v621_v5 = vld [vmem:[%s2265_s29] sm:$0xff]  ;;  %v622_v6 = vld [vmem:[%s2265_s29 + $0x8] sm:$0xff]  ;;  %vm625_vm3 = vcmask 31744  }
  0x15   : > { %619 = vst.msk [vmem:[#allocation3 + $0x10] sm:$0xff] %vm616_vm0, %v1895_v3  ;;  %620 = vst.msk [vmem:[#allocation3 + $0x28] sm:$0xff] %vm616_vm0, %v1895_v3  ;;  %1742 = vmatpush3.bf16.msra.mxu0 %v631_v4  ;;  %v624_v7 = vpack.c.bf16 %v622_v6, %v621_v5  ;;  %v1656_v8 = vld [vmem:[%s2248_s3] ss:$0 sm:$0xff] }
  0x16   : > { %v1657_v34 = vld [vmem:[%s2249_s4] ss:$0 sm:$0xff] }
  0x17   : > { %v1658_v36 = vld [vmem:[%s2250_s5] ss:$0 sm:$0xff] }
  0x18   : > { %1744 = vmatmul.mubr.msk.bf16.vlgmr.msra.gmra.mxu0 %vm625_vm3, %v624_v7 }
  0xd8   : > { %v667_v9 = vpop.f32.mrf.mxu0 }
  0xd9   : > { %v681_v10 = vadd.f32 %v1656_v8, %v667_v9 }
  0xda   : > { %v1745_v11 = vpop.f32.mrf.mxu0 }
  0xdb   : > { %v685_v12 = vsel %vm616_vm0, %v681_v10, 0.0 }
  0xdc   : > { %v670_v13 = vpop.f32.mrf.mxu0  ;;  %686 = vadd.xlane.f32.xlu0 %v685_v12 }
  0xdd   : > { %v682_v14 = vadd.f32 %v1656_v8, %v670_v13 }
  0xde   : > { %v1746_v15 = vpop.f32.mrf.mxu0 }
  0xdf   : > { %v688_v16 = vsel %vm616_vm0, %v682_v14, 0.0 }
  0xe0   : > { %689 = vadd.xlane.f32.xlu0 %v688_v16 }
 0x165   : > { %v687_v17 = vpop.xlane.xlu0 %686 }
 0x166   : > { %v692_v18 = vmul.f32 0.03125, %v687_v17 }
 0x168   : > { %v694_v19 = vsub.f32 %v681_v10, %v692_v18 }
 0x169   : > { %v690_v20 = vpop.xlane.xlu0 %689 }
 0x16a   : > { %v693_v21 = vmul.f32 0.03125, %v690_v20  ;;  %v696_v22 = vmul.f32 %v694_v19, %v694_v19 }
 0x16c   : > { %v695_v23 = vsub.f32 %v682_v14, %v693_v21  ;;  %v698_v24 = vsel %vm616_vm0, %v696_v22, 0.0 }
 0x16d   : > { %699 = vadd.xlane.f32.xlu1 %v698_v24 }
 0x16e   : > { %v697_v25 = vmul.f32 %v695_v23, %v695_v23 }
 0x170   : > { %v701_v26 = vsel %vm616_vm0, %v697_v25, 0.0 }
 0x171   : > { %702 = vadd.xlane.f32.xlu1 %v701_v26 }
 0x1f6   : > { %v700_v27 = vpop.xlane.xlu1 %699 }
 0x1f7   : > { %v704_v28 = vmul.f32 0.03125, %v700_v27 }
 0x1f9   : > { %v706_v29 = vadd.f32 1e-05, %v704_v28 }
 0x1fa   : > { %v703_v30 = vpop.xlane.xlu1 %702 }
 0x1fb   : > { %1835 = vrsqrt.f32 %v706_v29  ;;  %v705_v31 = vmul.f32 0.03125, %v703_v30 }
 0x1fd   : > { %v707_v32 = vadd.f32 1e-05, %v705_v31 }
 0x1ff   : > { %1837 = vrsqrt.f32 %v707_v32 }
 0x208   : > { %v1836_v33 = vpop.eup %1835 }
 0x209   : > { %v710_v35 = vmul.f32 %v1836_v33, %v694_v19 }
 0x20b   : > { %v718_v37 = vmul.f32 %v1657_v34, %v710_v35 }
 0x20c   : > { %v1838_v38 = vpop.eup %1837 }
 0x20d   : > { %v726_v39 = vadd.f32 %v1658_v36, %v718_v37  ;;  %v711_v40 = vmul.f32 %v1838_v38, %v695_v23 }
 0x20f   : > { %vm728_vm4 = vcmp.gt.f32.partialorder %v726_v39, 0.0  ;;  %v730_v41 = vmul.f32 0.2, %v726_v39  ;;  %v719_v42 = vmul.f32 %v1657_v34, %v711_v40 }
 0x211   : > { %v732_v43 = vsel %vm728_vm4, %v726_v39, %v730_v41  ;;  %v727_v44 = vadd.f32 %v1658_v36, %v719_v42 }
 0x212   : > { %734 = vst.msk [vmem:[#allocation2] sm:$0xff] %vm616_vm0, %v732_v43 }
 0x213   : > { %vm729_vm5 = vcmp.gt.f32.partialorder %v727_v44, 0.0  ;;  %v731_v45 = vmul.f32 0.2, %v727_v44 }
 0x215   : > { %v733_v46 = vsel %vm729_vm5, %v727_v44, %v731_v45 }
 0x216   : > { %735 = vst.msk [vmem:[#allocation2 + $0x8] sm:$0xff] %vm616_vm0, %v733_v46 }
 0x217 PF: > { %vm738_vm6 = vcmask 261120  }
 0x219   : > { %v2066_v47 = vld [vmem:[#allocation2] sm:$0xff] }
 0x21a   : > { %739 = vst.msk [vmem:[#allocation3 + $0x8] sm:$0xff] %vm738_vm6, %v2066_v47  ;;  %743 = sbr.rel (%p1654_p5) target bundleno = 552 (0x228), region = 92 }
 0x21d   : > { %v2068_v48 = vld [vmem:[#allocation2 + $0x8] sm:$0xff] }
 0x21e   : > { %740 = vst.msk [vmem:[#allocation3 + $0x20] sm:$0xff] %vm738_vm6, %v2068_v48 }
 0x221   : > { %v744_v49 = vld [vmem:[#allocation3 + $0x7] sm:$0xff] }
 0x222   : > { %v748_v51 = vld [vmem:[#allocation3 + $0x9] sm:$0xff]  ;;  %746 = vst.msk [vmem:[#allocation4] sm:$0xff] %vm738_vm6, %v744_v49 }
 0x223   : > { %750 = vst.msk [vmem:[#allocation5] sm:$0xff] %vm738_vm6, %v748_v51 }
 0x225   : > { %v745_v50 = vld [vmem:[#allocation3 + $0x1f] sm:$0xff] }
 0x226   : > { %747 = vst.msk [vmem:[#allocation4 + $0x8] sm:$0xff] %vm738_vm6, %v745_v50  ;;  %v749_v52 = vld [vmem:[#allocation3 + $0x21] sm:$0xff] }
 0x227   : > { %751 = vst.msk [vmem:[#allocation5 + $0x8] sm:$0xff] %vm738_vm6, %v749_v52 }
 0x228 PF: > { %p1660_p6 = scmp.ne.s32.totalorder %s1885_s23, 1 }
 0x22a   : > { %755 = sbr.rel (%p1660_p6) target bundleno = 562 (0x232), region = 96 }
 0x22f   : > { %v756_v53 = vld [vmem:[#allocation3 + $0x6] sm:$0xff]  ;;  %v757_v54 = vld [vmem:[#allocation3 + $0x1e] sm:$0xff] }
 0x230   : > { %v760_v55 = vld [vmem:[#allocation3 + $0xa] sm:$0xff]  ;;  %758 = vst.msk [vmem:[#allocation4] sm:$0xff] %vm738_vm6, %v756_v53  ;;  %759 = vst.msk [vmem:[#allocation4 + $0x8] sm:$0xff] %vm738_vm6, %v757_v54  ;;  %v761_v56 = vld [vmem:[#allocation3 + $0x22] sm:$0xff] }
 0x231   : > { %762 = vst.msk [vmem:[#allocation5] sm:$0xff] %vm738_vm6, %v760_v55  ;;  %763 = vst.msk [vmem:[#allocation5 + $0x8] sm:$0xff] %vm738_vm6, %v761_v56 }
 0x232 PF: > { %p1661_p7 = scmp.ne.s32.totalorder %s1885_s23, 2 }
 0x234   : > { %767 = sbr.rel (%p1661_p7) target bundleno = 572 (0x23c), region = 100 }
 0x239   : > { %v768_v57 = vld [vmem:[#allocation3 + $0x4] sm:$0xff]  ;;  %v769_v58 = vld [vmem:[#allocation3 + $0x1c] sm:$0xff]  ;;  %v772_v59 = vld [vmem:[#allocation3 + $0xc] sm:$0xff] }
 0x23a   : > { %770 = vst.msk [vmem:[#allocation4] sm:$0xff] %vm738_vm6, %v768_v57  ;;  %771 = vst.msk [vmem:[#allocation4 + $0x8] sm:$0xff] %vm738_vm6, %v769_v58  ;;  %v773_v60 = vld [vmem:[#allocation3 + $0x24] sm:$0xff] }
 0x23b   : > { %774 = vst.msk [vmem:[#allocation5] sm:$0xff] %vm738_vm6, %v772_v59  ;;  %775 = vst.msk [vmem:[#allocation5 + $0x8] sm:$0xff] %vm738_vm6, %v773_v60 }
 0x23c PF: > { %p1662_p8 = scmp.ne.s32.totalorder %s1885_s23, 3 }
 0x23e   : > { %779 = sbr.rel (%p1662_p8) target bundleno = 582 (0x246), region = 104 }
 0x243   : > { %v780_v61 = vld [vmem:[#allocation3] sm:$0xff]  ;;  %v781_v62 = vld [vmem:[#allocation3 + $0x18] sm:$0xff]  ;;  %v784_v63 = vld [vmem:[#allocation3 + $0x10] sm:$0xff] }
 0x244   : > { %782 = vst.msk [vmem:[#allocation4] sm:$0xff] %vm738_vm6, %v780_v61  ;;  %783 = vst.msk [vmem:[#allocation4 + $0x8] sm:$0xff] %vm738_vm6, %v781_v62  ;;  %v785_v0 = vld [vmem:[#allocation3 + $0x28] sm:$0xff] }
 0x245   : > { %786 = vst.msk [vmem:[#allocation5] sm:$0xff] %vm738_vm6, %v784_v63  ;;  %787 = vst.msk [vmem:[#allocation5 + $0x8] sm:$0xff] %vm738_vm6, %v785_v0 }
 0x246 PF: > { %v1839_v1 = vld [vmem:[%s2028_s20 + $0x18] sm:$0xff]   ;;  %v1897_v2 = vmov 0.0   ;;  %v1840_v3 = vld [vmem:[%s2028_s20 + $0x8] sm:$0xff]   ;;  %v1841_v4 = vld [vmem:[%s2028_s20 + $0x10] sm:$0xff]   ;;  %vm1898_vm7 = vmmov 0   ;;  %v803_v8 = vpack.c.bf16 %v2068_v48, %v2066_v47 }
 0x247   : > { %1747 = vmatprep.subr.bf16.mxu0 %v1897_v2  ;;  %1755 = vmatprep.subr.bf16.mxu1 %v1897_v2  ;;  %v1842_v5 = vld [vmem:[%s2028_s20] sm:$0xff]   ;;  %v1843_v10 = vld [vmem:[%s2028_s20 + $0x28] sm:$0xff]  }
 0x248   : > { %1748 = vmatpush3.bf16.msra.mxu0 %v1839_v1  ;;  %1751 = vmatprep.mubr.msk.bf16.mxu0 %vm1898_vm7, %v1897_v2  ;;  %v1844_v11 = vld [vmem:[%s2028_s20 + $0x20] sm:$0xff]  }
 0x249   : > { %1756 = vmatpush3.bf16.msra.mxu1 %v1840_v3  ;;  %1749 = vmatprep.subr.bf16.mxu0 %v1897_v2  ;;  %v1672_v25 = vld [vmem:[%s2018_s0] ss:$0 sm:$0xff] }
 0x24a   : > { %1757 = vmatprep.subr.bf16.mxu1 %v1897_v2  ;;  %1759 = vmatprep.mubr.msk.bf16.mxu1 %vm1898_vm7, %v1897_v2  ;;  %v1673_v55 = vld [vmem:[%s2023_s18] ss:$0 sm:$0xff] }
 0x24b   : > { %v800_v6 = vld [vmem:[#allocation4] sm:$0xff]  ;;  %v801_v7 = vld [vmem:[#allocation4 + $0x8] sm:$0xff] }
 0x24c   : > { %1750 = vmatpush3.bf16.msra.mxu0 %v1841_v4  ;;  %v802_v9 = vpack.c.bf16 %v801_v7, %v800_v6  ;;  %v916_v12 = vld [vmem:[#allocation5] sm:$0xff]  ;;  %v917_v13 = vld [vmem:[#allocation5 + $0x8] sm:$0xff]  ;;  %v1674_v57 = vld [vmem:[%s2033_s11] ss:$0 sm:$0xff] }
 0x24d   : > { %1758 = vmatpush3.bf16.msra.mxu1 %v1842_v5  ;;  %1763 = vmatprep.subr.bf16.mxu0 %v1897_v2  ;;  %v918_v14 = vpack.c.bf16 %v917_v13, %v916_v12 }
 0x24f   : > { %1752 = vmatmul.mubr.msk.bf16.vlgmr.msra.gmra.mxu0 %vm738_vm6, %v803_v8 }
 0x250   : > { %1760 = vmatmul.mubr.msk.bf16.vlgmr.msra.gmra.mxu1 %vm738_vm6, %v802_v9  ;;  %1764 = vmatpush3.bf16.msra.mxu0 %v1843_v10 }
 0x251   : > { %1765 = vmatprep.subr.bf16.mxu0 %v1897_v2  ;;  %1767 = vmatprep.mubr.msk.bf16.mxu0 %vm1898_vm7, %v1897_v2 }
 0x254   : > { %1766 = vmatpush3.bf16.msra.mxu0 %v1844_v11 }
 0x257   : > { %1768 = vmatmul.mubr.msk.bf16.vlgmr.msra.gmra.mxu0 %vm738_vm6, %v918_v14 }
 0x30f   : > { %v853_v15 = vpop.f32.mrf.mxu0 }
 0x310   : > { %v909_v16 = vpop.f32.mrf.mxu1 }
 0x311   : > { %v1753_v17 = vpop.f32.mrf.mxu0  ;;  %v910_v22 = vadd.f32 %v909_v16, %v853_v15 }
 0x312   : > { %v1761_v18 = vpop.f32.mrf.mxu1 }
 0x313   : > { %v856_v19 = vpop.f32.mrf.mxu0 }
 0x314   : > { %v912_v20 = vpop.f32.mrf.mxu1 }
 0x315   : > { %v1754_v21 = vpop.f32.mrf.mxu0  ;;  %v913_v28 = vadd.f32 %v912_v20, %v856_v19 }
 0x316   : > { %v1762_v23 = vpop.f32.mrf.mxu1 }
 0x317   : > { %v968_v24 = vpop.f32.mrf.mxu0 }
 0x318   : > { %v975_v26 = vadd.f32 %v968_v24, %v910_v22 }
 0x319   : > { %v1769_v27 = vpop.f32.mrf.mxu0 }
 0x31a   : > { %v984_v29 = vadd.f32 %v1672_v25, %v975_v26 }
 0x31b   : > { %v971_v30 = vpop.f32.mrf.mxu0 }
 0x31c   : > { %v976_v31 = vadd.f32 %v971_v30, %v913_v28  ;;  %v988_v32 = vsel %vm738_vm6, %v984_v29, 0.0 }
 0x31d   : > { %v1770_v33 = vpop.f32.mrf.mxu0  ;;  %989 = vadd.xlane.f32.xlu0 %v988_v32 }
 0x31e   : > { %v985_v34 = vadd.f32 %v1672_v25, %v976_v31 }
 0x320   : > { %v991_v35 = vsel %vm738_vm6, %v985_v34, 0.0 }
 0x321   : > { %992 = vadd.xlane.f32.xlu0 %v991_v35 }
 0x3a6   : > { %v990_v36 = vpop.xlane.xlu0 %989 }
 0x3a7   : > { %v995_v37 = vmul.f32 0.03125, %v990_v36 }
 0x3a9   : > { %v997_v38 = vsub.f32 %v984_v29, %v995_v37 }
 0x3aa   : > { %v993_v39 = vpop.xlane.xlu0 %992 }
 0x3ab   : > { %v996_v40 = vmul.f32 0.03125, %v993_v39  ;;  %v999_v41 = vmul.f32 %v997_v38, %v997_v38 }
 0x3ad   : > { %v998_v42 = vsub.f32 %v985_v34, %v996_v40  ;;  %v1001_v43 = vsel %vm738_vm6, %v999_v41, 0.0 }
 0x3ae   : > { %1002 = vadd.xlane.f32.xlu1 %v1001_v43 }
 0x3af   : > { %v1000_v44 = vmul.f32 %v998_v42, %v998_v42 }
 0x3b1   : > { %v1004_v45 = vsel %vm738_vm6, %v1000_v44, 0.0 }
 0x3b2   : > { %1005 = vadd.xlane.f32.xlu1 %v1004_v45 }
 0x437   : > { %v1003_v46 = vpop.xlane.xlu1 %1002 }
 0x438   : > { %v1007_v49 = vmul.f32 0.03125, %v1003_v46 }
 0x43a   : > { %v1009_v50 = vadd.f32 1e-05, %v1007_v49 }
 0x43b   : > { %v1006_v51 = vpop.xlane.xlu1 %1005 }
 0x43c   : > { %1845 = vrsqrt.f32 %v1009_v50  ;;  %v1008_v52 = vmul.f32 0.03125, %v1006_v51 }
 0x43e   : > { %v1010_v53 = vadd.f32 1e-05, %v1008_v52 }
 0x440   : > { %1847 = vrsqrt.f32 %v1010_v53 }
 0x449   : > { %v1846_v54 = vpop.eup %1845 }
 0x44a   : > { %v1013_v56 = vmul.f32 %v1846_v54, %v997_v38 }
 0x44c   : > { %v1021_v58 = vmul.f32 %v1673_v55, %v1013_v56 }
 0x44d   : > { %v1848_v59 = vpop.eup %1847 }
 0x44e   : > { %v1029_v60 = vadd.f32 %v1674_v57, %v1021_v58  ;;  %v1014_v61 = vmul.f32 %v1848_v59, %v998_v42 }
 0x450   : > { %vm1031_vm8 = vcmp.gt.f32.partialorder %v1029_v60, 0.0  ;;  %v1033_v62 = vmul.f32 0.2, %v1029_v60  ;;  %v1022_v63 = vmul.f32 %v1673_v55, %v1014_v61 }
 0x452   : > { %v2131_v0 = vsel %vm1031_vm8, %v1029_v60, %v1033_v62  ;;  %v1030_v1 = vadd.f32 %v1674_v57, %v1022_v63 }
 0x453   : > { %1037 = vst.msk [vmem:[#allocation3 + $0x8] sm:$0xff] %vm738_vm6, %v2131_v0  ;;  %1041 = sbr.rel (%p1654_p5) target bundleno = 1121 (0x461), region = 108 }
 0x454   : > { %vm1032_vm9 = vcmp.gt.f32.partialorder %v1030_v1, 0.0  ;;  %v1034_v3 = vmul.f32 0.2, %v1030_v1 }
 0x456   : > { %v2135_v4 = vsel %vm1032_vm9, %v1030_v1, %v1034_v3 }
 0x457   : > { %1038 = vst.msk [vmem:[#allocation3 + $0x20] sm:$0xff] %vm738_vm6, %v2135_v4 }
 0x45a   : > { %v1042_v5 = vld [vmem:[#allocation3 + $0x7] sm:$0xff] }
 0x45b   : > { %v1046_v7 = vld [vmem:[#allocation3 + $0x9] sm:$0xff]  ;;  %1044 = vst.msk [vmem:[#allocation4] sm:$0xff] %vm738_vm6, %v1042_v5 }
 0x45c   : > { %1048 = vst.msk [vmem:[#allocation5] sm:$0xff] %vm738_vm6, %v1046_v7 }
 0x45e   : > { %v1043_v6 = vld [vmem:[#allocation3 + $0x1f] sm:$0xff] }
 0x45f   : > { %1045 = vst.msk [vmem:[#allocation4 + $0x8] sm:$0xff] %vm738_vm6, %v1043_v6  ;;  %v1047_v8 = vld [vmem:[#allocation3 + $0x21] sm:$0xff] }
 0x460   : > { %1049 = vst.msk [vmem:[#allocation5 + $0x8] sm:$0xff] %vm738_vm6, %v1047_v8 }
 0x461 PF: > { %1052 = sbr.rel (%p1660_p6) target bundleno = 1130 (0x46a), region = 112 }
 0x466   : > { %v1053_v9 = vld [vmem:[#allocation3 + $0x6] sm:$0xff] }
 0x467   : > { %v1054_v10 = vld [vmem:[#allocation3 + $0x1e] sm:$0xff]  ;;  %v1057_v11 = vld [vmem:[#allocation3 + $0xa] sm:$0xff]  ;;  %1055 = vst.msk [vmem:[#allocation4] sm:$0xff] %vm738_vm6, %v1053_v9 }
 0x468   : > { %1056 = vst.msk [vmem:[#allocation4 + $0x8] sm:$0xff] %vm738_vm6, %v1054_v10  ;;  %1059 = vst.msk [vmem:[#allocation5] sm:$0xff] %vm738_vm6, %v1057_v11  ;;  %v1058_v12 = vld [vmem:[#allocation3 + $0x22] sm:$0xff] }
 0x469   : > { %1060 = vst.msk [vmem:[#allocation5 + $0x8] sm:$0xff] %vm738_vm6, %v1058_v12 }
 0x46a PF: > { %1063 = sbr.rel (%p1661_p7) target bundleno = 1138 (0x472), region = 116 }
 0x46f   : > { %v1064_v13 = vld [vmem:[#allocation3 + $0x4] sm:$0xff]  ;;  %v1065_v14 = vld [vmem:[#allocation3 + $0x1c] sm:$0xff]  ;;  %v1068_v15 = vld [vmem:[#allocation3 + $0xc] sm:$0xff] }
 0x470   : > { %1066 = vst.msk [vmem:[#allocation4] sm:$0xff] %vm738_vm6, %v1064_v13  ;;  %1067 = vst.msk [vmem:[#allocation4 + $0x8] sm:$0xff] %vm738_vm6, %v1065_v14  ;;  %v1069_v16 = vld [vmem:[#allocation3 + $0x24] sm:$0xff] }
 0x471   : > { %1070 = vst.msk [vmem:[#allocation5] sm:$0xff] %vm738_vm6, %v1068_v15  ;;  %1071 = vst.msk [vmem:[#allocation5 + $0x8] sm:$0xff] %vm738_vm6, %v1069_v16 }
 0x472 PF: > { %1074 = sbr.rel (%p1662_p8) target bundleno = 1146 (0x47a), region = 120 }
 0x477   : > { %v1075_v17 = vld [vmem:[#allocation3] sm:$0xff]  ;;  %v1076_v18 = vld [vmem:[#allocation3 + $0x18] sm:$0xff]  ;;  %v1079_v19 = vld [vmem:[#allocation3 + $0x10] sm:$0xff] }
 0x478   : > { %1077 = vst.msk [vmem:[#allocation4] sm:$0xff] %vm738_vm6, %v1075_v17  ;;  %1078 = vst.msk [vmem:[#allocation4 + $0x8] sm:$0xff] %vm738_vm6, %v1076_v18  ;;  %v1080_v20 = vld [vmem:[#allocation3 + $0x28] sm:$0xff] }
 0x479   : > { %1081 = vst.msk [vmem:[#allocation5] sm:$0xff] %vm738_vm6, %v1079_v19  ;;  %1082 = vst.msk [vmem:[#allocation5 + $0x8] sm:$0xff] %vm738_vm6, %v1080_v20 }
 0x47a PF: > { %1771 = vmatprep.subr.bf16.mxu1 %v1897_v2  ;;  %1779 = vmatprep.subr.bf16.mxu0 %v1897_v2  ;;  %v1849_v21 = vld [vmem:[%s2028_s20 + $0x48] sm:$0xff]   ;;  %v1850_v22 = vld [vmem:[%s2028_s20 + $0x38] sm:$0xff]   ;;  %v1851_v23 = vld [vmem:[%s2028_s20 + $0x40] sm:$0xff]   ;;  %v1099_v27 = vpack.c.bf16 %v2135_v4, %v2131_v0 }
 0x47b   : > { %1775 = vmatprep.mubr.msk.bf16.mxu1 %vm1898_vm7, %v1897_v2  ;;  %1783 = vmatprep.mubr.msk.bf16.mxu0 %vm1898_vm7, %v1897_v2  ;;  %v1852_v24 = vld [vmem:[%s2028_s20 + $0x30] sm:$0xff]   ;;  %v1853_v29 = vld [vmem:[%s2028_s20 + $0x58] sm:$0xff]   ;;  %v1701_v44 = vld [vmem:[%s2018_s0 + $0x1] ss:$0 sm:$0xff] }
 0x47c   : > { %1772 = vmatpush3.bf16.msra.mxu1 %v1849_v21  ;;  %1780 = vmatpush3.bf16.msra.mxu0 %v1850_v22  ;;  %v1854_v30 = vld [vmem:[%s2028_s20 + $0x50] sm:$0xff]   ;;  %v1704_v10 = vld [vmem:[%s2023_s18 + $0x1] ss:$0 sm:$0xff] }
 0x47d   : > { %1773 = vmatprep.subr.bf16.mxu1 %v1897_v2  ;;  %1781 = vmatprep.subr.bf16.mxu0 %v1897_v2  ;;  %v1705_v12 = vld [vmem:[%s2033_s11 + $0x1] ss:$0 sm:$0xff] }
 0x47f   : > { %v1096_v25 = vld [vmem:[#allocation4] sm:$0xff]  ;;  %v1097_v26 = vld [vmem:[#allocation4 + $0x8] sm:$0xff] }
 0x480   : > { %1774 = vmatpush3.bf16.msra.mxu1 %v1851_v23  ;;  %v1098_v28 = vpack.c.bf16 %v1097_v26, %v1096_v25  ;;  %1782 = vmatpush3.bf16.msra.mxu0 %v1852_v24  ;;  %v1212_v31 = vld [vmem:[#allocation5] sm:$0xff]  ;;  %v1213_v32 = vld [vmem:[#allocation5 + $0x8] sm:$0xff] }
 0x481   : > { %1787 = vmatprep.subr.bf16.mxu1 %v1897_v2  ;;  %v1214_v33 = vpack.c.bf16 %v1213_v32, %v1212_v31 }
 0x483   : > { %1776 = vmatmul.mubr.msk.bf16.vlgmr.msra.gmra.mxu1 %vm738_vm6, %v1099_v27  ;;  %1784 = vmatmul.mubr.msk.bf16.vlgmr.msra.gmra.mxu0 %vm738_vm6, %v1098_v28 }
 0x484   : > { %1788 = vmatpush3.bf16.msra.mxu1 %v1853_v29  ;;  %1791 = vmatprep.mubr.msk.bf16.mxu1 %vm1898_vm7, %v1897_v2 }
 0x485   : > { %1789 = vmatprep.subr.bf16.mxu1 %v1897_v2 }
 0x488   : > { %1790 = vmatpush3.bf16.msra.mxu1 %v1854_v30 }
 0x48b   : > { %1792 = vmatmul.mubr.msk.bf16.vlgmr.msra.gmra.mxu1 %vm738_vm6, %v1214_v33 }
 0x543   : > { %v1149_v34 = vpop.f32.mrf.mxu1  ;;  %v1205_v35 = vpop.f32.mrf.mxu0 }
 0x544   : > { %v1206_v41 = vadd.f32 %v1205_v35, %v1149_v34 }
 0x545   : > { %v1777_v36 = vpop.f32.mrf.mxu1  ;;  %v1785_v37 = vpop.f32.mrf.mxu0 }
 0x547   : > { %v1152_v38 = vpop.f32.mrf.mxu1  ;;  %v1208_v39 = vpop.f32.mrf.mxu0 }
 0x548   : > { %v1209_v49 = vadd.f32 %v1208_v39, %v1152_v38 }
 0x549   : > { %v1778_v40 = vpop.f32.mrf.mxu1  ;;  %v1786_v42 = vpop.f32.mrf.mxu0 }
 0x54b   : > { %v1264_v43 = vpop.f32.mrf.mxu1 }
 0x54c   : > { %v1271_v45 = vadd.f32 %v1264_v43, %v1206_v41 }
 0x54d   : > { %v1793_v46 = vpop.f32.mrf.mxu1 }
 0x54e   : > { %v1281_v50 = vadd.f32 %v1701_v44, %v1271_v45 }
 0x54f   : > { %v1267_v2 = vpop.f32.mrf.mxu1 }
 0x550   : > { %v1272_v51 = vadd.f32 %v1267_v2, %v1209_v49  ;;  %v1287_v52 = vsel %vm738_vm6, %v1281_v50, 0.0 }
 0x551   : > { %v1794_v53 = vpop.f32.mrf.mxu1  ;;  %1288 = vadd.xlane.f32.xlu0 %v1287_v52 }
 0x552   : > { %v1282_v54 = vadd.f32 %v1701_v44, %v1272_v51 }
 0x554   : > { %v1290_v55 = vsel %vm738_vm6, %v1282_v54, 0.0 }
 0x555   : > { %1291 = vadd.xlane.f32.xlu0 %v1290_v55 }
 0x5da   : > { %v1289_v56 = vpop.xlane.xlu0 %1288 }
 0x5db   : > { %v1293_v57 = vmul.f32 0.03125, %v1289_v56 }
 0x5dd   : > { %v1295_v58 = vsub.f32 %v1281_v50, %v1293_v57 }
 0x5de   : > { %v1292_v59 = vpop.xlane.xlu0 %1291 }
 0x5df   : > { %v1294_v60 = vmul.f32 0.03125, %v1292_v59  ;;  %v1297_v61 = vmul.f32 %v1295_v58, %v1295_v58 }
 0x5e1   : > { %v1296_v62 = vsub.f32 %v1282_v54, %v1294_v60  ;;  %v1299_v63 = vsel %vm738_vm6, %v1297_v61, 0.0 }
 0x5e2   : > { %1300 = vadd.xlane.f32.xlu1 %v1299_v63 }
 0x5e3   : > { %v1298_v0 = vmul.f32 %v1296_v62, %v1296_v62 }
 0x5e5   : > { %v1302_v1 = vsel %vm738_vm6, %v1298_v0, 0.0 }
 0x5e6   : > { %1303 = vadd.xlane.f32.xlu1 %v1302_v1 }
 0x66b   : > { %v1301_v3 = vpop.xlane.xlu1 %1300 }
 0x66c   : > { %v1305_v4 = vmul.f32 0.03125, %v1301_v3 }
 0x66e   : > { %v1307_v5 = vadd.f32 1e-05, %v1305_v4 }
 0x66f   : > { %v1304_v6 = vpop.xlane.xlu1 %1303 }
 0x670   : > { %1855 = vrsqrt.f32 %v1307_v5  ;;  %v1306_v7 = vmul.f32 0.03125, %v1304_v6 }
 0x672   : > { %v1308_v8 = vadd.f32 1e-05, %v1306_v7 }
 0x674   : > { %1857 = vrsqrt.f32 %v1308_v8 }
 0x67d   : > { %v1856_v9 = vpop.eup %1855 }
 0x67e   : > { %v1311_v11 = vmul.f32 %v1856_v9, %v1295_v58 }
 0x680   : > { %v1319_v13 = vmul.f32 %v1704_v10, %v1311_v11 }
 0x681   : > { %v1858_v14 = vpop.eup %1857 }
 0x682   : > { %v1327_v15 = vadd.f32 %v1705_v12, %v1319_v13  ;;  %v1312_v16 = vmul.f32 %v1858_v14, %v1296_v62 }
 0x684   : > { %v1329_v17 = vadd.f32 %v1327_v15, %v2066_v47  ;;  %v1320_v18 = vmul.f32 %v1704_v10, %v1312_v16 }
 0x686   : > { %vm1331_vm10 = vcmp.gt.f32.partialorder %v1329_v17, 0.0  ;;  %v1333_v19 = vmul.f32 0.2, %v1329_v17  ;;  %v1328_v20 = vadd.f32 %v1705_v12, %v1320_v18 }
 0x688   : > { %v2194_v21 = vsel %vm1331_vm10, %v1329_v17, %v1333_v19  ;;  %v1330_v22 = vadd.f32 %v1328_v20, %v2068_v48 }
 0x689   : > { %1337 = vst.msk [vmem:[#allocation2] sm:$0xff] %vm738_vm6, %v2194_v21  ;;  %1341 = sbr.rel (%p1662_p8) target bundleno = 2498 (0x9c2), region = 124 }
 0x68a   : > { %vm1332_vm11 = vcmp.gt.f32.partialorder %v1330_v22, 0.0  ;;  %v1334_v23 = vmul.f32 0.2, %v1330_v22 }
 0x68c   : > { %v2199_v24 = vsel %vm1332_vm11, %v1330_v22, %v1334_v23 }
 0x68d   : > { %1338 = vst.msk [vmem:[#allocation2 + $0x8] sm:$0xff] %vm738_vm6, %v2199_v24 }
 0x68e   : > { %v1707_v47 = vld [vmem:[%s2255_s10] ss:$0 sm:$0xff]  ;;  %v1899_v28 = vmov 0   ;;  %vm1366_vm12 = vcmask 7168   ;;  %v1861_v10 = vld [vmem:[%s2256_s12 + $0x8] sm:$0xff]   ;;  %v1900_v11 = vmov 0.0  }
 0x68f   : > { %v1349_v25 = vmul.f32 %v1707_v47, %v2194_v21  ;;  %v1350_v48 = vmul.f32 %v1707_v47, %v2199_v24  ;;  %1859 = vset.pattern.permute.xlu1 %v1899_v28  ;;  %1860 = vset.pattern.permute.xlu0 %v1899_v28  ;;  %v1708_v29 = vld [vmem:[#allocation7] ss:$0 sm:$0xff]  ;;  %vm1901_vm13 = vmmov 0   ;;  %vm1448_vm14 = vcmask 1041409  }
 0x690   : > { %1795 = vmatprep.subr.bf16.mxu0 %v1900_v11  ;;  %v1862_v12 = vld [vmem:[%s2256_s12] sm:$0xff]   ;;  %1799 = vmatprep.mubr.msk.bf16.mxu0 %vm1901_vm13, %v1900_v11  ;;  %vm1517_vm0 = vcmask 254976  }
 0x691   : > { %v1351_v26 = vsel %vm738_vm6, %v1349_v25, 0.0  ;;  %v1354_v27 = vsel %vm738_vm6, %v1350_v48, 0.0  ;;  %1796 = vmatpush3.bf16.msra.mxu0 %v1861_v10 }
 0x692   : > { %1352 = vadd.xlane.f32.xlu0 %v1351_v26  ;;  %1797 = vmatprep.subr.bf16.mxu0 %v1900_v11 }
 0x695   : > { %1798 = vmatpush3.bf16.msra.mxu0 %v1862_v12 }
 0x696   : > { %1355 = vadd.xlane.f32.xlu0 %v1354_v27 }
 0x71b   : > { %v1353_v30 = vpop.xlane.xlu0 %1352 }
 0x71c   : > { %v1364_v31 = vadd.f32 %v1708_v29, %v1353_v30 }
 0x71e   : > { %v1367_v32 = vsel %vm1366_vm12, %v1364_v31, -inf }
 0x71f   : > { %v1368_v33 = vrot.slane %v1367_v32, 4  ;;  %v1356_v34 = vpop.xlane.xlu0 %1355 }
 0x720   : > { %v1365_v35 = vadd.f32 %v1708_v29, %v1356_v34 }
 0x721   : > { %v1369_v36 = vmax.f32 %v1367_v32, %v1368_v33 }
 0x722   : > { %v1374_v37 = vsel %vm1366_vm12, %v1365_v35, -inf }
 0x723   : > { %v1370_v38 = vrot.slane %v1369_v36, 2  ;;  %v1375_v39 = vrot.slane %v1374_v37, 4 }
 0x725   : > { %v1371_v40 = vmax.f32 %v1369_v36, %v1370_v38  ;;  %v1376_v41 = vmax.f32 %v1374_v37, %v1375_v39 }
 0x727   : > { %v1372_v42 = vrot.slane %v1371_v40, 1  ;;  %v1377_v43 = vrot.slane %v1376_v41, 2 }
 0x729   : > { %v1373_v44 = vmax.f32 %v1371_v40, %v1372_v42  ;;  %v1378_v45 = vmax.f32 %v1376_v41, %v1377_v43  ;;  %v1713_v40 = vld [vmem:[%s2258_s14] ss:$0 sm:$0xff] }
 0x72b   : > { %v1381_v46 = vsub.f32 %v1364_v31, %v1373_v44  ;;  %v1379_v49 = vrot.slane %v1378_v45, 1 }
 0x72d   : > { %v1383_v50 = vmul.f32 1.442695, %v1381_v46  ;;  %v1380_v2 = vmax.f32 %v1378_v45, %v1379_v49  ;;  %v1714_v46 = vld [vmem:[#allocation8] ss:$0 sm:$0xff] }
 0x72f   : > { %1863 = vpow2.f32 %v1383_v50  ;;  %v1382_v51 = vsub.f32 %v1365_v35, %v1380_v2  ;;  %v1709_v35 = vld [vmem:[%s2257_s13] ss:$0 sm:$0xff] }
 0x731   : > { %v1385_v52 = vmul.f32 1.442695, %v1382_v51 }
 0x733   : > { %1865 = vpow2.f32 %v1385_v52 }
 0x73c   : > { %v1864_v53 = vpop.eup %1863 }
 0x73d   : > { %v1387_v54 = vsel %vm1366_vm12, %v1864_v53, 0.0 }
 0x73e   : > { %v1388_v55 = vrot.slane %v1387_v54, 4 }
 0x740   : > { %v1866_v56 = vpop.eup %1865  ;;  %v1389_v57 = vadd.f32 %v1388_v55, %v1387_v54 }
 0x741   : > { %v1394_v58 = vsel %vm1366_vm12, %v1866_v56, 0.0 }
 0x742   : > { %v1390_v59 = vrot.slane %v1389_v57, 2  ;;  %v1395_v60 = vrot.slane %v1394_v58, 4 }
 0x744   : > { %v1391_v61 = vadd.f32 %v1390_v59, %v1389_v57  ;;  %v1396_v62 = vadd.f32 %v1395_v60, %v1394_v58 }
 0x746   : > { %v1392_v63 = vrot.slane %v1391_v61, 1  ;;  %v1397_v0 = vrot.slane %v1396_v62, 2 }
 0x748   : > { %v1393_v1 = vadd.f32 %v1392_v63, %v1391_v61  ;;  %v1398_v3 = vadd.f32 %v1397_v0, %v1396_v62 }
 0x74a   : > { %1867 = vrcp.f32 %v1393_v1  ;;  %v1399_v4 = vrot.slane %v1398_v3, 1 }
 0x74c   : > { %v1400_v5 = vadd.f32 %v1399_v4, %v1398_v3 }
 0x74e   : > { %1869 = vrcp.f32 %v1400_v5 }
 0x757   : > { %v1868_v6 = vpop.eup %1867 }
 0x758   : > { %v1403_v7 = vmul.f32 %v1868_v6, %v1864_v53 }
 0x75a   : > { %1407 = vperm.xlu1 %1859, %v1403_v7  }
 0x75b   : > { %v1870_v8 = vpop.eup %1869 }
 0x75c   : > { %v1404_v9 = vmul.f32 %v1870_v8, %v1866_v56 }
 0x75e   : > { %1412 = vperm.xlu1 %1859, %v1404_v9  }
 0x7d5   : > { %v1408_v13 = vpop.permute.xlu1 %1407 }
 0x7d6   : > { %v1415_v14 = vmul.f32 %v1408_v13, %v2194_v21 }
 0x7d8   : > { %v1417_v15 = vsel %vm738_vm6, %v1415_v14, 0.0 }
 0x7d9   : > { %v1418_v16 = vrot.slane %v1417_v15, 4  ;;  %v1413_v17 = vpop.permute.xlu1 %1412 }
 0x7da   : > { %v1416_v18 = vmul.f32 %v1413_v17, %v2199_v24 }
 0x7db   : > { %v1419_v19 = vadd.f32 %v1418_v16, %v1417_v15 }
 0x7dc   : > { %v1424_v20 = vsel %vm738_vm6, %v1416_v18, 0.0 }
 0x7dd   : > { %v1420_v22 = vrot.slane %v1419_v19, 2  ;;  %v1425_v23 = vrot.slane %v1424_v20, 4 }
 0x7df   : > { %v1421_v47 = vadd.f32 %v1420_v22, %v1419_v19  ;;  %v1426_v25 = vadd.f32 %v1425_v23, %v1424_v20 }
 0x7e1   : > { %v1422_v48 = vrot.slane %v1421_v47, 1  ;;  %v1427_v26 = vrot.slane %v1426_v25, 2 }
 0x7e3   : > { %v1423_v27 = vadd.f32 %v1422_v48, %v1421_v47  ;;  %v1428_v28 = vadd.f32 %v1427_v26, %v1426_v25 }
 0x7e5   : > { %v1429_v29 = vrot.slane %v1428_v28, 1  ;;  %v1435_v30 = vpack.c.bf16 %v1423_v27, %v1423_v27 }
 0x7e7   : > { %v1430_v21 = vadd.f32 %v1429_v29, %v1428_v28  ;;  %v1446_v32 = vunpack.c.l.b16 %v1435_v30 }
 0x7e9   : > { %v1436_v31 = vpack.c.bf16 %v1430_v21, %v1430_v21 }
 0x7eb   : > { %v1447_v33 = vunpack.c.l.b16 %v1436_v31 }
 0x7ed   : > { %v1449_v34 = vsel %vm1448_vm14, %v1447_v33, %v1446_v32 }
 0x7ee   : > { %v1450_v24 = vpack.c.b16 %v1449_v34, %v1449_v34 }
 0x7f0   : > { %1800 = vmatmul.mubr.msk.bf16.vlgmr.msra.gmra.mxu0 %vm738_vm6, %v1450_v24 }
 0x8b0   : > { %v1500_v36 = vpop.f32.mrf.mxu0 }
 0x8b1   : > { %v1501_v37 = vadd.f32 %v1709_v35, %v1500_v36 }
 0x8b2   : > { %v1801_v38 = vpop.f32.mrf.mxu0 }
 0x8b3   : > { %vm1506_vm15 = vcmp.gt.f32.partialorder %v1501_v37, 0.0  ;;  %v1507_v39 = vmul.f32 0.2, %v1501_v37 }
 0x8b4   : > { %v1503_v41 = vpop.f32.mrf.mxu0 }
 0x8b5   : > { %v1508_v42 = vsel %vm1506_vm15, %v1501_v37, %v1507_v39 }
 0x8b6   : > { %v1802_v43 = vpop.f32.mrf.mxu0  ;;  %v1516_v44 = vmul.f32 %v1713_v40, %v1508_v42 }
 0x8b8   : > { %v1518_v45 = vsel %vm1517_vm0, %v1516_v44, 0.0 }
 0x8b9   : > { %1519 = vadd.xlane.f32.xlu0 %v1518_v45 }
 0x942   : > { %v1520_v49 = vpop.xlane.xlu0 %1519 }
 0x943   : > { %v1528_v50 = vadd.f32 %v1714_v46, %v1520_v49 }
 0x945   : > { %1531 = vperm.xlu1 %1859, %v1528_v50  }
 0x9c0   : > { %v1532_v2 = vpop.permute.xlu1 %1531 }
 0x9c1   : > { %1534 = vst [vmem:[%s2259_s16] sm:$0x3] %v1532_v2 }
 0x9c2 PF: > { %s32_s25 = sadd.s32 1, %s1893_s25   ;;  %s2266_s22 = sld [smem:[#allocation9_spill]] }
 0x9c3   : > { %p29_p9 = scmp.ge.s32.totalorder %s32_s25, 6   ;;  %s2267_s23 = smov %s1889_s24 }
 0x9c5   :  { %31 = sbr.rel (!%p29_p9) target bundleno = 3 (0x3), region = 170 }
 0x9c8   : > { %s2268_s24 = smov %s2266_s22 }

</bundles_post_ra>
